<compile_context>
chip_gen: v7x
topology: tpu7x:2x2x1
jax: 0.10.0
libtpu: 0.0.40
codegen_flags: <defaults>
</compile_context>

<pallas_src>
import functools

import jax
import jax.numpy as jnp
from jax import lax
from jax.experimental import pallas as pl
from jax.experimental.pallas import tpu as pltpu


# ------------------------------ Pallas kernels --------------------------------

def _mm_relu_kernel(p_ref, w_ref, o_ref, *, relu):
    """o = act(w @ p).  p: (K, M) im2col patches (row 0 = ones -> bias),
    w: (N, K) prepared weight (col 0 = bias), o: (N, M), M = B*Ho*Wo."""
    y = jnp.dot(w_ref[...], p_ref[...], preferred_element_type=jnp.float32)
    if relu:
        y = jnp.maximum(y, 0.0)
    o_ref[...] = y


def _mm2_relu_kernel(pa_ref, pb_ref, wa_ref, wb_ref, o_ref, *, relu):
    """Split-K version for decoder skip connections (replaces torch.cat):
    o = act(wa @ pa + wb @ pb)."""
    y = jnp.dot(wa_ref[...], pa_ref[...], preferred_element_type=jnp.float32)
    y = y + jnp.dot(wb_ref[...], pb_ref[...], preferred_element_type=jnp.float32)
    if relu:
        y = jnp.maximum(y, 0.0)
    o_ref[...] = y


def _matmul_call(p, w2, *, relu):
    K, M = p.shape
    N = w2.shape[0]
    return pl.pallas_call(
        functools.partial(_mm_relu_kernel, relu=relu),
        out_shape=jax.ShapeDtypeStruct((N, M), jnp.float32),
        cost_estimate=pl.CostEstimate(
            flops=2 * N * K * M,
            transcendentals=0,
            bytes_accessed=4 * (K * M + N * K + N * M)),
    )(p, w2)


def _matmul2_call(pa, pb, wa2, wb2, *, relu):
    Ka, M = pa.shape
    Kb = pb.shape[0]
    N = wa2.shape[0]
    return pl.pallas_call(
        functools.partial(_mm2_relu_kernel, relu=relu),
        out_shape=jax.ShapeDtypeStruct((N, M), jnp.float32),
        cost_estimate=pl.CostEstimate(
            flops=2 * N * (Ka + Kb) * M,
            transcendentals=0,
            bytes_accessed=4 * ((Ka + Kb) * M + N * (Ka + Kb) + N * M)),
    )(pa, pb, wa2, wb2)


# ------------------- layout plumbing (XLA, wrapper side) ---------------------

def _im2col_cm(xpad, Ho, Wo, *, with_ones):
    """xpad: (C, B, Hp, Wp) channel-major, spatially padded.
    Returns ([1+]9*C, B*Ho*Wo); row 0 is ones (bias row) when with_ones."""
    C, B = xpad.shape[0], xpad.shape[1]
    taps = []
    if with_ones:
        taps.append(jnp.ones((1, B, Ho, Wo), xpad.dtype))
    taps += [xpad[:, :, ky:ky + Ho, kx:kx + Wo]
             for ky in range(3) for kx in range(3)]
    return jnp.concatenate(taps, axis=0).reshape(-1, B * Ho * Wo)


def conv_block(x_cm, w2, *, relu, pool=False):
    """'same' 3x3 conv. x_cm: (Cin, B, H, W). w2: (Cout, 1+9*Cin) prepared."""
    _, B, H, W = x_cm.shape
    Cout = w2.shape[0]
    xpad = jnp.pad(x_cm, ((0, 0), (0, 0), (1, 1), (1, 1)))
    patches = _im2col_cm(xpad, H, W, with_ones=True)
    y = _matmul_call(patches, w2, relu=relu)            # (Cout, B*H*W)
    y = y.reshape(Cout, B, H, W)
    if pool:
        # relu already applied in-kernel; pool(relu(z)) == relu(pool(z)).
        y = y.reshape(Cout, B, H // 2, 2, W // 2, 2).max(axis=(3, 5))
    return y


_DILATE_PAD = ((0, 0, 0), (0, 0, 0), (1, 2, 1), (1, 2, 1))


def convT_block(a_cm, b_cm, wa2, wb2, *, relu=True):
    """ConvTranspose2d(stride=2, padding=1, output_padding=1, k=3) applied to
    channel-concat([a, b]) without materializing the concat (split-K).
    a_cm/b_cm: (Ca/Cb, B, H, W) -> output (Cout, B, 2H, 2W).
    Equivalent to a valid 3x3 conv of the zero-dilated (interior=1),
    (low=1, high=2)-padded input with flipped, channel-swapped weights."""
    _, B, H, W = a_cm.shape
    Ho, Wo = 2 * H, 2 * W
    Cout = wa2.shape[0]
    a_d = lax.pad(a_cm, jnp.float32(0.0), _DILATE_PAD)   # (Ca, B, Ho+2, Wo+2)
    b_d = lax.pad(b_cm, jnp.float32(0.0), _DILATE_PAD)
    pa = _im2col_cm(a_d, Ho, Wo, with_ones=True)
    pb = _im2col_cm(b_d, Ho, Wo, with_ones=False)
    y = _matmul2_call(pa, pb, wa2, wb2, relu=relu)       # (Cout, B*Ho*Wo)
    return y.reshape(Cout, B, Ho, Wo)


# ------------------------------- model forward -------------------------------

def unet_forward(x, p):
    """x: (B, C=1, H, W) NCHW, H and W divisible by 16."""
    xc = jnp.transpose(x, (1, 0, 2, 3))                  # channel-major CBHW
    d0 = conv_block(xc, p['encoder_init'], relu=True)
    d1 = conv_block(d0, p['encoder01'], relu=True, pool=True)
    d2 = conv_block(d1, p['encoder02'], relu=True, pool=True)
    d3 = conv_block(d2, p['encoder03'], relu=True, pool=True)
    d4 = conv_block(d3, p['encoder04'], relu=True, pool=True)
    base = conv_block(d4, p['base'], relu=True)
    u4 = convT_block(base, d4, *p['decoder04'], relu=True)
    u3 = convT_block(u4, d3, *p['decoder03'], relu=True)
    u2 = convT_block(u3, d2, *p['decoder02'], relu=True)
    u1 = convT_block(u2, d1, *p['decoder01'], relu=True)
    out = conv_block(u1, p['decoder_outp'], relu=False)
    return jnp.transpose(out, (1, 0, 2, 3))              # back to NCHW


# --------------------- one-time parameter preparation -------------------------
# (hoisted out of the forward: conv weight reshape, conv-transpose flip +
#  channel swap, and bias folded in as column 0)

def prep_conv(w, b):
    """torch Conv2d weight (Cout, Cin, 3, 3), bias (Cout,) -> (Cout, 1+9*Cin).
    Column order matches _im2col_cm: [bias, (ky,kx)-major, ci-minor]."""
    Cout, Cin = w.shape[:2]
    w2 = jnp.transpose(w, (0, 2, 3, 1)).reshape(Cout, 9 * Cin)
    return jnp.concatenate([b[:, None], w2], axis=1)


def prep_convT(wt, b, *, ca):
    """torch ConvTranspose2d weight (Cin, Cout, 3, 3), bias (Cout,).
    Returns (wa2, wb2) for split-K where the conv input is concat([a, b]) with
    a having `ca` channels.  Equivalent conv weight = flip + channel swap."""
    w_conv = jnp.transpose(jnp.flip(wt, axis=(2, 3)), (1, 0, 2, 3))  # (Cout, Cin, 3, 3)
    Cout = w_conv.shape[0]
    cb = w_conv.shape[1] - ca
    wa2 = jnp.transpose(w_conv[:, :ca], (0, 2, 3, 1)).reshape(Cout, 9 * ca)
    wb2 = jnp.transpose(w_conv[:, ca:], (0, 2, 3, 1)).reshape(Cout, 9 * cb)
    wa2 = jnp.concatenate([b[:, None], wa2], axis=1)     # bias rides on the a-path
    return wa2, wb2


# ---------------------------- deterministic params ---------------------------

def _init_conv_raw(key, cin, cout):
    k1, k2 = jax.random.split(key)
    bound = float((cin * 9.0) ** -0.5)
    w = jax.random.uniform(k1, (cout, cin, 3, 3), jnp.float32, -bound, bound)
    b = jax.random.uniform(k2, (cout,), jnp.float32, -bound, bound)
    return w, b


def _init_convT_raw(key, cin, cout):
    k1, k2 = jax.random.split(key)
    bound = float((cin * 9.0) ** -0.5)
    w = jax.random.uniform(k1, (cin, cout, 3, 3), jnp.float32, -bound, bound)  # torch layout
    b = jax.random.uniform(k2, (cout,), jnp.float32, -bound, bound)
    return w, b


def make_params(key):
    ks = jax.random.split(key, 11)
    p = {
        'encoder_init': prep_conv(*_init_conv_raw(ks[0], 1, 1)),
        'encoder01':    prep_conv(*_init_conv_raw(ks[1], 1, 5)),
        'encoder02':    prep_conv(*_init_conv_raw(ks[2], 5, 10)),
        'encoder03':    prep_conv(*_init_conv_raw(ks[3], 10, 20)),
        'encoder04':    prep_conv(*_init_conv_raw(ks[4], 20, 40)),
        'base':         prep_conv(*_init_conv_raw(ks[5], 40, 40)),
        'decoder04':    prep_convT(*_init_convT_raw(ks[6], 80, 20), ca=40),
        'decoder03':    prep_convT(*_init_convT_raw(ks[7], 40, 10), ca=20),
        'decoder02':    prep_convT(*_init_convT_raw(ks[8], 20, 5), ca=10),
        'decoder01':    prep_convT(*_init_convT_raw(ks[9], 10, 1), ca=5),
        'decoder_outp': prep_conv(*_init_conv_raw(ks[10], 1, 1)),
    }
    return p


if __name__ == "__main__":
    key = jax.random.PRNGKey(0)
    k_params, k_x = jax.random.split(key)
    params = make_params(k_params)      # one-time prep, outside the forward

    # Input: (B, C, H, W), C=1 (encoder_init expects 1 channel), H=W divisible by 16.
    x = jax.random.normal(k_x, (2, 1, 32, 32), jnp.float32)

    out = jax.jit(unet_forward)(x, params)
    out = jax.block_until_ready(out)
    assert out.shape == (2, 1, 32, 32), out.shape
    assert bool(jnp.all(jnp.isfinite(out)))
    print("KERNEL_OK")
</pallas_src>

<mosaic_0001>
module attributes {stable_mosaic.version = 11 : i64} {
  func.func @_mm_relu_kernel(%arg0: memref<10x2048xf32, #tpu.memory_space<vmem>>, %arg1: memref<1x10xf32, #tpu.memory_space<vmem>>, %arg2: memref<1x2048xf32, #tpu.memory_space<vmem>>) attributes {dimension_semantics = [], scalar_prefetch = 0 : i64, scratch_operands = 0 : i64, tpu.core_type = #tpu.core_type<tc>} {
    %c0 = arith.constant 0 : index
    %c0_0 = arith.constant 0 : index
    %0 = vector.load %arg1[%c0, %c0_0] : memref<1x10xf32, #tpu.memory_space<vmem>>, vector<1x10xf32>
    %c0_1 = arith.constant 0 : index
    %c0_2 = arith.constant 0 : index
    %1 = vector.load %arg0[%c0_1, %c0_2] : memref<10x2048xf32, #tpu.memory_space<vmem>>, vector<10x2048xf32>
    %cst = arith.constant dense<0.000000e+00> : vector<1x2048xf32>
    %2 = tpu.matmul %0, %1, %cst {dimension_numbers = #tpu.dot_dimension_numbers<[1], [0], [0], [1], [0, 0, 1, 1], [], []>} : vector<1x10xf32>, vector<10x2048xf32>, vector<1x2048xf32> -> vector<1x2048xf32>
    %cst_3 = arith.constant 0.000000e+00 : f32
    %3 = vector.broadcast %cst_3 : f32 to vector<1x2048xf32>
    %4 = arith.maximumf %2, %3 : vector<1x2048xf32>
    %c0_4 = arith.constant 0 : index
    %c0_5 = arith.constant 0 : index
    %5 = vector.load %arg2[%c0_4, %c0_5] : memref<1x2048xf32, #tpu.memory_space<vmem>>, vector<1x2048xf32>
    tpu.vector_store %arg2[%c0_4, %c0_5], %4 {strides = array<i32>} : memref<1x2048xf32, #tpu.memory_space<vmem>>, vector<1x2048xf32>,
    return
  }
}

module attributes {stable_mosaic.version = 11 : i64} {
  func.func @_mm_relu_kernel(%arg0: memref<10x2048xf32, #tpu.memory_space<vmem>>, %arg1: memref<5x10xf32, #tpu.memory_space<vmem>>, %arg2: memref<5x2048xf32, #tpu.memory_space<vmem>>) attributes {dimension_semantics = [], scalar_prefetch = 0 : i64, scratch_operands = 0 : i64, tpu.core_type = #tpu.core_type<tc>} {
    %c0 = arith.constant 0 : index
    %c0_0 = arith.constant 0 : index
    %0 = vector.load %arg1[%c0, %c0_0] : memref<5x10xf32, #tpu.memory_space<vmem>>, vector<5x10xf32>
    %c0_1 = arith.constant 0 : index
    %c0_2 = arith.constant 0 : index
    %1 = vector.load %arg0[%c0_1, %c0_2] : memref<10x2048xf32, #tpu.memory_space<vmem>>, vector<10x2048xf32>
    %cst = arith.constant dense<0.000000e+00> : vector<5x2048xf32>
    %2 = tpu.matmul %0, %1, %cst {dimension_numbers = #tpu.dot_dimension_numbers<[1], [0], [0], [1], [0, 0, 1, 1], [], []>} : vector<5x10xf32>, vector<10x2048xf32>, vector<5x2048xf32> -> vector<5x2048xf32>
    %cst_3 = arith.constant 0.000000e+00 : f32
    %3 = vector.broadcast %cst_3 : f32 to vector<5x2048xf32>
    %4 = arith.maximumf %2, %3 : vector<5x2048xf32>
    %c0_4 = arith.constant 0 : index
    %c0_5 = arith.constant 0 : index
    %5 = vector.load %arg2[%c0_4, %c0_5] : memref<5x2048xf32, #tpu.memory_space<vmem>>, vector<5x2048xf32>
    tpu.vector_store %arg2[%c0_4, %c0_5], %4 {strides = array<i32>} : memref<5x2048xf32, #tpu.memory_space<vmem>>, vector<5x2048xf32>,
    return
  }
}

module attributes {stable_mosaic.version = 11 : i64} {
  func.func @_mm_relu_kernel(%arg0: memref<46x512xf32, #tpu.memory_space<vmem>>, %arg1: memref<10x46xf32, #tpu.memory_space<vmem>>, %arg2: memref<10x512xf32, #tpu.memory_space<vmem>>) attributes {dimension_semantics = [], scalar_prefetch = 0 : i64, scratch_operands = 0 : i64, tpu.core_type = #tpu.core_type<tc>} {
    %c0 = arith.constant 0 : index
    %c0_0 = arith.constant 0 : index
    %0 = vector.load %arg1[%c0, %c0_0] : memref<10x46xf32, #tpu.memory_space<vmem>>, vector<10x46xf32>
    %c0_1 = arith.constant 0 : index
    %c0_2 = arith.constant 0 : index
    %1 = vector.load %arg0[%c0_1, %c0_2] : memref<46x512xf32, #tpu.memory_space<vmem>>, vector<46x512xf32>
    %cst = arith.constant dense<0.000000e+00> : vector<10x512xf32>
    %2 = tpu.matmul %0, %1, %cst {dimension_numbers = #tpu.dot_dimension_numbers<[1], [0], [0], [1], [0, 0, 1, 1], [], []>} : vector<10x46xf32>, vector<46x512xf32>, vector<10x512xf32> -> vector<10x512xf32>
    %cst_3 = arith.constant 0.000000e+00 : f32
    %3 = vector.broadcast %cst_3 : f32 to vector<10x512xf32>
    %4 = arith.maximumf %2, %3 : vector<10x512xf32>
    %c0_4 = arith.constant 0 : index
    %c0_5 = arith.constant 0 : index
    %5 = vector.load %arg2[%c0_4, %c0_5] : memref<10x512xf32, #tpu.memory_space<vmem>>, vector<10x512xf32>
    tpu.vector_store %arg2[%c0_4, %c0_5], %4 {strides = array<i32>} : memref<10x512xf32, #tpu.memory_space<vmem>>, vector<10x512xf32>,
    return
  }
}

module attributes {stable_mosaic.version = 11 : i64} {
  func.func @_mm_relu_kernel(%arg0: memref<91x128xf32, #tpu.memory_space<vmem>>, %arg1: memref<20x91xf32, #tpu.memory_space<vmem>>, %arg2: memref<20x128xf32, #tpu.memory_space<vmem>>) attributes {dimension_semantics = [], scalar_prefetch = 0 : i64, scratch_operands = 0 : i64, tpu.core_type = #tpu.core_type<tc>} {
    %c0 = arith.constant 0 : index
    %c0_0 = arith.constant 0 : index
    %0 = vector.load %arg1[%c0, %c0_0] : memref<20x91xf32, #tpu.memory_space<vmem>>, vector<20x91xf32>
    %c0_1 = arith.constant 0 : index
    %c0_2 = arith.constant 0 : index
    %1 = vector.load %arg0[%c0_1, %c0_2] : memref<91x128xf32, #tpu.memory_space<vmem>>, vector<91x128xf32>
    %cst = arith.constant dense<0.000000e+00> : vector<20x128xf32>
    %2 = tpu.matmul %0, %1, %cst {dimension_numbers = #tpu.dot_dimension_numbers<[1], [0], [0], [1], [0, 0, 1, 1], [], []>} : vector<20x91xf32>, vector<91x128xf32>, vector<20x128xf32> -> vector<20x128xf32>
    %cst_3 = arith.constant 0.000000e+00 : f32
    %3 = vector.broadcast %cst_3 : f32 to vector<20x128xf32>
    %4 = arith.maximumf %2, %3 : vector<20x128xf32>
    %c0_4 = arith.constant 0 : index
    %c0_5 = arith.constant 0 : index
    %5 = vector.load %arg2[%c0_4, %c0_5] : memref<20x128xf32, #tpu.memory_space<vmem>>, vector<20x128xf32>
    tpu.vector_store %arg2[%c0_4, %c0_5], %4 {strides = array<i32>} : memref<20x128xf32, #tpu.memory_space<vmem>>, vector<20x128xf32>,
    return
  }
}

module attributes {stable_mosaic.version = 11 : i64} {
  func.func @_mm_relu_kernel(%arg0: memref<181x32xf32, #tpu.memory_space<vmem>>, %arg1: memref<40x181xf32, #tpu.memory_space<vmem>>, %arg2: memref<40x32xf32, #tpu.memory_space<vmem>>) attributes {dimension_semantics = [], scalar_prefetch = 0 : i64, scratch_operands = 0 : i64, tpu.core_type = #tpu.core_type<tc>} {
    %c0 = arith.constant 0 : index
    %c0_0 = arith.constant 0 : index
    %0 = vector.load %arg1[%c0, %c0_0] : memref<40x181xf32, #tpu.memory_space<vmem>>, vector<40x181xf32>
    %c0_1 = arith.constant 0 : index
    %c0_2 = arith.constant 0 : index
    %1 = vector.load %arg0[%c0_1, %c0_2] : memref<181x32xf32, #tpu.memory_space<vmem>>, vector<181x32xf32>
    %cst = arith.constant dense<0.000000e+00> : vector<40x32xf32>
    %2 = tpu.matmul %0, %1, %cst {dimension_numbers = #tpu.dot_dimension_numbers<[1], [0], [0], [1], [0, 0, 1, 1], [], []>} : vector<40x181xf32>, vector<181x32xf32>, vector<40x32xf32> -> vector<40x32xf32>
    %cst_3 = arith.constant 0.000000e+00 : f32
    %3 = vector.broadcast %cst_3 : f32 to vector<40x32xf32>
    %4 = arith.maximumf %2, %3 : vector<40x32xf32>
    %c0_4 = arith.constant 0 : index
    %c0_5 = arith.constant 0 : index
    %5 = vector.load %arg2[%c0_4, %c0_5] : memref<40x32xf32, #tpu.memory_space<vmem>>, vector<40x32xf32>
    tpu.vector_store %arg2[%c0_4, %c0_5], %4 {strides = array<i32>} : memref<40x32xf32, #tpu.memory_space<vmem>>, vector<40x32xf32>,
    return
  }
}

module attributes {stable_mosaic.version = 11 : i64} {
  func.func @_mm_relu_kernel(%arg0: memref<361x8xf32, #tpu.memory_space<vmem>>, %arg1: memref<40x361xf32, #tpu.memory_space<vmem>>, %arg2: memref<40x8xf32, #tpu.memory_space<vmem>>) attributes {dimension_semantics = [], scalar_prefetch = 0 : i64, scratch_operands = 0 : i64, tpu.core_type = #tpu.core_type<tc>} {
    %c0 = arith.constant 0 : index
    %c0_0 = arith.constant 0 : index
    %0 = vector.load %arg1[%c0, %c0_0] : memref<40x361xf32, #tpu.memory_space<vmem>>, vector<40x361xf32>
    %c0_1 = arith.constant 0 : index
    %c0_2 = arith.constant 0 : index
    %1 = vector.load %arg0[%c0_1, %c0_2] : memref<361x8xf32, #tpu.memory_space<vmem>>, vector<361x8xf32>
    %cst = arith.constant dense<0.000000e+00> : vector<40x8xf32>
    %2 = tpu.matmul %0, %1, %cst {dimension_numbers = #tpu.dot_dimension_numbers<[1], [0], [0], [1], [0, 0, 1, 1], [], []>} : vector<40x361xf32>, vector<361x8xf32>, vector<40x8xf32> -> vector<40x8xf32>
    %cst_3 = arith.constant 0.000000e+00 : f32
    %3 = vector.broadcast %cst_3 : f32 to vector<40x8xf32>
    %4 = arith.maximumf %2, %3 : vector<40x8xf32>
    %c0_4 = arith.constant 0 : index
    %c0_5 = arith.constant 0 : index
    %5 = vector.load %arg2[%c0_4, %c0_5] : memref<40x8xf32, #tpu.memory_space<vmem>>, vector<40x8xf32>
    tpu.vector_store %arg2[%c0_4, %c0_5], %4 {strides = array<i32>} : memref<40x8xf32, #tpu.memory_space<vmem>>, vector<40x8xf32>,
    return
  }
}

module attributes {stable_mosaic.version = 11 : i64} {
  func.func @_mm2_relu_kernel(%arg0: memref<361x32xf32, #tpu.memory_space<vmem>>, %arg1: memref<360x32xf32, #tpu.memory_space<vmem>>, %arg2: memref<20x361xf32, #tpu.memory_space<vmem>>, %arg3: memref<20x360xf32, #tpu.memory_space<vmem>>, %arg4: memref<20x32xf32, #tpu.memory_space<vmem>>) attributes {dimension_semantics = [], scalar_prefetch = 0 : i64, scratch_operands = 0 : i64, tpu.core_type = #tpu.core_type<tc>} {
    %c0 = arith.constant 0 : index
    %c0_0 = arith.constant 0 : index
    %0 = vector.load %arg2[%c0, %c0_0] : memref<20x361xf32, #tpu.memory_space<vmem>>, vector<20x361xf32>
    %c0_1 = arith.constant 0 : index
    %c0_2 = arith.constant 0 : index
    %1 = vector.load %arg0[%c0_1, %c0_2] : memref<361x32xf32, #tpu.memory_space<vmem>>, vector<361x32xf32>
    %cst = arith.constant dense<0.000000e+00> : vector<20x32xf32>
    %2 = tpu.matmul %0, %1, %cst {dimension_numbers = #tpu.dot_dimension_numbers<[1], [0], [0], [1], [0, 0, 1, 1], [], []>} : vector<20x361xf32>, vector<361x32xf32>, vector<20x32xf32> -> vector<20x32xf32>
    %c0_3 = arith.constant 0 : index
    %c0_4 = arith.constant 0 : index
    %3 = vector.load %arg3[%c0_3, %c0_4] : memref<20x360xf32, #tpu.memory_space<vmem>>, vector<20x360xf32>
    %c0_5 = arith.constant 0 : index
    %c0_6 = arith.constant 0 : index
    %4 = vector.load %arg1[%c0_5, %c0_6] : memref<360x32xf32, #tpu.memory_space<vmem>>, vector<360x32xf32>
    %cst_7 = arith.constant dense<0.000000e+00> : vector<20x32xf32>
    %5 = tpu.matmul %3, %4, %cst_7 {dimension_numbers = #tpu.dot_dimension_numbers<[1], [0], [0], [1], [0, 0, 1, 1], [], []>} : vector<20x360xf32>, vector<360x32xf32>, vector<20x32xf32> -> vector<20x32xf32>
    %6 = arith.addf %2, %5 : vector<20x32xf32>
    %cst_8 = arith.constant 0.000000e+00 : f32
    %7 = vector.broadcast %cst_8 : f32 to vector<20x32xf32>
    %8 = arith.maximumf %6, %7 : vector<20x32xf32>
    %c0_9 = arith.constant 0 : index
    %c0_10 = arith.constant 0 : index
    %9 = vector.load %arg4[%c0_9, %c0_10] : memref<20x32xf32, #tpu.memory_space<vmem>>, vector<20x32xf32>
    tpu.vector_store %arg4[%c0_9, %c0_10], %8 {strides = array<i32>} : memref<20x32xf32, #tpu.memory_space<vmem>>, vector<20x32xf32>,
    return
  }
}

module attributes {stable_mosaic.version = 11 : i64} {
  func.func @_mm2_relu_kernel(%arg0: memref<181x128xf32, #tpu.memory_space<vmem>>, %arg1: memref<180x128xf32, #tpu.memory_space<vmem>>, %arg2: memref<10x181xf32, #tpu.memory_space<vmem>>, %arg3: memref<10x180xf32, #tpu.memory_space<vmem>>, %arg4: memref<10x128xf32, #tpu.memory_space<vmem>>) attributes {dimension_semantics = [], scalar_prefetch = 0 : i64, scratch_operands = 0 : i64, tpu.core_type = #tpu.core_type<tc>} {
    %c0 = arith.constant 0 : index
    %c0_0 = arith.constant 0 : index
    %0 = vector.load %arg2[%c0, %c0_0] : memref<10x181xf32, #tpu.memory_space<vmem>>, vector<10x181xf32>
    %c0_1 = arith.constant 0 : index
    %c0_2 = arith.constant 0 : index
    %1 = vector.load %arg0[%c0_1, %c0_2] : memref<181x128xf32, #tpu.memory_space<vmem>>, vector<181x128xf32>
    %cst = arith.constant dense<0.000000e+00> : vector<10x128xf32>
    %2 = tpu.matmul %0, %1, %cst {dimension_numbers = #tpu.dot_dimension_numbers<[1], [0], [0], [1], [0, 0, 1, 1], [], []>} : vector<10x181xf32>, vector<181x128xf32>, vector<10x128xf32> -> vector<10x128xf32>
    %c0_3 = arith.constant 0 : index
    %c0_4 = arith.constant 0 : index
    %3 = vector.load %arg3[%c0_3, %c0_4] : memref<10x180xf32, #tpu.memory_space<vmem>>, vector<10x180xf32>
    %c0_5 = arith.constant 0 : index
    %c0_6 = arith.constant 0 : index
    %4 = vector.load %arg1[%c0_5, %c0_6] : memref<180x128xf32, #tpu.memory_space<vmem>>, vector<180x128xf32>
    %cst_7 = arith.constant dense<0.000000e+00> : vector<10x128xf32>
    %5 = tpu.matmul %3, %4, %cst_7 {dimension_numbers = #tpu.dot_dimension_numbers<[1], [0], [0], [1], [0, 0, 1, 1], [], []>} : vector<10x180xf32>, vector<180x128xf32>, vector<10x128xf32> -> vector<10x128xf32>
    %6 = arith.addf %2, %5 : vector<10x128xf32>
    %cst_8 = arith.constant 0.000000e+00 : f32
    %7 = vector.broadcast %cst_8 : f32 to vector<10x128xf32>
    %8 = arith.maximumf %6, %7 : vector<10x128xf32>
    %c0_9 = arith.constant 0 : index
    %c0_10 = arith.constant 0 : index
    %9 = vector.load %arg4[%c0_9, %c0_10] : memref<10x128xf32, #tpu.memory_space<vmem>>, vector<10x128xf32>
    tpu.vector_store %arg4[%c0_9, %c0_10], %8 {strides = array<i32>} : memref<10x128xf32, #tpu.memory_space<vmem>>, vector<10x128xf32>,
    return
  }
}

module attributes {stable_mosaic.version = 11 : i64} {
  func.func @_mm2_relu_kernel(%arg0: memref<91x512xf32, #tpu.memory_space<vmem>>, %arg1: memref<90x512xf32, #tpu.memory_space<vmem>>, %arg2: memref<5x91xf32, #tpu.memory_space<vmem>>, %arg3: memref<5x90xf32, #tpu.memory_space<vmem>>, %arg4: memref<5x512xf32, #tpu.memory_space<vmem>>) attributes {dimension_semantics = [], scalar_prefetch = 0 : i64, scratch_operands = 0 : i64, tpu.core_type = #tpu.core_type<tc>} {
    %c0 = arith.constant 0 : index
    %c0_0 = arith.constant 0 : index
    %0 = vector.load %arg2[%c0, %c0_0] : memref<5x91xf32, #tpu.memory_space<vmem>>, vector<5x91xf32>
    %c0_1 = arith.constant 0 : index
    %c0_2 = arith.constant 0 : index
    %1 = vector.load %arg0[%c0_1, %c0_2] : memref<91x512xf32, #tpu.memory_space<vmem>>, vector<91x512xf32>
    %cst = arith.constant dense<0.000000e+00> : vector<5x512xf32>
    %2 = tpu.matmul %0, %1, %cst {dimension_numbers = #tpu.dot_dimension_numbers<[1], [0], [0], [1], [0, 0, 1, 1], [], []>} : vector<5x91xf32>, vector<91x512xf32>, vector<5x512xf32> -> vector<5x512xf32>
    %c0_3 = arith.constant 0 : index
    %c0_4 = arith.constant 0 : index
    %3 = vector.load %arg3[%c0_3, %c0_4] : memref<5x90xf32, #tpu.memory_space<vmem>>, vector<5x90xf32>
    %c0_5 = arith.constant 0 : index
    %c0_6 = arith.constant 0 : index
    %4 = vector.load %arg1[%c0_5, %c0_6] : memref<90x512xf32, #tpu.memory_space<vmem>>, vector<90x512xf32>
    %cst_7 = arith.constant dense<0.000000e+00> : vector<5x512xf32>
    %5 = tpu.matmul %3, %4, %cst_7 {dimension_numbers = #tpu.dot_dimension_numbers<[1], [0], [0], [1], [0, 0, 1, 1], [], []>} : vector<5x90xf32>, vector<90x512xf32>, vector<5x512xf32> -> vector<5x512xf32>
    %6 = arith.addf %2, %5 : vector<5x512xf32>
    %cst_8 = arith.constant 0.000000e+00 : f32
    %7 = vector.broadcast %cst_8 : f32 to vector<5x512xf32>
    %8 = arith.maximumf %6, %7 : vector<5x512xf32>
    %c0_9 = arith.constant 0 : index
    %c0_10 = arith.constant 0 : index
    %9 = vector.load %arg4[%c0_9, %c0_10] : memref<5x512xf32, #tpu.memory_space<vmem>>, vector<5x512xf32>
    tpu.vector_store %arg4[%c0_9, %c0_10], %8 {strides = array<i32>} : memref<5x512xf32, #tpu.memory_space<vmem>>, vector<5x512xf32>,
    return
  }
}

module attributes {stable_mosaic.version = 11 : i64} {
  func.func @_mm2_relu_kernel(%arg0: memref<46x2048xf32, #tpu.memory_space<vmem>>, %arg1: memref<45x2048xf32, #tpu.memory_space<vmem>>, %arg2: memref<1x46xf32, #tpu.memory_space<vmem>>, %arg3: memref<1x45xf32, #tpu.memory_space<vmem>>, %arg4: memref<1x2048xf32, #tpu.memory_space<vmem>>) attributes {dimension_semantics = [], scalar_prefetch = 0 : i64, scratch_operands = 0 : i64, tpu.core_type = #tpu.core_type<tc>} {
    %c0 = arith.constant 0 : index
    %c0_0 = arith.constant 0 : index
    %0 = vector.load %arg2[%c0, %c0_0] : memref<1x46xf32, #tpu.memory_space<vmem>>, vector<1x46xf32>
    %c0_1 = arith.constant 0 : index
    %c0_2 = arith.constant 0 : index
    %1 = vector.load %arg0[%c0_1, %c0_2] : memref<46x2048xf32, #tpu.memory_space<vmem>>, vector<46x2048xf32>
    %cst = arith.constant dense<0.000000e+00> : vector<1x2048xf32>
    %2 = tpu.matmul %0, %1, %cst {dimension_numbers = #tpu.dot_dimension_numbers<[1], [0], [0], [1], [0, 0, 1, 1], [], []>} : vector<1x46xf32>, vector<46x2048xf32>, vector<1x2048xf32> -> vector<1x2048xf32>
    %c0_3 = arith.constant 0 : index
    %c0_4 = arith.constant 0 : index
    %3 = vector.load %arg3[%c0_3, %c0_4] : memref<1x45xf32, #tpu.memory_space<vmem>>, vector<1x45xf32>
    %c0_5 = arith.constant 0 : index
    %c0_6 = arith.constant 0 : index
    %4 = vector.load %arg1[%c0_5, %c0_6] : memref<45x2048xf32, #tpu.memory_space<vmem>>, vector<45x2048xf32>
    %cst_7 = arith.constant dense<0.000000e+00> : vector<1x2048xf32>
    %5 = tpu.matmul %3, %4, %cst_7 {dimension_numbers = #tpu.dot_dimension_numbers<[1], [0], [0], [1], [0, 0, 1, 1], [], []>} : vector<1x45xf32>, vector<45x2048xf32>, vector<1x2048xf32> -> vector<1x2048xf32>
    %6 = arith.addf %2, %5 : vector<1x2048xf32>
    %cst_8 = arith.constant 0.000000e+00 : f32
    %7 = vector.broadcast %cst_8 : f32 to vector<1x2048xf32>
    %8 = arith.maximumf %6, %7 : vector<1x2048xf32>
    %c0_9 = arith.constant 0 : index
    %c0_10 = arith.constant 0 : index
    %9 = vector.load %arg4[%c0_9, %c0_10] : memref<1x2048xf32, #tpu.memory_space<vmem>>, vector<1x2048xf32>
    tpu.vector_store %arg4[%c0_9, %c0_10], %8 {strides = array<i32>} : memref<1x2048xf32, #tpu.memory_space<vmem>>, vector<1x2048xf32>,
    return
  }
}

module attributes {stable_mosaic.version = 11 : i64} {
  func.func @_mm_relu_kernel(%arg0: memref<10x2048xf32, #tpu.memory_space<vmem>>, %arg1: memref<1x10xf32, #tpu.memory_space<vmem>>, %arg2: memref<1x2048xf32, #tpu.memory_space<vmem>>) attributes {dimension_semantics = [], scalar_prefetch = 0 : i64, scratch_operands = 0 : i64, tpu.core_type = #tpu.core_type<tc>} {
    %c0 = arith.constant 0 : index
    %c0_0 = arith.constant 0 : index
    %0 = vector.load %arg1[%c0, %c0_0] : memref<1x10xf32, #tpu.memory_space<vmem>>, vector<1x10xf32>
    %c0_1 = arith.constant 0 : index
    %c0_2 = arith.constant 0 : index
    %1 = vector.load %arg0[%c0_1, %c0_2] : memref<10x2048xf32, #tpu.memory_space<vmem>>, vector<10x2048xf32>
    %cst = arith.constant dense<0.000000e+00> : vector<1x2048xf32>
    %2 = tpu.matmul %0, %1, %cst {dimension_numbers = #tpu.dot_dimension_numbers<[1], [0], [0], [1], [0, 0, 1, 1], [], []>} : vector<1x10xf32>, vector<10x2048xf32>, vector<1x2048xf32> -> vector<1x2048xf32>
    %c0_3 = arith.constant 0 : index
    %c0_4 = arith.constant 0 : index
    %3 = vector.load %arg2[%c0_3, %c0_4] : memref<1x2048xf32, #tpu.memory_space<vmem>>, vector<1x2048xf32>
    tpu.vector_store %arg2[%c0_3, %c0_4], %2 {strides = array<i32>} : memref<1x2048xf32, #tpu.memory_space<vmem>>, vector<1x2048xf32>,
    return
  }
}

</mosaic_0001>

<bundles_post_ra>
// kernel: unet_forward.11
= control target key start
LH: loop header
LB: loop body
LE: loop exit
PB: predicated region body
PF: predicated region fallthrough
CT: control target
= control target key end

     0   :  { %7 = vsyncpa [#allocation3], 0  ;;  %s916_s9 = smov [#allocation2]   ;;  %s1111_s0 = inlined_call_operand.vmem [shape: f32[10,2048], index: 0, kind: input, shape index: {}]   ;;  %s1112_s1 = inlined_call_operand.hbm [shape: f32[1,10], index: 1, kind: input, shape index: {}]   ;;  %s1113_s2 = inlined_call_operand.vmem [shape: f32[1,2048], index: 2, kind: output, shape index: {}]  }
   0x1   :  { %s16_s10 = sshll.u32 %s916_s9, 4  ;;  %s892_s13 = scalar_lea.hbm %s1112_s1, 16  ;;  %s17_s10 = int_to_ptr.vmem [resolvable:$true] %s16_s10 }
   0x2   :  { %p893_p0 = scmp.ne.s32.totalorder %s1112_s1, %s892_s13  ;;  %p896_p1 = scmp.lt.u32.totalorder %s892_s13, %s1112_s1 }
   0x4   :  { %p898_p2 = pnand %p896_p1, %p893_p0 }
   0x6   :  { %901 = shalt.err (!%p898_p2)
}
   0x7   :  { %s902_s18 = scalar_lea.vmem %s17_s10, 16  ;;  %s906_s19 = scalar_lea.vmem %s17_s10, 32 }
   0x8   :  { %p903_p3 = scmp.ne.s32.totalorder %s17_s10, %s902_s18  ;;  %p907_p4 = scmp.lt.s32.totalorder %s17_s10, %s17_s10 }
   0x9   :  { %p908_p5 = scmp.lt.s32.totalorder %s906_s19, %s902_s18 }
   0xb   :  { %p909_p6 = por %p908_p5, %p907_p4 }
   0xd   :  { %p910_p7 = pnand %p909_p6, %p903_p3 }
   0xf   :  { %913 = shalt.err (!%p910_p7)
}
  0x10   :  { %19 = dma.hbm_to_vmem [thread:$0]  %s1112_s1, 16, %s17_s10, [#allocation3]  }
  0x11   :  { %914 = dma.done.wait [#allocation3], 16  }
  0x12   :  { %915 = vsyncadd [#allocation3], 4294967280  ;;  %v917_v0 = vmov 0.0   ;;  %vm60_vm0 = vcmask 1041408   ;;  %vm918_vm1 = vmmov 1   ;;  %v25_v2 = vld [vmem:[%s1111_s0 + $0x8] sm:$0xff]  ;;  %v716_v53 = vlaneseq }
  0x13   :  { %173 = vmatprep.mubr.f32.mxu0 %v917_v0  ;;  %244 = vmatprep.mubr.f32.mxu1 %v917_v0  ;;  %vm949_vm2 = vmpackc.low %vm60_vm0, %vm918_vm1  ;;  %v41_v3 = vld [vmem:[%s1111_s0 + $0x88] sm:$0x3]  ;;  %v27_v4 = vld [vmem:[%s1111_s0 + $0x18] sm:$0xff]  ;;  %vm56_vm3 = vcmask 80896   ;;  %v919_v51 = vmov 1966171168  }
  0x14   :  { %v840_v5 = vpack.c.bf16 %v41_v3, %v25_v2  ;;  %v43_v6 = vld [vmem:[%s1111_s0 + $0x98] sm:$0x3]  ;;  %v24_v7 = vld [vmem:[%s1111_s0] sm:$0xff]  ;;  %v26_v11 = vld [vmem:[%s1111_s0 + $0x10] sm:$0xff]  ;;  %v714_v52 = vunpack.c.l.s4 %v919_v51  ;;  %v717_v55 = vshrl.u32 %v716_v53, 7 }
  0x15   :  { %v40_v8 = vld [vmem:[%s1111_s0 + $0x80] sm:$0x3]  ;;  %v846_v9 = vpack.c.bf16 %v43_v6, %v27_v4  ;;  %v42_v12 = vld [vmem:[%s1111_s0 + $0x90] sm:$0x3]  ;;  %v29_v15 = vld [vmem:[%s1111_s0 + $0x28] sm:$0xff] }
  0x16   :  { %v843_v10 = vpack.c.bf16 %v40_v8, %v24_v7  ;;  %v977_v13 = vld [vmem:[#allocation2] sm:$0x1]  ;;  %842 = vmatprep.subr.msk.bf16.mxu0 %vm949_vm2, %v840_v5  ;;  %v849_v14 = vpack.c.bf16 %v42_v12, %v26_v11  ;;  %v45_v16 = vld [vmem:[%s1111_s0 + $0xa8] sm:$0x3]  ;;  %v31_v17 = vld [vmem:[%s1111_s0 + $0x38] sm:$0xff]  ;;  %v715_v54 = vunpack.c.0.s8 %v714_v52 }
  0x17   :  { %848 = vmatprep.subr.msk.bf16.mxu1 %vm949_vm2, %v846_v9  ;;  %v852_v18 = vpack.c.bf16 %v45_v16, %v29_v15  ;;  %v47_v19 = vld [vmem:[%s1111_s0 + $0xb8] sm:$0x3]  ;;  %v28_v20 = vld [vmem:[%s1111_s0 + $0x20] sm:$0xff]  ;;  %v30_v24 = vld [vmem:[%s1111_s0 + $0x30] sm:$0xff] }
  0x18   :  { %845 = vmatpush1.bf16.msk.msra.mxu0 %vm949_vm2, %v843_v10  ;;  %v44_v21 = vld [vmem:[%s1111_s0 + $0xa0] sm:$0x3]  ;;  %851 = vmatpush1.bf16.msk.msra.mxu1 %vm949_vm2, %v849_v14  ;;  %v858_v22 = vpack.c.bf16 %v47_v19, %v31_v17  ;;  %v46_v25 = vld [vmem:[%s1111_s0 + $0xb0] sm:$0x3]  ;;  %v33_v26 = vld [vmem:[%s1111_s0 + $0x48] sm:$0xff]  ;;  %v718_v62 = vsub.s32 %v715_v54, %v717_v55 }
  0x19   :  { %v855_v23 = vpack.c.bf16 %v44_v21, %v28_v20  ;;  %854 = vmatprep.subr.msk.bf16.mxu0 %vm949_vm2, %v852_v18  ;;  %v861_v27 = vpack.c.bf16 %v46_v25, %v30_v24  ;;  %v49_v28 = vld [vmem:[%s1111_s0 + $0xc8] sm:$0x3]  ;;  %v35_v29 = vld [vmem:[%s1111_s0 + $0x58] sm:$0xff]  ;;  %v32_v33 = vld [vmem:[%s1111_s0 + $0x40] sm:$0xff] }
  0x1a   :  { %v51_v30 = vld [vmem:[%s1111_s0 + $0xd8] sm:$0x3]  ;;  %860 = vmatprep.subr.msk.bf16.mxu1 %vm949_vm2, %v858_v22  ;;  %v864_v31 = vpack.c.bf16 %v49_v28, %v33_v26  ;;  %v48_v34 = vld [vmem:[%s1111_s0 + $0xc0] sm:$0x3]  ;;  %v34_v35 = vld [vmem:[%s1111_s0 + $0x50] sm:$0xff] }
  0x1b   :  { %818 = vmatmul.mubr.msk.f32.vlgmr.msra.gmra.mrb[0].mxu0 %vm56_vm3, %v977_v13  ;;  %v870_v32 = vpack.c.bf16 %v51_v30, %v35_v29  ;;  %821 = vmatmul.mubr.msk.f32.vlgmr.msra.gmra.mrb[0].mxu1 %vm56_vm3, %v977_v13  ;;  %v867_v36 = vpack.c.bf16 %v48_v34, %v32_v33  ;;  %v50_v37 = vld [vmem:[%s1111_s0 + $0xd0] sm:$0x3]  ;;  %v37_v38 = vld [vmem:[%s1111_s0 + $0x68] sm:$0xff]  ;;  %v39_v41 = vld [vmem:[%s1111_s0 + $0x78] sm:$0xff] }
  0x1c   :  { %857 = vmatpush1.bf16.msk.msra.mxu0 %vm949_vm2, %v855_v23  ;;  %v53_v39 = vld [vmem:[%s1111_s0 + $0xe8] sm:$0x3]  ;;  %863 = vmatpush1.bf16.msk.msra.mxu1 %vm949_vm2, %v861_v27  ;;  %v873_v40 = vpack.c.bf16 %v50_v37, %v34_v35  ;;  %v55_v42 = vld [vmem:[%s1111_s0 + $0xf8] sm:$0x3]  ;;  %v36_v43 = vld [vmem:[%s1111_s0 + $0x60] sm:$0xff] }
  0x1d   :  { %315 = vmatprep.mubr.f32.mxu0 %v917_v0  ;;  %386 = vmatprep.mubr.f32.mxu1 %v917_v0  ;;  %v876_v44 = vpack.c.bf16 %v53_v39, %v37_v38  ;;  %v52_v45 = vld [vmem:[%s1111_s0 + $0xe0] sm:$0x3]  ;;  %v38_v46 = vld [vmem:[%s1111_s0 + $0x70] sm:$0xff]  ;;  %v882_v48 = vpack.c.bf16 %v55_v42, %v39_v41 }
  0x1e   :  { %866 = vmatprep.subr.msk.bf16.mxu0 %vm949_vm2, %v864_v31  ;;  %v54_v47 = vld [vmem:[%s1111_s0 + $0xf0] sm:$0x3]  ;;  %872 = vmatprep.subr.msk.bf16.mxu1 %vm949_vm2, %v870_v32  ;;  %v879_v49 = vpack.c.bf16 %v52_v45, %v36_v43 }
  0x1f   :  { %824 = vmatmul.mubr.msk.f32.vlgmr.msra.gmra.mrb[2].mxu0 %vm56_vm3, %v977_v13  ;;  %827 = vmatmul.mubr.msk.f32.vlgmr.msra.gmra.mrb[2].mxu1 %vm56_vm3, %v977_v13  ;;  %v885_v50 = vpack.c.bf16 %v54_v47, %v38_v46 }
  0x20   :  { %869 = vmatpush1.bf16.msk.msra.mxu0 %vm949_vm2, %v867_v36  ;;  %875 = vmatpush1.bf16.msk.msra.mxu1 %vm949_vm2, %v873_v40 }
  0x21   :  { %457 = vmatprep.mubr.f32.mxu0 %v917_v0  ;;  %528 = vmatprep.mubr.f32.mxu1 %v917_v0 }
  0x22   :  { %878 = vmatprep.subr.msk.bf16.mxu0 %vm949_vm2, %v876_v44  ;;  %884 = vmatprep.subr.msk.bf16.mxu1 %vm949_vm2, %v882_v48 }
  0x23   :  { %830 = vmatmul.mubr.msk.f32.vlgmr.msra.gmra.mrb[4].mxu0 %vm56_vm3, %v977_v13  ;;  %833 = vmatmul.mubr.msk.f32.vlgmr.msra.gmra.mrb[4].mxu1 %vm56_vm3, %v977_v13 }
  0x24   :  { %881 = vmatpush1.bf16.msk.msra.mxu0 %vm949_vm2, %v879_v49  ;;  %887 = vmatpush1.bf16.msk.msra.mxu1 %vm949_vm2, %v885_v50 }
  0x25   :  { %599 = vmatprep.mubr.f32.mxu0 %v917_v0  ;;  %670 = vmatprep.mubr.f32.mxu1 %v917_v0 }
  0x27   :  { %836 = vmatmul.mubr.msk.f32.vlgmr.msra.gmra.mrb[6].mxu0 %vm56_vm3, %v977_v13  ;;  %839 = vmatmul.mubr.msk.f32.vlgmr.msra.gmra.mrb[6].mxu1 %vm56_vm3, %v977_v13 }
  0xee   :  { %v175_v56 = vpop.f32.mrb[0].mxu0  ;;  %v246_v58 = vpop.f32.mrb[0].mxu1 }
  0xef   :  { %v677_v57 = vmax.f32 %v175_v56, 0.0  ;;  %v177_v59 = vpop.f32.mrb[1].mxu0  ;;  %v679_v60 = vmax.f32 %v246_v58, 0.0  ;;  %v248_v63 = vpop.f32.mrb[1].mxu1 }
  0xf0   :  { %v678_v61 = vmax.f32 %v177_v59, 0.0  ;;  %v680_v0 = vmax.f32 %v248_v63, 0.0 }
  0xf2   :  { %v709_v1 = vcombine.low %v677_v57, %v678_v61  ;;  %v317_v2 = vpop.f32.mrb[2].mxu0  ;;  %v710_v3 = vcombine.low %v679_v60, %v680_v0  ;;  %v388_v5 = vpop.f32.mrb[2].mxu1 }
  0xf3   :  { %v681_v4 = vmax.f32 %v317_v2, 0.0  ;;  %v319_v6 = vpop.f32.mrb[3].mxu0  ;;  %v683_v8 = vmax.f32 %v388_v5, 0.0  ;;  %v390_v10 = vpop.f32.mrb[3].mxu1 }
  0xf4   :  { %v719_v7 = vrot.slane %v709_v1, %v718_v62  ;;  %v682_v9 = vmax.f32 %v319_v6, 0.0  ;;  %v726_v11 = vrot.slane %v710_v3, %v718_v62  ;;  %v684_v12 = vmax.f32 %v390_v10, 0.0 }
  0xf6   :  { %v711_v13 = vcombine.low %v681_v4, %v682_v9  ;;  %v459_v14 = vpop.f32.mrb[4].mxu0  ;;  %v741_v15 = vcombine.low %v719_v7, %v726_v11  ;;  %v712_v16 = vcombine.low %v683_v8, %v684_v12  ;;  %v530_v18 = vpop.f32.mrb[4].mxu1 }
  0xf7   :  { %v685_v17 = vmax.f32 %v459_v14, 0.0  ;;  %v461_v19 = vpop.f32.mrb[5].mxu0  ;;  %v687_v21 = vmax.f32 %v530_v18, 0.0  ;;  %v532_v23 = vpop.f32.mrb[5].mxu1 }
  0xf8   :  { %v733_v20 = vrot.slane %v711_v13, %v718_v62  ;;  %v686_v22 = vmax.f32 %v461_v19, 0.0  ;;  %v740_v24 = vrot.slane %v712_v16, %v718_v62  ;;  %v688_v25 = vmax.f32 %v532_v23, 0.0 }
  0xf9   :  { %v749_v37 = vrot.slane %v741_v15, %v718_v62 }
  0xfa   :  { %v758_v26 = vcombine.low %v685_v17, %v686_v22  ;;  %v601_v27 = vpop.f32.mrb[6].mxu0  ;;  %v742_v28 = vcombine.low %v733_v20, %v740_v24  ;;  %v759_v29 = vcombine.low %v687_v21, %v688_v25  ;;  %v672_v31 = vpop.f32.mrb[6].mxu1 }
  0xfb   :  { %v689_v30 = vmax.f32 %v601_v27, 0.0  ;;  %v603_v32 = vpop.f32.mrb[7].mxu0  ;;  %v691_v34 = vmax.f32 %v672_v31, 0.0  ;;  %v674_v36 = vpop.f32.mrb[7].mxu1 }
  0xfc   :  { %v768_v33 = vrot.slane %v758_v26, %v718_v62  ;;  %v690_v35 = vmax.f32 %v603_v32, 0.0  ;;  %v756_v38 = vrot.slane %v742_v28, %v718_v62  ;;  %v775_v39 = vrot.slane %v759_v29, %v718_v62 }
  0xfd   :  { %v692_v40 = vmax.f32 %v674_v36, 0.0 }
  0xfe   :  { %v760_v41 = vcombine.low %v689_v30, %v690_v35  ;;  %v757_v42 = vcombine.low %v749_v37, %v756_v38  ;;  %v790_v43 = vcombine.low %v768_v33, %v775_v39 }
  0xff   :  { %v761_v44 = vcombine.low %v691_v34, %v692_v40 }
 0x100   :  { %v782_v45 = vrot.slane %v760_v41, %v718_v62  ;;  %809 = vst [vmem:[%s1113_s2] sm:$0xff] %v757_v42  ;;  %v798_v48 = vrot.slane %v790_v43, %v718_v62 }
 0x101   :  { %v789_v46 = vrot.slane %v761_v44, %v718_v62 }
 0x103   :  { %v791_v47 = vcombine.low %v782_v45, %v789_v46 }
 0x105   :  { %v805_v49 = vrot.slane %v791_v47, %v718_v62 }
 0x107   :  { %v806_v50 = vcombine.low %v798_v48, %v805_v49 }
 0x109   :  { %810 = vst [vmem:[%s1113_s2 + $0x8] sm:$0xff] %v806_v50 }
 0x10a   :  { %815 = vsyncpa [#allocation3], 1 }

// kernel: unet_forward.12
= control target key start
LH: loop header
LB: loop body
LE: loop exit
PB: predicated region body
PF: predicated region fallthrough
CT: control target
= control target key end

     0   :  { %vm48_vm0 = vcmask 1041408   ;;  %vm775_vm1 = vmmov 1   ;;  %v776_v3 = vmov 0.0   ;;  %vm44_vm3 = vcmask 80896   ;;  %s1001_s0 = inlined_call_operand.vmem [shape: f32[10,2048], index: 0, kind: input, shape index: {}]   ;;  %s1002_s1 = inlined_call_operand.vmem [shape: f32[5,10], index: 1, kind: input, shape index: {}]   ;;  %s1003_s2 = inlined_call_operand.vmem [shape: f32[5,2048], index: 2, kind: output, shape index: {}]  }
   0x1   :  { %v13_v0 = vld [vmem:[%s1001_s0 + $0x8] sm:$0xff]  ;;  %vm798_vm2 = vmpackc.low %vm48_vm0, %vm775_vm1  ;;  %161 = vmatprep.mubr.f32.mxu0 %v776_v3  ;;  %232 = vmatprep.mubr.f32.mxu1 %v776_v3  ;;  %v15_v5 = vld [vmem:[%s1001_s0 + $0x18] sm:$0xff] }
   0x2   :  { %v29_v1 = vld [vmem:[%s1001_s0 + $0x88] sm:$0x3]  ;;  %v31_v6 = vld [vmem:[%s1001_s0 + $0x98] sm:$0x3]  ;;  %v12_v7 = vld [vmem:[%s1001_s0] sm:$0xff] }
   0x3   :  { %v725_v4 = vpack.c.bf16 %v29_v1, %v13_v0  ;;  %v731_v8 = vpack.c.bf16 %v31_v6, %v15_v5  ;;  %v28_v9 = vld [vmem:[%s1001_s0 + $0x80] sm:$0x3]  ;;  %v14_v10 = vld [vmem:[%s1001_s0 + $0x10] sm:$0xff]  ;;  %v17_v15 = vld [vmem:[%s1001_s0 + $0x28] sm:$0xff] }
   0x4   :  { %v30_v11 = vld [vmem:[%s1001_s0 + $0x90] sm:$0x3]  ;;  %v728_v12 = vpack.c.bf16 %v28_v9, %v12_v7  ;;  %v827_v14 = vld [vmem:[%s1002_s1] sm:$0x1f]  ;;  %v33_v16 = vld [vmem:[%s1001_s0 + $0xa8] sm:$0x3] }
   0x5   :  { %727 = vmatprep.subr.msk.bf16.mxu0 %vm798_vm2, %v725_v4  ;;  %v734_v13 = vpack.c.bf16 %v30_v11, %v14_v10  ;;  %733 = vmatprep.subr.msk.bf16.mxu1 %vm798_vm2, %v731_v8  ;;  %v737_v17 = vpack.c.bf16 %v33_v16, %v17_v15  ;;  %v19_v18 = vld [vmem:[%s1001_s0 + $0x38] sm:$0xff]  ;;  %v16_v20 = vld [vmem:[%s1001_s0 + $0x20] sm:$0xff]  ;;  %v18_v23 = vld [vmem:[%s1001_s0 + $0x30] sm:$0xff] }
   0x6   :  { %v35_v19 = vld [vmem:[%s1001_s0 + $0xb8] sm:$0x3]  ;;  %730 = vmatpush1.bf16.msk.msra.mxu0 %vm798_vm2, %v728_v12  ;;  %v32_v22 = vld [vmem:[%s1001_s0 + $0xa0] sm:$0x3]  ;;  %v34_v24 = vld [vmem:[%s1001_s0 + $0xb0] sm:$0x3] }
   0x7   :  { %736 = vmatpush1.bf16.msk.msra.mxu1 %vm798_vm2, %v734_v13  ;;  %v743_v21 = vpack.c.bf16 %v35_v19, %v19_v18  ;;  %739 = vmatprep.subr.msk.bf16.mxu0 %vm798_vm2, %v737_v17  ;;  %v740_v25 = vpack.c.bf16 %v32_v22, %v16_v20  ;;  %v746_v26 = vpack.c.bf16 %v34_v24, %v18_v23  ;;  %v21_v27 = vld [vmem:[%s1001_s0 + $0x48] sm:$0xff]  ;;  %v23_v29 = vld [vmem:[%s1001_s0 + $0x58] sm:$0xff]  ;;  %v20_v32 = vld [vmem:[%s1001_s0 + $0x40] sm:$0xff] }
   0x8   :  { %v37_v28 = vld [vmem:[%s1001_s0 + $0xc8] sm:$0x3]  ;;  %v39_v31 = vld [vmem:[%s1001_s0 + $0xd8] sm:$0x3]  ;;  %v36_v33 = vld [vmem:[%s1001_s0 + $0xc0] sm:$0x3] }
   0x9   :  { %745 = vmatprep.subr.msk.bf16.mxu1 %vm798_vm2, %v743_v21  ;;  %v749_v30 = vpack.c.bf16 %v37_v28, %v21_v27  ;;  %703 = vmatmul.mubr.msk.f32.vlgmr.msra.gmra.mrb[0].mxu0 %vm44_vm3, %v827_v14  ;;  %v755_v34 = vpack.c.bf16 %v39_v31, %v23_v29  ;;  %v22_v35 = vld [vmem:[%s1001_s0 + $0x50] sm:$0xff]  ;;  %v25_v37 = vld [vmem:[%s1001_s0 + $0x68] sm:$0xff]  ;;  %v752_v38 = vpack.c.bf16 %v36_v33, %v20_v32  ;;  %v27_v41 = vld [vmem:[%s1001_s0 + $0x78] sm:$0xff] }
   0xa   :  { %706 = vmatmul.mubr.msk.f32.vlgmr.msra.gmra.mrb[0].mxu1 %vm44_vm3, %v827_v14  ;;  %v38_v36 = vld [vmem:[%s1001_s0 + $0xd0] sm:$0x3]  ;;  %742 = vmatpush1.bf16.msk.msra.mxu0 %vm798_vm2, %v740_v25  ;;  %v41_v40 = vld [vmem:[%s1001_s0 + $0xe8] sm:$0x3]  ;;  %v43_v42 = vld [vmem:[%s1001_s0 + $0xf8] sm:$0x3] }
   0xb   :  { %748 = vmatpush1.bf16.msk.msra.mxu1 %vm798_vm2, %v746_v26  ;;  %v758_v39 = vpack.c.bf16 %v38_v36, %v22_v35  ;;  %303 = vmatprep.mubr.f32.mxu0 %v776_v3  ;;  %v24_v43 = vld [vmem:[%s1001_s0 + $0x60] sm:$0xff]  ;;  %v26_v45 = vld [vmem:[%s1001_s0 + $0x70] sm:$0xff]  ;;  %v761_v46 = vpack.c.bf16 %v41_v40, %v25_v37  ;;  %v767_v47 = vpack.c.bf16 %v43_v42, %v27_v41 }
   0xc   :  { %374 = vmatprep.mubr.f32.mxu1 %v776_v3  ;;  %v40_v44 = vld [vmem:[%s1001_s0 + $0xe0] sm:$0x3]  ;;  %751 = vmatprep.subr.msk.bf16.mxu0 %vm798_vm2, %v749_v30  ;;  %v42_v48 = vld [vmem:[%s1001_s0 + $0xf0] sm:$0x3] }
   0xd   :  { %757 = vmatprep.subr.msk.bf16.mxu1 %vm798_vm2, %v755_v34  ;;  %709 = vmatmul.mubr.msk.f32.vlgmr.msra.gmra.mrb[2].mxu0 %vm44_vm3, %v827_v14  ;;  %v764_v49 = vpack.c.bf16 %v40_v44, %v24_v43  ;;  %v770_v50 = vpack.c.bf16 %v42_v48, %v26_v45 }
   0xe   :  { %712 = vmatmul.mubr.msk.f32.vlgmr.msra.gmra.mrb[2].mxu1 %vm44_vm3, %v827_v14  ;;  %754 = vmatpush1.bf16.msk.msra.mxu0 %vm798_vm2, %v752_v38 }
   0xf   :  { %760 = vmatpush1.bf16.msk.msra.mxu1 %vm798_vm2, %v758_v39  ;;  %445 = vmatprep.mubr.f32.mxu0 %v776_v3 }
  0x10   :  { %516 = vmatprep.mubr.f32.mxu1 %v776_v3  ;;  %763 = vmatprep.subr.msk.bf16.mxu0 %vm798_vm2, %v761_v46 }
  0x11   :  { %769 = vmatprep.subr.msk.bf16.mxu1 %vm798_vm2, %v767_v47  ;;  %715 = vmatmul.mubr.msk.f32.vlgmr.msra.gmra.mrb[4].mxu0 %vm44_vm3, %v827_v14 }
  0x12   :  { %718 = vmatmul.mubr.msk.f32.vlgmr.msra.gmra.mrb[4].mxu1 %vm44_vm3, %v827_v14  ;;  %766 = vmatpush1.bf16.msk.msra.mxu0 %vm798_vm2, %v764_v49 }
  0x13   :  { %772 = vmatpush1.bf16.msk.msra.mxu1 %vm798_vm2, %v770_v50  ;;  %587 = vmatprep.mubr.f32.mxu0 %v776_v3 }
  0x14   :  { %658 = vmatprep.mubr.f32.mxu1 %v776_v3 }
  0x15   :  { %721 = vmatmul.mubr.msk.f32.vlgmr.msra.gmra.mrb[6].mxu0 %vm44_vm3, %v827_v14 }
  0x16   :  { %724 = vmatmul.mubr.msk.f32.vlgmr.msra.gmra.mrb[6].mxu1 %vm44_vm3, %v827_v14 }
  0xdc   :  { %v163_v51 = vpop.f32.mrb[0].mxu0 }
  0xdd   :  { %v234_v52 = vpop.f32.mrb[0].mxu1  ;;  %v665_v53 = vmax.f32 %v163_v51, 0.0  ;;  %v165_v55 = vpop.f32.mrb[1].mxu0 }
  0xde   :  { %v667_v54 = vmax.f32 %v234_v52, 0.0  ;;  %v236_v56 = vpop.f32.mrb[1].mxu1  ;;  %v666_v57 = vmax.f32 %v165_v55, 0.0 }
  0xdf   :  { %v668_v58 = vmax.f32 %v236_v56, 0.0  ;;  %681 = vst [vmem:[%s1003_s2] sm:$0x1f] %v665_v53 }
  0xe0   :  { %683 = vst [vmem:[%s1003_s2 + $0x10] sm:$0x1f] %v667_v54  ;;  %682 = vst [vmem:[%s1003_s2 + $0x8] sm:$0x1f] %v666_v57  ;;  %v305_v59 = vpop.f32.mrb[2].mxu0 }
  0xe1   :  { %684 = vst [vmem:[%s1003_s2 + $0x18] sm:$0x1f] %v668_v58  ;;  %v376_v60 = vpop.f32.mrb[2].mxu1  ;;  %v669_v61 = vmax.f32 %v305_v59, 0.0  ;;  %v307_v63 = vpop.f32.mrb[3].mxu0 }
  0xe2   :  { %v671_v62 = vmax.f32 %v376_v60, 0.0  ;;  %v378_v0 = vpop.f32.mrb[3].mxu1  ;;  %v670_v1 = vmax.f32 %v307_v63, 0.0 }
  0xe3   :  { %v672_v2 = vmax.f32 %v378_v0, 0.0  ;;  %685 = vst [vmem:[%s1003_s2 + $0x20] sm:$0x1f] %v669_v61 }
  0xe4   :  { %687 = vst [vmem:[%s1003_s2 + $0x30] sm:$0x1f] %v671_v62  ;;  %686 = vst [vmem:[%s1003_s2 + $0x28] sm:$0x1f] %v670_v1  ;;  %v447_v3 = vpop.f32.mrb[4].mxu0 }
  0xe5   :  { %688 = vst [vmem:[%s1003_s2 + $0x38] sm:$0x1f] %v672_v2  ;;  %v518_v4 = vpop.f32.mrb[4].mxu1  ;;  %v673_v5 = vmax.f32 %v447_v3, 0.0  ;;  %v449_v7 = vpop.f32.mrb[5].mxu0 }
  0xe6   :  { %v675_v6 = vmax.f32 %v518_v4, 0.0  ;;  %v520_v8 = vpop.f32.mrb[5].mxu1  ;;  %v674_v9 = vmax.f32 %v449_v7, 0.0 }
  0xe7   :  { %v676_v10 = vmax.f32 %v520_v8, 0.0  ;;  %689 = vst [vmem:[%s1003_s2 + $0x40] sm:$0x1f] %v673_v5 }
  0xe8   :  { %691 = vst [vmem:[%s1003_s2 + $0x50] sm:$0x1f] %v675_v6  ;;  %690 = vst [vmem:[%s1003_s2 + $0x48] sm:$0x1f] %v674_v9  ;;  %v589_v11 = vpop.f32.mrb[6].mxu0 }
  0xe9   :  { %692 = vst [vmem:[%s1003_s2 + $0x58] sm:$0x1f] %v676_v10  ;;  %v660_v12 = vpop.f32.mrb[6].mxu1  ;;  %v677_v13 = vmax.f32 %v589_v11, 0.0  ;;  %v591_v15 = vpop.f32.mrb[7].mxu0 }
  0xea   :  { %v679_v14 = vmax.f32 %v660_v12, 0.0  ;;  %v662_v16 = vpop.f32.mrb[7].mxu1  ;;  %v678_v17 = vmax.f32 %v591_v15, 0.0 }
  0xeb   :  { %v680_v18 = vmax.f32 %v662_v16, 0.0  ;;  %693 = vst [vmem:[%s1003_s2 + $0x60] sm:$0x1f] %v677_v13 }
  0xec   :  { %695 = vst [vmem:[%s1003_s2 + $0x70] sm:$0x1f] %v679_v14  ;;  %694 = vst [vmem:[%s1003_s2 + $0x68] sm:$0x1f] %v678_v17 }
  0xed   :  { %696 = vst [vmem:[%s1003_s2 + $0x78] sm:$0x1f] %v680_v18 }

// kernel: unet_forward.13
= control target key start
LH: loop header
LB: loop body
LE: loop exit
PB: predicated region body
PF: predicated region fallthrough
CT: control target
= control target key end

     0   :  { %v269_v3 = vmov 0.0   ;;  %vm44_vm0 = vcmask 1045504   ;;  %vm270_vm1 = vmmov 1   ;;  %vm37_vm3 = vcmask 375808   ;;  %s401_s0 = inlined_call_operand.vmem [shape: f32[46,512], index: 0, kind: input, shape index: {}]   ;;  %s402_s1 = inlined_call_operand.vmem [shape: f32[10,46], index: 1, kind: input, shape index: {}]   ;;  %s403_s2 = inlined_call_operand.vmem [shape: f32[10,512], index: 2, kind: output, shape index: {}]  }
   0x1   :  { %v14_v0 = vld [vmem:[%s401_s0 + $0x8] sm:$0xff]  ;;  %v16_v2 = vld [vmem:[%s401_s0 + $0x18] sm:$0xff]  ;;  %121 = vmatprep.mubr.f32.mxu0 %v269_v3  ;;  %198 = vmatprep.mubr.f32.mxu1 %v269_v3  ;;  %v13_v6 = vld [vmem:[%s401_s0] sm:$0xff] }
   0x2   :  { %v18_v1 = vld [vmem:[%s401_s0 + $0x28] sm:$0xff]  ;;  %v20_v5 = vld [vmem:[%s401_s0 + $0x38] sm:$0xff]  ;;  %v17_v7 = vld [vmem:[%s401_s0 + $0x20] sm:$0xff] }
   0x3   :  { %v239_v4 = vpack.c.bf16 %v18_v1, %v14_v0  ;;  %v253_v8 = vpack.c.bf16 %v20_v5, %v16_v2  ;;  %v241_v9 = vpack.c.bf16 %v17_v7, %v13_v6  ;;  %v15_v10 = vld [vmem:[%s401_s0 + $0x10] sm:$0xff]  ;;  %v22_v12 = vld [vmem:[%s401_s0 + $0x48] sm:$0xff]  ;;  %v24_v15 = vld [vmem:[%s401_s0 + $0x58] sm:$0xff] }
   0x4   :  { %v19_v11 = vld [vmem:[%s401_s0 + $0x30] sm:$0xff]  ;;  %v26_v14 = vld [vmem:[%s401_s0 + $0x68] sm:$0xff]  ;;  %v28_v16 = vld [vmem:[%s401_s0 + $0x78] sm:$0xff] }
   0x5   :  { %240 = vmatprep.subr.bf16.mxu0 %v239_v4  ;;  %v255_v13 = vpack.c.bf16 %v19_v11, %v15_v10  ;;  %254 = vmatprep.subr.bf16.mxu1 %v253_v8  ;;  %v243_v17 = vpack.c.bf16 %v26_v14, %v22_v12  ;;  %v257_v18 = vpack.c.bf16 %v28_v16, %v24_v15  ;;  %v21_v19 = vld [vmem:[%s401_s0 + $0x40] sm:$0xff]  ;;  %v23_v21 = vld [vmem:[%s401_s0 + $0x50] sm:$0xff]  ;;  %v30_v24 = vld [vmem:[%s401_s0 + $0x88] sm:$0xff] }
   0x6   :  { %242 = vmatpush1.bf16.msra.mxu0 %v241_v9  ;;  %v25_v20 = vld [vmem:[%s401_s0 + $0x60] sm:$0xff]  ;;  %v27_v23 = vld [vmem:[%s401_s0 + $0x70] sm:$0xff]  ;;  %v34_v25 = vld [vmem:[%s401_s0 + $0xa8] sm:$0x3f] }
   0x7   :  { %256 = vmatpush1.bf16.msra.mxu1 %v255_v13  ;;  %v245_v22 = vpack.c.bf16 %v25_v20, %v21_v19  ;;  %244 = vmatprep.subr.bf16.mxu0 %v243_v17  ;;  %v259_v26 = vpack.c.bf16 %v27_v23, %v23_v21  ;;  %v247_v27 = vpack.c.bf16 %v34_v25, %v30_v24  ;;  %vm341_vm2 = vmpackc.low %vm44_vm0, %vm270_vm1  ;;  %v32_v29 = vld [vmem:[%s401_s0 + $0x98] sm:$0xff]  ;;  %v29_v32 = vld [vmem:[%s401_s0 + $0x80] sm:$0xff] }
   0x8   :  { %258 = vmatprep.subr.bf16.mxu1 %v257_v18  ;;  %v36_v30 = vld [vmem:[%s401_s0 + $0xb8] sm:$0x3f]  ;;  %v33_v33 = vld [vmem:[%s401_s0 + $0xa0] sm:$0x3f]  ;;  %v31_v34 = vld [vmem:[%s401_s0 + $0x90] sm:$0xff] }
   0x9   :  { %v261_v31 = vpack.c.bf16 %v36_v30, %v32_v29  ;;  %v250_v35 = vpack.c.bf16 %v33_v33, %v29_v32  ;;  %v35_v36 = vld [vmem:[%s401_s0 + $0xb0] sm:$0x3f]  ;;  %v11_v38 = vld [vmem:[%s402_s1] sm:$0xff]  ;;  %v12_v39 = vld [vmem:[%s402_s1 + $0x8] sm:$0x3] }
   0xa   :  { %246 = vmatpush1.bf16.msra.mxu0 %v245_v22  ;;  %v264_v37 = vpack.c.bf16 %v35_v36, %v31_v34 }
   0xb   :  { %260 = vmatpush1.bf16.msra.mxu1 %v259_v26  ;;  %249 = vmatprep.subr.msk.bf16.mxu0 %vm341_vm2, %v247_v27 }
   0xc   :  { %263 = vmatprep.subr.msk.bf16.mxu1 %vm341_vm2, %v261_v31 }
   0xe   :  { %252 = vmatpush1.bf16.msk.msra.mxu0 %vm341_vm2, %v250_v35 }
   0xf   :  { %266 = vmatpush1.bf16.msk.msra.mxu1 %vm341_vm2, %v264_v37 }
  0x11   :  { %233 = vmatmul.mubr.msk.f32.vlgmr.msra.gmra.mrb[0].mxu0 %vm37_vm3, %v11_v38 }
  0x12   :  { %237 = vmatmul.mubr.msk.f32.vlgmr.msra.gmra.mrb[0].mxu1 %vm37_vm3, %v11_v38  ;;  %127 = vmatprep.mubr.f32.mxu0 %v269_v3 }
  0x13   :  { %204 = vmatprep.mubr.f32.mxu1 %v269_v3 }
  0x15   :  { %234 = vmatmul.mubr.msk.f32.gmra.mrb[2].mxu0 %vm37_vm3, %v12_v39 }
  0x16   :  { %238 = vmatmul.mubr.msk.f32.gmra.mrb[2].mxu1 %vm37_vm3, %v12_v39 }
  0xe4   :  { %v123_v40 = vpop.f32.mrb[0].mxu0 }
  0xe5   :  { %v211_v41 = vmax.f32 %v123_v40, 0.0  ;;  %v200_v42 = vpop.f32.mrb[0].mxu1  ;;  %v125_v43 = vpop.f32.mrb[1].mxu0 }
  0xe6   :  { %v213_v44 = vmax.f32 %v200_v42, 0.0  ;;  %v212_v45 = vmax.f32 %v125_v43, 0.0  ;;  %v202_v46 = vpop.f32.mrb[1].mxu1 }
  0xe7   :  { %219 = vst [vmem:[%s403_s2] sm:$0xff] %v211_v41  ;;  %v214_v47 = vmax.f32 %v202_v46, 0.0 }
  0xe8   :  { %221 = vst [vmem:[%s403_s2 + $0x10] sm:$0xff] %v213_v44  ;;  %220 = vst [vmem:[%s403_s2 + $0x8] sm:$0xff] %v212_v45  ;;  %v129_v48 = vpop.f32.mrb[2].mxu0 }
  0xe9   :  { %222 = vst [vmem:[%s403_s2 + $0x18] sm:$0xff] %v214_v47  ;;  %v215_v49 = vmax.f32 %v129_v48, 0.0  ;;  %v206_v50 = vpop.f32.mrb[2].mxu1  ;;  %v131_v51 = vpop.f32.mrb[3].mxu0 }
  0xea   :  { %v217_v52 = vmax.f32 %v206_v50, 0.0  ;;  %v216_v53 = vmax.f32 %v131_v51, 0.0  ;;  %v208_v54 = vpop.f32.mrb[3].mxu1 }
  0xeb   :  { %223 = vst [vmem:[%s403_s2 + $0x20] sm:$0x3] %v215_v49  ;;  %v218_v55 = vmax.f32 %v208_v54, 0.0 }
  0xec   :  { %225 = vst [vmem:[%s403_s2 + $0x30] sm:$0x3] %v217_v52  ;;  %224 = vst [vmem:[%s403_s2 + $0x28] sm:$0x3] %v216_v53 }
  0xed   :  { %226 = vst [vmem:[%s403_s2 + $0x38] sm:$0x3] %v218_v55 }

// kernel: unet_forward.14
= control target key start
LH: loop header
LB: loop body
LE: loop exit
PB: predicated region body
PF: predicated region fallthrough
CT: control target
= control target key end

     0   :  { %v217_v0 = vmov 0.0|0.0   ;;  %vm218_vm0 = vmmov 0   ;;  %v219_v6 = vmov 0.0   ;;  %vm36_vm1 = vcmask 1042432   ;;  %s293_s0 = inlined_call_operand.vmem [shape: f32[91,128], index: 0, kind: input, shape index: {}]   ;;  %s294_s1 = inlined_call_operand.vmem [shape: f32[20,91], index: 1, kind: input, shape index: {}]   ;;  %s295_s2 = inlined_call_operand.vmem [shape: f32[20,128], index: 2, kind: output, shape index: {}]  }
   0x1   :  { %201 = vmatprep.subr.bf16.mxu1 %v217_v0  ;;  %v14_v1 = vld [vmem:[%s293_s0] sm:$0xff]  ;;  %v15_v2 = vld [vmem:[%s293_s0 + $0x8] sm:$0xff]  ;;  %182 = vmatprep.subr.bf16.mxu0 %v217_v0  ;;  %v16_v3 = vld [vmem:[%s293_s0 + $0x10] sm:$0xff]  ;;  %vm220_vm2 = vmmov 1   ;;  %vm26_vm4 = vcmask 744448  }
   0x2   :  { %v183_v4 = vpack.c.bf16 %v15_v2, %v14_v1  ;;  %v17_v5 = vld [vmem:[%s293_s0 + $0x18] sm:$0xff]  ;;  %176 = vmatprep.mubr.msk.f32.mxu1 %vm218_vm0, %v219_v6  ;;  %173 = vmatprep.mubr.msk.f32.mxu0 %vm218_vm0, %v219_v6  ;;  %v18_v8 = vld [vmem:[%s293_s0 + $0x20] sm:$0xff]  ;;  %v19_v9 = vld [vmem:[%s293_s0 + $0x28] sm:$0xff] }
   0x3   :  { %v186_v7 = vpack.c.bf16 %v17_v5, %v16_v3  ;;  %v189_v10 = vpack.c.bf16 %v19_v9, %v18_v8  ;;  %v20_v11 = vld [vmem:[%s293_s0 + $0x30] sm:$0xff]  ;;  %v21_v12 = vld [vmem:[%s293_s0 + $0x38] sm:$0xff]  ;;  %v22_v14 = vld [vmem:[%s293_s0 + $0x40] sm:$0xff] }
   0x4   :  { %207 = vmatpush3.bf16.msra.mxu1 %v183_v4  ;;  %184 = vmatpush3.bf16.msra.mxu0 %v183_v4  ;;  %v192_v13 = vpack.c.bf16 %v21_v12, %v20_v11  ;;  %v23_v15 = vld [vmem:[%s293_s0 + $0x48] sm:$0xff]  ;;  %v24_v17 = vld [vmem:[%s293_s0 + $0x50] sm:$0xff]  ;;  %v25_v18 = vld [vmem:[%s293_s0 + $0x58] sm:$0x7] }
   0x5   :  { %202 = vmatprep.subr.bf16.mxu1 %v217_v0  ;;  %185 = vmatprep.subr.bf16.mxu0 %v217_v0  ;;  %v195_v16 = vpack.c.bf16 %v23_v15, %v22_v14  ;;  %v198_v19 = vpack.c.bf16 %v25_v18, %v24_v17  ;;  %vm199_vm3 = vmpackc.low %vm36_vm1, %vm220_vm2  ;;  %v12_v20 = vld [vmem:[%s294_s1 + $0x8] sm:$0xff]  ;;  %v11_v21 = vld [vmem:[%s294_s1] sm:$0xff] }
   0x6   :  { %v13_v22 = vld [vmem:[%s294_s1 + $0x10] sm:$0xf] }
   0x8   :  { %208 = vmatpush3.bf16.msra.mxu1 %v186_v7  ;;  %187 = vmatpush3.bf16.msra.mxu0 %v186_v7 }
   0x9   :  { %203 = vmatprep.subr.bf16.mxu1 %v217_v0  ;;  %188 = vmatprep.subr.bf16.mxu0 %v217_v0 }
   0xc   :  { %209 = vmatpush3.bf16.msra.mxu1 %v189_v10  ;;  %190 = vmatpush3.bf16.msra.mxu0 %v189_v10 }
   0xd   :  { %204 = vmatprep.subr.bf16.mxu1 %v217_v0  ;;  %191 = vmatprep.subr.bf16.mxu0 %v217_v0 }
  0x10   :  { %210 = vmatpush3.bf16.msra.mxu1 %v192_v13  ;;  %193 = vmatpush3.bf16.msra.mxu0 %v192_v13 }
  0x11   :  { %205 = vmatprep.subr.bf16.mxu1 %v217_v0  ;;  %194 = vmatprep.subr.bf16.mxu0 %v217_v0 }
  0x14   :  { %211 = vmatpush3.bf16.msra.mxu1 %v195_v16  ;;  %196 = vmatpush3.bf16.msra.mxu0 %v195_v16 }
  0x15   :  { %206 = vmatprep.subr.bf16.mxu1 %v217_v0  ;;  %197 = vmatprep.subr.bf16.mxu0 %v217_v0 }
  0x18   :  { %212 = vmatpush3.bf16.msk.msra.mxu1 %vm199_vm3, %v198_v19  ;;  %200 = vmatpush3.bf16.msk.msra.mxu0 %vm199_vm3, %v198_v19 }
  0x1b   :  { %177 = vmatmul.mubr.msk.f32.vlgmr.msra.gmra.mrb[0].mxu1 %vm26_vm4, %v12_v20  ;;  %174 = vmatmul.mubr.msk.f32.vlgmr.msra.gmra.mrb[0].mxu0 %vm26_vm4, %v11_v21 }
  0x1c   :  { %179 = vmatprep.mubr.msk.f32.mxu1 %vm218_vm0, %v219_v6 }
  0x1f   :  { %180 = vmatmul.mubr.msk.f32.gmra.mrb[2].mxu1 %vm26_vm4, %v13_v22 }
  0xee   :  { %v111_v23 = vpop.f32.mrb[0].mxu1  ;;  %v106_v24 = vpop.f32.mrb[0].mxu0 }
  0xef   :  { %v121_v25 = vmax.f32 %v111_v23, 0.0  ;;  %v178_v26 = vpop.f32.mrb[1].mxu1  ;;  %v120_v27 = vmax.f32 %v106_v24, 0.0  ;;  %v175_v28 = vpop.f32.mrb[1].mxu0 }
  0xf1   :  { %124 = vst [vmem:[%s295_s2 + $0x8] sm:$0xff] %v121_v25  ;;  %123 = vst [vmem:[%s295_s2] sm:$0xff] %v120_v27 }
  0xf2   :  { %v116_v29 = vpop.f32.mrb[2].mxu1 }
  0xf3   :  { %v122_v30 = vmax.f32 %v116_v29, 0.0  ;;  %v181_v31 = vpop.f32.mrb[3].mxu1 }
  0xf5   :  { %125 = vst [vmem:[%s295_s2 + $0x10] sm:$0xf] %v122_v30 }

// kernel: unet_forward.15
= control target key start
LH: loop header
LB: loop body
LE: loop exit
PB: predicated region body
PF: predicated region fallthrough
CT: control target
= control target key end

     0   :  { %v234_v0 = vmov 0.0|0.0   ;;  %vm44_vm0 = vcmask 433152   ;;  %v235_v36 = vmov 0.0   ;;  %vm60_vm1 = vcmask 1044480   ;;  %s397_s0 = inlined_call_operand.vmem [shape: f32[181,32], index: 0, kind: input, shape index: {}]   ;;  %s398_s1 = inlined_call_operand.vmem [shape: f32[40,181], index: 1, kind: input, shape index: {}]   ;;  %s399_s2 = inlined_call_operand.vmem [shape: f32[40,32], index: 2, kind: output, shape index: {}]  }
   0x1   :  { %175 = vmatprep.subr.bf16.mxu0 %v234_v0  ;;  %v21_v1 = vld [vmem:[%s397_s0] sm:$0xff]  ;;  %v22_v2 = vld [vmem:[%s397_s0 + $0x8] sm:$0xff]  ;;  %208 = vmatprep.subr.bf16.mxu1 %v234_v0  ;;  %v23_v3 = vld [vmem:[%s397_s0 + $0x10] sm:$0xff]  ;;  %vm159_vm2 = vcmask 261120  }
   0x2   :  { %v176_v4 = vpack.c.bf16 %v22_v2, %v21_v1  ;;  %v24_v5 = vld [vmem:[%s397_s0 + $0x18] sm:$0xff]  ;;  %v25_v7 = vld [vmem:[%s397_s0 + $0x20] sm:$0xff]  ;;  %v26_v8 = vld [vmem:[%s397_s0 + $0x28] sm:$0xff] }
   0x3   :  { %v179_v6 = vpack.c.bf16 %v24_v5, %v23_v3  ;;  %v182_v9 = vpack.c.bf16 %v26_v8, %v25_v7  ;;  %v12_v10 = vld [vmem:[%s398_s1 + $0x8] sm:$0xff]  ;;  %v27_v11 = vld [vmem:[%s397_s0 + $0x30] sm:$0xff]  ;;  %v28_v12 = vld [vmem:[%s397_s0 + $0x38] sm:$0xff] }
   0x4   :  { %177 = vmatpush1.bf16.msra.mxu0 %v176_v4  ;;  %220 = vmatpush1.bf16.msra.mxu1 %v176_v4  ;;  %v18_v13 = vld [vmem:[%s398_s1 + $0x38] sm:$0xff]  ;;  %v185_v14 = vpack.c.bf16 %v28_v12, %v27_v11  ;;  %v29_v15 = vld [vmem:[%s397_s0 + $0x40] sm:$0xff]  ;;  %v30_v16 = vld [vmem:[%s397_s0 + $0x48] sm:$0xff] }
   0x5   :  { %178 = vmatprep.subr.bf16.mxu0 %v234_v0  ;;  %209 = vmatprep.subr.bf16.mxu1 %v234_v0  ;;  %v188_v17 = vpack.c.bf16 %v30_v16, %v29_v15  ;;  %v31_v18 = vld [vmem:[%s397_s0 + $0x50] sm:$0xff]  ;;  %v32_v19 = vld [vmem:[%s397_s0 + $0x58] sm:$0xff]  ;;  %v33_v21 = vld [vmem:[%s397_s0 + $0x60] sm:$0xff] }
   0x6   :  { %170 = vmatprep.mubr.msk.f32.mxu0 %vm44_vm0, %v12_v10  ;;  %173 = vmatprep.mubr.msk.f32.mxu1 %vm44_vm0, %v18_v13  ;;  %v191_v20 = vpack.c.bf16 %v32_v19, %v31_v18  ;;  %v34_v22 = vld [vmem:[%s397_s0 + $0x68] sm:$0xff]  ;;  %v35_v24 = vld [vmem:[%s397_s0 + $0x70] sm:$0xff]  ;;  %v36_v25 = vld [vmem:[%s397_s0 + $0x78] sm:$0xff] }
   0x7   :  { %v194_v23 = vpack.c.bf16 %v34_v22, %v33_v21  ;;  %v197_v26 = vpack.c.bf16 %v36_v25, %v35_v24  ;;  %v37_v27 = vld [vmem:[%s397_s0 + $0x80] sm:$0xff]  ;;  %v38_v28 = vld [vmem:[%s397_s0 + $0x88] sm:$0xff]  ;;  %v39_v30 = vld [vmem:[%s397_s0 + $0x90] sm:$0xff] }
   0x8   :  { %180 = vmatpush1.bf16.msra.mxu0 %v179_v6  ;;  %221 = vmatpush1.bf16.msra.mxu1 %v179_v6  ;;  %v200_v29 = vpack.c.bf16 %v38_v28, %v37_v27  ;;  %v40_v31 = vld [vmem:[%s397_s0 + $0x98] sm:$0xff]  ;;  %v41_v33 = vld [vmem:[%s397_s0 + $0xa0] sm:$0xff]  ;;  %v42_v34 = vld [vmem:[%s397_s0 + $0xa8] sm:$0xff] }
   0x9   :  { %181 = vmatprep.subr.bf16.mxu0 %v234_v0  ;;  %210 = vmatprep.subr.bf16.mxu1 %v234_v0  ;;  %v203_v32 = vpack.c.bf16 %v40_v31, %v39_v30  ;;  %v206_v35 = vpack.c.bf16 %v42_v34, %v41_v33  ;;  %v43_v37 = vld [vmem:[%s397_s0 + $0xb0] sm:$0x1f]  ;;  %v11_v38 = vld [vmem:[%s398_s1] sm:$0xff]  ;;  %v14_v40 = vld [vmem:[%s398_s1 + $0x18] sm:$0xff] }
   0xa   :  { %v17_v39 = vld [vmem:[%s398_s1 + $0x30] sm:$0xff]  ;;  %v20_v41 = vld [vmem:[%s398_s1 + $0x48] sm:$0xff]  ;;  %v19_v43 = vld [vmem:[%s398_s1 + $0x40] sm:$0xff] }
   0xb   :  { %v13_v42 = vld [vmem:[%s398_s1 + $0x10] sm:$0xff]  ;;  %v16_v44 = vld [vmem:[%s398_s1 + $0x28] sm:$0xff]  ;;  %v15_v45 = vld [vmem:[%s398_s1 + $0x20] sm:$0xff] }
   0xc   :  { %183 = vmatpush1.bf16.msra.mxu0 %v182_v9  ;;  %222 = vmatpush1.bf16.msra.mxu1 %v182_v9 }
   0xd   :  { %184 = vmatprep.subr.bf16.mxu0 %v234_v0  ;;  %211 = vmatprep.subr.bf16.mxu1 %v234_v0 }
  0x10   :  { %186 = vmatpush1.bf16.msra.mxu0 %v185_v14  ;;  %223 = vmatpush1.bf16.msra.mxu1 %v185_v14 }
  0x11   :  { %187 = vmatprep.subr.bf16.mxu0 %v234_v0  ;;  %212 = vmatprep.subr.bf16.mxu1 %v234_v0 }
  0x14   :  { %189 = vmatpush1.bf16.msra.mxu0 %v188_v17  ;;  %224 = vmatpush1.bf16.msra.mxu1 %v188_v17 }
  0x15   :  { %190 = vmatprep.subr.bf16.mxu0 %v234_v0  ;;  %213 = vmatprep.subr.bf16.mxu1 %v234_v0 }
  0x18   :  { %192 = vmatpush1.bf16.msra.mxu0 %v191_v20  ;;  %225 = vmatpush1.bf16.msra.mxu1 %v191_v20 }
  0x19   :  { %193 = vmatprep.subr.bf16.mxu0 %v234_v0  ;;  %214 = vmatprep.subr.bf16.mxu1 %v234_v0 }
  0x1c   :  { %195 = vmatpush1.bf16.msra.mxu0 %v194_v23  ;;  %226 = vmatpush1.bf16.msra.mxu1 %v194_v23 }
  0x1d   :  { %196 = vmatprep.subr.bf16.mxu0 %v234_v0  ;;  %215 = vmatprep.subr.bf16.mxu1 %v234_v0 }
  0x20   :  { %198 = vmatpush1.bf16.msra.mxu0 %v197_v26  ;;  %227 = vmatpush1.bf16.msra.mxu1 %v197_v26 }
  0x21   :  { %199 = vmatprep.subr.bf16.mxu0 %v234_v0  ;;  %216 = vmatprep.subr.bf16.mxu1 %v234_v0 }
  0x24   :  { %201 = vmatpush1.bf16.msra.mxu0 %v200_v29  ;;  %228 = vmatpush1.bf16.msra.mxu1 %v200_v29 }
  0x25   :  { %202 = vmatprep.subr.bf16.mxu0 %v234_v0  ;;  %217 = vmatprep.subr.bf16.mxu1 %v234_v0 }
  0x28   :  { %204 = vmatpush1.bf16.msra.mxu0 %v203_v32  ;;  %229 = vmatpush1.bf16.msra.mxu1 %v203_v32 }
  0x29   :  { %205 = vmatprep.subr.bf16.mxu0 %v234_v0  ;;  %218 = vmatprep.subr.bf16.mxu1 %v234_v0 }
  0x2c   :  { %207 = vmatpush1.bf16.msra.mxu0 %v206_v35  ;;  %230 = vmatpush1.bf16.msra.mxu1 %v206_v35 }
  0x2d   :  { %108 = vmatprep.subr.mxu0 %v235_v36  ;;  %219 = vmatprep.subr.mxu1 %v235_v36 }
  0x30   :  { %169 = vmatpush1.msk.msra.mxu0 %vm60_vm1, %v43_v37  ;;  %231 = vmatpush1.msk.msra.mxu1 %vm60_vm1, %v43_v37 }
  0x31   :  { %129 = vmatmul.mubr.f32.vlgmr.msra.gmra.mrb[0].mxu0 %v11_v38  ;;  %144 = vmatmul.mubr.f32.vlgmr.msra.gmra.mrb[0].mxu1 %v17_v39 }
  0x32   :  { %171 = vmatprep.mubr.msk.f32.mxu0 %vm44_vm0, %v14_v40  ;;  %174 = vmatprep.mubr.msk.f32.mxu1 %vm44_vm0, %v20_v41 }
  0x35   :  { %134 = vmatmul.mubr.f32.gmra.mrb[2].mxu0 %v13_v42  ;;  %149 = vmatmul.mubr.f32.gmra.mrb[2].mxu1 %v19_v43 }
  0x36   :  { %172 = vmatprep.mubr.msk.f32.mxu0 %vm44_vm0, %v16_v44 }
  0x39   :  { %139 = vmatmul.mubr.f32.gmra.mrb[4].mxu0 %v15_v45 }
 0x104   :  { %v130_v46 = vpop.f32.mrb[0].mxu0  ;;  %v145_v47 = vpop.f32.mrb[0].mxu1 }
 0x105   :  { %v154_v48 = vmax.f32 %v130_v46, 0.0  ;;  %v132_v49 = vpop.f32.mrb[1].mxu0  ;;  %v157_v50 = vmax.f32 %v145_v47, 0.0  ;;  %v147_v51 = vpop.f32.mrb[1].mxu1 }
 0x107   :  { %160 = vst.msk [vmem:[%s399_s2] sm:$0xff] %vm159_vm2, %v154_v48  ;;  %163 = vst.msk [vmem:[%s399_s2 + $0x18] sm:$0xff] %vm159_vm2, %v157_v50 }
 0x108   :  { %v135_v52 = vpop.f32.mrb[2].mxu0  ;;  %v150_v53 = vpop.f32.mrb[2].mxu1 }
 0x109   :  { %v155_v54 = vmax.f32 %v135_v52, 0.0  ;;  %v137_v55 = vpop.f32.mrb[3].mxu0  ;;  %v158_v56 = vmax.f32 %v150_v53, 0.0  ;;  %v152_v57 = vpop.f32.mrb[3].mxu1 }
 0x10b   :  { %161 = vst.msk [vmem:[%s399_s2 + $0x8] sm:$0xff] %vm159_vm2, %v155_v54  ;;  %164 = vst.msk [vmem:[%s399_s2 + $0x20] sm:$0xff] %vm159_vm2, %v158_v56 }
 0x10c   :  { %v140_v58 = vpop.f32.mrb[4].mxu0 }
 0x10d   :  { %v156_v59 = vmax.f32 %v140_v58, 0.0  ;;  %v142_v60 = vpop.f32.mrb[5].mxu0 }
 0x10f   :  { %162 = vst.msk [vmem:[%s399_s2 + $0x10] sm:$0xff] %vm159_vm2, %v156_v59 }

// kernel: unet_forward.16
= control target key start
LH: loop header
LB: loop body
LE: loop exit
PB: predicated region body
PF: predicated region fallthrough
CT: control target
= control target key end

     0   :  { %v460_v3 = vmov 0.0|0.0   ;;  %vm461_vm0 = vmmov 0   ;;  %v462_v8 = vmov 0.0   ;;  %vm88_vm1 = vcmask 1040384   ;;  %s704_s0 = inlined_call_operand.vmem [shape: f32[361,8], index: 0, kind: input, shape index: {}]   ;;  %s705_s1 = inlined_call_operand.vmem [shape: f32[40,361], index: 1, kind: input, shape index: {}]   ;;  %s706_s2 = inlined_call_operand.vmem [shape: f32[40,8], index: 2, kind: output, shape index: {}]  }
   0x1   :  { %v42_v0 = vld [vmem:[%s704_s0 + $0x80] sm:$0xff]  ;;  %v43_v1 = vld [vmem:[%s704_s0 + $0x88] sm:$0xff]  ;;  %434 = vmatprep.subr.bf16.mxu1 %v460_v3  ;;  %v44_v6 = vld [vmem:[%s704_s0 + $0x90] sm:$0xff]  ;;  %387 = vmatprep.mubr.msk.f32.mxu1 %vm461_vm0, %v462_v8  ;;  %vm463_vm2 = vmmov 1   ;;  %vm72_vm4 = vcmask 859136   ;;  %vm277_vm5 = vcmask 64512  }
   0x2   :  { %v26_v2 = vld [vmem:[%s704_s0] sm:$0xff]  ;;  %v402_v4 = vpack.c.bf16 %v43_v1, %v42_v0  ;;  %v27_v5 = vld [vmem:[%s704_s0 + $0x8] sm:$0xff]  ;;  %v45_v7 = vld [vmem:[%s704_s0 + $0x98] sm:$0xff] }
   0x3   :  { %v404_v9 = vpack.c.bf16 %v27_v5, %v26_v2  ;;  %v406_v10 = vpack.c.bf16 %v45_v7, %v44_v6  ;;  %v28_v11 = vld [vmem:[%s704_s0 + $0x10] sm:$0xff]  ;;  %v29_v12 = vld [vmem:[%s704_s0 + $0x18] sm:$0xff]  ;;  %v58_v13 = vld [vmem:[%s704_s0 + $0x100] sm:$0xff] }
   0x4   :  { %403 = vmatprep.subr.bf16.mxu0 %v402_v4  ;;  %v59_v14 = vld [vmem:[%s704_s0 + $0x108] sm:$0xff]  ;;  %v46_v15 = vld [vmem:[%s704_s0 + $0xa0] sm:$0xff]  ;;  %v408_v17 = vpack.c.bf16 %v29_v12, %v28_v11  ;;  %v60_v19 = vld [vmem:[%s704_s0 + $0x110] sm:$0xff] }
   0x5   :  { %v47_v16 = vld [vmem:[%s704_s0 + $0xa8] sm:$0xff]  ;;  %405 = vmatpush3.bf16.msra.mxu0 %v404_v9  ;;  %v435_v18 = vpack.c.bf16 %v59_v14, %v58_v13  ;;  %v30_v21 = vld [vmem:[%s704_s0 + $0x20] sm:$0xff]  ;;  %v61_v23 = vld [vmem:[%s704_s0 + $0x118] sm:$0xff] }
   0x6   :  { %407 = vmatprep.subr.bf16.mxu0 %v406_v10  ;;  %v410_v20 = vpack.c.bf16 %v47_v16, %v46_v15  ;;  %v31_v22 = vld [vmem:[%s704_s0 + $0x28] sm:$0xff]  ;;  %v438_v24 = vpack.c.bf16 %v61_v23, %v60_v19  ;;  %v48_v25 = vld [vmem:[%s704_s0 + $0xb0] sm:$0xff]  ;;  %v49_v26 = vld [vmem:[%s704_s0 + $0xb8] sm:$0xff] }
   0x7   :  { %436 = vmatpush3.bf16.msra.mxu1 %v435_v18  ;;  %v62_v27 = vld [vmem:[%s704_s0 + $0x120] sm:$0xff]  ;;  %v63_v28 = vld [vmem:[%s704_s0 + $0x128] sm:$0xff]  ;;  %v412_v29 = vpack.c.bf16 %v31_v22, %v30_v21  ;;  %v414_v30 = vpack.c.bf16 %v49_v26, %v48_v25  ;;  %v32_v31 = vld [vmem:[%s704_s0 + $0x30] sm:$0xff] }
   0x8   :  { %437 = vmatprep.subr.bf16.mxu1 %v460_v3  ;;  %v33_v32 = vld [vmem:[%s704_s0 + $0x38] sm:$0xff]  ;;  %v441_v33 = vpack.c.bf16 %v63_v28, %v62_v27  ;;  %v50_v34 = vld [vmem:[%s704_s0 + $0xc0] sm:$0xff]  ;;  %v51_v35 = vld [vmem:[%s704_s0 + $0xc8] sm:$0xff] }
   0x9   :  { %409 = vmatpush3.bf16.msra.mxu0 %v408_v17  ;;  %v64_v36 = vld [vmem:[%s704_s0 + $0x130] sm:$0xff]  ;;  %v65_v37 = vld [vmem:[%s704_s0 + $0x138] sm:$0xff]  ;;  %v416_v38 = vpack.c.bf16 %v33_v32, %v32_v31  ;;  %v418_v39 = vpack.c.bf16 %v51_v35, %v50_v34  ;;  %v34_v40 = vld [vmem:[%s704_s0 + $0x40] sm:$0xff] }
   0xa   :  { %411 = vmatprep.subr.bf16.mxu0 %v410_v20  ;;  %v35_v41 = vld [vmem:[%s704_s0 + $0x48] sm:$0xff]  ;;  %v444_v42 = vpack.c.bf16 %v65_v37, %v64_v36  ;;  %v52_v43 = vld [vmem:[%s704_s0 + $0xd0] sm:$0xff]  ;;  %v53_v44 = vld [vmem:[%s704_s0 + $0xd8] sm:$0xff] }
   0xb   :  { %439 = vmatpush3.bf16.msra.mxu1 %v438_v24  ;;  %v12_v45 = vld [vmem:[%s705_s1 + $0x8] sm:$0xff]  ;;  %v66_v46 = vld [vmem:[%s704_s0 + $0x140] sm:$0xff]  ;;  %v420_v48 = vpack.c.bf16 %v35_v41, %v34_v40  ;;  %v422_v49 = vpack.c.bf16 %v53_v44, %v52_v43  ;;  %v36_v50 = vld [vmem:[%s704_s0 + $0x50] sm:$0xff] }
   0xc   :  { %440 = vmatprep.subr.bf16.mxu1 %v460_v3  ;;  %v67_v47 = vld [vmem:[%s704_s0 + $0x148] sm:$0xff]  ;;  %156 = vmatprep.mubr.f32.mxu0 %v12_v45  ;;  %v37_v51 = vld [vmem:[%s704_s0 + $0x58] sm:$0xff]  ;;  %v54_v53 = vld [vmem:[%s704_s0 + $0xe0] sm:$0xff] }
   0xd   :  { %413 = vmatpush3.bf16.msra.mxu0 %v412_v29  ;;  %v447_v52 = vpack.c.bf16 %v67_v47, %v66_v46  ;;  %v55_v54 = vld [vmem:[%s704_s0 + $0xe8] sm:$0xff]  ;;  %v68_v55 = vld [vmem:[%s704_s0 + $0x150] sm:$0xff]  ;;  %v69_v56 = vld [vmem:[%s704_s0 + $0x158] sm:$0xff]  ;;  %v424_v57 = vpack.c.bf16 %v37_v51, %v36_v50 }
   0xe   :  { %415 = vmatprep.subr.bf16.mxu0 %v414_v30  ;;  %v426_v58 = vpack.c.bf16 %v55_v54, %v54_v53  ;;  %v38_v59 = vld [vmem:[%s704_s0 + $0x60] sm:$0xff]  ;;  %v39_v60 = vld [vmem:[%s704_s0 + $0x68] sm:$0xff]  ;;  %v450_v61 = vpack.c.bf16 %v69_v56, %v68_v55  ;;  %v56_v62 = vld [vmem:[%s704_s0 + $0xf0] sm:$0xff] }
   0xf   :  { %442 = vmatpush3.bf16.msra.mxu1 %v441_v33  ;;  %v57_v63 = vld [vmem:[%s704_s0 + $0xf8] sm:$0xff]  ;;  %v70_v0 = vld [vmem:[%s704_s0 + $0x160] sm:$0xff]  ;;  %v71_v1 = vld [vmem:[%s704_s0 + $0x168] sm:$0x1]  ;;  %v428_v2 = vpack.c.bf16 %v39_v60, %v38_v59 }
  0x10   :  { %443 = vmatprep.subr.bf16.mxu1 %v460_v3  ;;  %v430_v4 = vpack.c.bf16 %v57_v63, %v56_v62  ;;  %v40_v5 = vld [vmem:[%s704_s0 + $0x70] sm:$0xff]  ;;  %v41_v6 = vld [vmem:[%s704_s0 + $0x78] sm:$0xff]  ;;  %v453_v7 = vpack.c.bf16 %v71_v1, %v70_v0  ;;  %vm454_vm3 = vmpackc.low %vm88_vm1, %vm463_vm2 }
  0x11   :  { %417 = vmatpush3.bf16.msra.mxu0 %v416_v38  ;;  %v432_v9 = vpack.c.bf16 %v41_v6, %v40_v5  ;;  %v13_v10 = vld [vmem:[%s705_s1 + $0x10] sm:$0xff]  ;;  %v11_v11 = vld [vmem:[%s705_s1] sm:$0xff]  ;;  %v16_v12 = vld [vmem:[%s705_s1 + $0x28] sm:$0xff] }
  0x12   :  { %419 = vmatprep.subr.bf16.mxu0 %v418_v39  ;;  %v14_v13 = vld [vmem:[%s705_s1 + $0x18] sm:$0xff]  ;;  %v19_v15 = vld [vmem:[%s705_s1 + $0x40] sm:$0xff]  ;;  %v17_v16 = vld [vmem:[%s705_s1 + $0x30] sm:$0xff] }
  0x13   :  { %445 = vmatpush3.bf16.msra.mxu1 %v444_v42  ;;  %v18_v14 = vld [vmem:[%s705_s1 + $0x38] sm:$0xff]  ;;  %v21_v17 = vld [vmem:[%s705_s1 + $0x50] sm:$0xff]  ;;  %v20_v19 = vld [vmem:[%s705_s1 + $0x48] sm:$0xff] }
  0x14   :  { %446 = vmatprep.subr.bf16.mxu1 %v460_v3  ;;  %v22_v18 = vld [vmem:[%s705_s1 + $0x58] sm:$0xff]  ;;  %v24_v20 = vld [vmem:[%s705_s1 + $0x68] sm:$0xff]  ;;  %v25_v21 = vld [vmem:[%s705_s1 + $0x70] sm:$0xff] }
  0x15   :  { %421 = vmatpush3.bf16.msra.mxu0 %v420_v48  ;;  %v23_v22 = vld [vmem:[%s705_s1 + $0x60] sm:$0xff] }
  0x16   :  { %423 = vmatprep.subr.bf16.mxu0 %v422_v49 }
  0x17   :  { %448 = vmatpush3.bf16.msra.mxu1 %v447_v52 }
  0x18   :  { %449 = vmatprep.subr.bf16.mxu1 %v460_v3 }
  0x19   :  { %425 = vmatpush3.bf16.msra.mxu0 %v424_v57 }
  0x1a   :  { %427 = vmatprep.subr.bf16.mxu0 %v426_v58 }
  0x1b   :  { %451 = vmatpush3.bf16.msra.mxu1 %v450_v61 }
  0x1c   :  { %452 = vmatprep.subr.bf16.mxu1 %v460_v3  ;;  %v15_v3 = vld [vmem:[%s705_s1 + $0x20] sm:$0xff] }
  0x1d   :  { %429 = vmatpush3.bf16.msra.mxu0 %v428_v2 }
  0x1e   :  { %431 = vmatprep.subr.bf16.mxu0 %v430_v4 }
  0x1f   :  { %455 = vmatpush3.bf16.msk.msra.mxu1 %vm454_vm3, %v453_v7 }
  0x21   :  { %433 = vmatpush3.bf16.msra.mxu0 %v432_v9 }
  0x22   :  { %388 = vmatmul.mubr.msk.f32.vlgmr.msra.gmra.mrb[0].mxu1 %vm72_vm4, %v13_v10 }
  0x23   :  { %390 = vmatprep.mubr.msk.f32.mxu1 %vm461_vm0, %v462_v8 }
  0x24   :  { %157 = vmatmul.mubr.f32.vlgmr.msra.gmra.mrb[0].mxu0 %v11_v11 }
  0x25   :  { %161 = vmatprep.mubr.f32.mxu0 %v15_v3 }
  0x26   :  { %391 = vmatmul.mubr.msk.f32.gmra.mrb[2].mxu1 %vm72_vm4, %v16_v12 }
  0x27   :  { %393 = vmatprep.mubr.msk.f32.mxu1 %vm461_vm0, %v462_v8 }
  0x28   :  { %162 = vmatmul.mubr.f32.gmra.mrb[2].mxu0 %v14_v13 }
  0x29   :  { %166 = vmatprep.mubr.f32.mxu0 %v18_v14 }
  0x2a   :  { %394 = vmatmul.mubr.msk.f32.gmra.mrb[4].mxu1 %vm72_vm4, %v19_v15 }
  0x2b   :  { %396 = vmatprep.mubr.msk.f32.mxu1 %vm461_vm0, %v462_v8 }
  0x2c   :  { %167 = vmatmul.mubr.f32.gmra.mrb[4].mxu0 %v17_v16 }
  0x2d   :  { %171 = vmatprep.mubr.f32.mxu0 %v21_v17 }
  0x2e   :  { %397 = vmatmul.mubr.msk.f32.gmra.mrb[6].mxu1 %vm72_vm4, %v22_v18 }
  0x2f   :  { %399 = vmatprep.mubr.msk.f32.mxu1 %vm461_vm0, %v462_v8 }
  0x30   :  { %172 = vmatmul.mubr.f32.gmra.mrb[6].mxu0 %v20_v19 }
  0x31   :  { %176 = vmatprep.mubr.f32.mxu0 %v24_v20 }
  0x32   :  { %400 = vmatmul.mubr.msk.f32.gmra.mrb[8].mxu1 %vm72_vm4, %v25_v21 }
  0x34   :  { %177 = vmatmul.mubr.f32.gmra.mrb[8].mxu0 %v23_v22 }
  0xf5   :  { %v248_v23 = vpop.f32.mrb[0].mxu1 }
  0xf6   :  { %v389_v24 = vpop.f32.mrb[1].mxu1 }
  0xf7   :  { %v325_v25 = vpop.f32.mrb[0].mxu0 }
  0xf8   :  { %v326_v26 = vpop.f32.mrb[1].mxu0 }
  0xf9   :  { %v327_v27 = vadd.f32 %v326_v26, %v325_v25  ;;  %v253_v28 = vpop.f32.mrb[2].mxu1 }
  0xfa   :  { %v392_v8 = vpop.f32.mrb[3].mxu1 }
  0xfb   :  { %v249_v29 = vadd.f32 %v327_v27, %v248_v23  ;;  %v328_v30 = vpop.f32.mrb[2].mxu0 }
  0xfc   :  { %v329_v31 = vpop.f32.mrb[3].mxu0 }
  0xfd   :  { %v272_v32 = vmax.f32 %v249_v29, 0.0  ;;  %v330_v33 = vadd.f32 %v329_v31, %v328_v30  ;;  %v258_v34 = vpop.f32.mrb[4].mxu1 }
  0xfe   :  { %v395_v35 = vpop.f32.mrb[5].mxu1 }
  0xff   :  { %278 = vst.msk [vmem:[%s706_s2] sm:$0xff] %vm277_vm5, %v272_v32  ;;  %v254_v36 = vadd.f32 %v330_v33, %v253_v28  ;;  %v331_v37 = vpop.f32.mrb[4].mxu0 }
 0x100   :  { %v332_v38 = vpop.f32.mrb[5].mxu0 }
 0x101   :  { %v273_v39 = vmax.f32 %v254_v36, 0.0  ;;  %v333_v40 = vadd.f32 %v332_v38, %v331_v37  ;;  %v263_v41 = vpop.f32.mrb[6].mxu1 }
 0x102   :  { %v398_v42 = vpop.f32.mrb[7].mxu1 }
 0x103   :  { %279 = vst.msk [vmem:[%s706_s2 + $0x8] sm:$0xff] %vm277_vm5, %v273_v39  ;;  %v259_v43 = vadd.f32 %v333_v40, %v258_v34  ;;  %v334_v44 = vpop.f32.mrb[6].mxu0 }
 0x104   :  { %v335_v45 = vpop.f32.mrb[7].mxu0 }
 0x105   :  { %v274_v46 = vmax.f32 %v259_v43, 0.0  ;;  %v336_v47 = vadd.f32 %v335_v45, %v334_v44  ;;  %v268_v48 = vpop.f32.mrb[8].mxu1 }
 0x106   :  { %v401_v49 = vpop.f32.mrb[9].mxu1 }
 0x107   :  { %280 = vst.msk [vmem:[%s706_s2 + $0x10] sm:$0xff] %vm277_vm5, %v274_v46  ;;  %v264_v50 = vadd.f32 %v336_v47, %v263_v41  ;;  %v337_v51 = vpop.f32.mrb[8].mxu0 }
 0x108   :  { %v338_v52 = vpop.f32.mrb[9].mxu0 }
 0x109   :  { %v275_v53 = vmax.f32 %v264_v50, 0.0  ;;  %v339_v54 = vadd.f32 %v338_v52, %v337_v51 }
 0x10b   :  { %281 = vst.msk [vmem:[%s706_s2 + $0x18] sm:$0xff] %vm277_vm5, %v275_v53  ;;  %v269_v55 = vadd.f32 %v339_v54, %v268_v48 }
 0x10d   :  { %v276_v56 = vmax.f32 %v269_v55, 0.0 }
 0x10f   :  { %282 = vst.msk [vmem:[%s706_s2 + $0x20] sm:$0xff] %vm277_vm5, %v276_v56 }

// kernel: unet_forward.17
= control target key start
LH: loop header
LB: loop body
LE: loop exit
PB: predicated region body
PF: predicated region fallthrough
CT: control target
= control target key end

     0   :  { %vm794_vm0 = vmmov 0   ;;  %vm306_vm1 = vcmask 1040384   ;;  %vm126_vm2 = vcmask 850944   ;;  %vm796_vm3 = vmmov 1   ;;  %s1180_s1 = inlined_call_operand.vmem [shape: f32[360,32], index: 1, kind: input, shape index: {}]   ;;  %s1181_s0 = inlined_call_operand.vmem [shape: f32[361,32], index: 0, kind: input, shape index: {}]   ;;  %s1182_s3 = inlined_call_operand.vmem [shape: f32[20,360], index: 3, kind: input, shape index: {}]   ;;  %s1183_s2 = inlined_call_operand.vmem [shape: f32[20,361], index: 2, kind: input, shape index: {}]   ;;  %s1184_s4 = inlined_call_operand.vmem [shape: f32[20,32], index: 4, kind: output, shape index: {}]  }
   0x1   :  { %v97_v0 = vld [vmem:[%s1180_s1 + $0x80] sm:$0xff]  ;;  %v98_v1 = vld [vmem:[%s1180_s1 + $0x88] sm:$0xff]  ;;  %v99_v11 = vld [vmem:[%s1180_s1 + $0x90] sm:$0xff]  ;;  %vm296_vm5 = vcmask 859136   ;;  %vm473_vm6 = vcmask 261120   ;;  %vm476_vm7 = vcmask 257024  }
   0x2   :  { %v81_v2 = vld [vmem:[%s1180_s1] sm:$0xff]  ;;  %v676_v3 = vpack.c.bf16 %v98_v1, %v97_v0  ;;  %v82_v4 = vld [vmem:[%s1180_s1 + $0x8] sm:$0xff]  ;;  %v100_v13 = vld [vmem:[%s1180_s1 + $0x98] sm:$0xff] }
   0x3   :  { %v42_v5 = vld [vmem:[%s1181_s0 + $0x80] sm:$0xff]  ;;  %v43_v6 = vld [vmem:[%s1181_s0 + $0x88] sm:$0xff]  ;;  %v678_v7 = vpack.c.bf16 %v82_v4, %v81_v2  ;;  %v83_v14 = vld [vmem:[%s1180_s1 + $0x10] sm:$0xff]  ;;  %v680_v16 = vpack.c.bf16 %v100_v13, %v99_v11 }
   0x4   :  { %v726_v8 = vpack.c.bf16 %v43_v6, %v42_v5  ;;  %v26_v9 = vld [vmem:[%s1181_s0] sm:$0xff]  ;;  %v27_v10 = vld [vmem:[%s1181_s0 + $0x8] sm:$0xff]  ;;  %677 = vmatprep.subr.bf16.mxu0 %v676_v3  ;;  %v84_v15 = vld [vmem:[%s1180_s1 + $0x18] sm:$0xff] }
   0x5   :  { %v728_v12 = vpack.c.bf16 %v27_v10, %v26_v9  ;;  %679 = vmatpush3.bf16.msra.mxu0 %v678_v7  ;;  %v682_v17 = vpack.c.bf16 %v84_v15, %v83_v14  ;;  %v44_v18 = vld [vmem:[%s1181_s0 + $0x90] sm:$0xff]  ;;  %v45_v19 = vld [vmem:[%s1181_s0 + $0x98] sm:$0xff]  ;;  %v101_v23 = vld [vmem:[%s1180_s1 + $0xa0] sm:$0xff] }
   0x6   :  { %727 = vmatprep.subr.bf16.mxu1 %v726_v8  ;;  %v28_v20 = vld [vmem:[%s1181_s0 + $0x10] sm:$0xff]  ;;  %v730_v21 = vpack.c.bf16 %v45_v19, %v44_v18  ;;  %v29_v22 = vld [vmem:[%s1181_s0 + $0x18] sm:$0xff]  ;;  %v102_v24 = vld [vmem:[%s1180_s1 + $0xa8] sm:$0xff]  ;;  %681 = vmatprep.subr.bf16.mxu0 %v680_v16 }
   0x7   :  { %729 = vmatpush3.bf16.msra.mxu1 %v728_v12  ;;  %v732_v25 = vpack.c.bf16 %v29_v22, %v28_v20  ;;  %v684_v26 = vpack.c.bf16 %v102_v24, %v101_v23  ;;  %v85_v27 = vld [vmem:[%s1180_s1 + $0x20] sm:$0xff]  ;;  %v86_v28 = vld [vmem:[%s1180_s1 + $0x28] sm:$0xff]  ;;  %v103_v35 = vld [vmem:[%s1180_s1 + $0xb0] sm:$0xff] }
   0x8   :  { %v46_v29 = vld [vmem:[%s1181_s0 + $0xa0] sm:$0xff]  ;;  %731 = vmatprep.subr.bf16.mxu1 %v730_v21  ;;  %v47_v30 = vld [vmem:[%s1181_s0 + $0xa8] sm:$0xff]  ;;  %v686_v33 = vpack.c.bf16 %v86_v28, %v85_v27  ;;  %v104_v36 = vld [vmem:[%s1180_s1 + $0xb8] sm:$0xff] }
   0x9   :  { %v30_v31 = vld [vmem:[%s1181_s0 + $0x20] sm:$0xff]  ;;  %v31_v32 = vld [vmem:[%s1181_s0 + $0x28] sm:$0xff]  ;;  %683 = vmatpush3.bf16.msra.mxu0 %v682_v17  ;;  %v734_v34 = vpack.c.bf16 %v47_v30, %v46_v29  ;;  %v87_v37 = vld [vmem:[%s1180_s1 + $0x30] sm:$0xff]  ;;  %v688_v39 = vpack.c.bf16 %v104_v36, %v103_v35 }
   0xa   :  { %685 = vmatprep.subr.bf16.mxu0 %v684_v26  ;;  %v736_v38 = vpack.c.bf16 %v31_v32, %v30_v31  ;;  %v88_v40 = vld [vmem:[%s1180_s1 + $0x38] sm:$0xff]  ;;  %v48_v41 = vld [vmem:[%s1181_s0 + $0xb0] sm:$0xff]  ;;  %v105_v46 = vld [vmem:[%s1180_s1 + $0xc0] sm:$0xff] }
   0xb   :  { %733 = vmatpush3.bf16.msra.mxu1 %v732_v25  ;;  %v49_v42 = vld [vmem:[%s1181_s0 + $0xb8] sm:$0xff]  ;;  %v32_v44 = vld [vmem:[%s1181_s0 + $0x30] sm:$0xff]  ;;  %v106_v47 = vld [vmem:[%s1180_s1 + $0xc8] sm:$0xff]  ;;  %v690_v48 = vpack.c.bf16 %v88_v40, %v87_v37  ;;  %v793_v40 = vmov 0.0|0.0  }
   0xc   :  { %735 = vmatprep.subr.bf16.mxu1 %v734_v34  ;;  %v738_v43 = vpack.c.bf16 %v49_v42, %v48_v41  ;;  %v33_v45 = vld [vmem:[%s1181_s0 + $0x38] sm:$0xff]  ;;  %v50_v49 = vld [vmem:[%s1181_s0 + $0xc0] sm:$0xff]  ;;  %v51_v50 = vld [vmem:[%s1181_s0 + $0xc8] sm:$0xff]  ;;  %v692_v52 = vpack.c.bf16 %v106_v47, %v105_v46 }
   0xd   :  { %687 = vmatpush3.bf16.msra.mxu0 %v686_v33  ;;  %v740_v51 = vpack.c.bf16 %v33_v45, %v32_v44  ;;  %v89_v53 = vld [vmem:[%s1180_s1 + $0x40] sm:$0xff]  ;;  %v90_v54 = vld [vmem:[%s1180_s1 + $0x48] sm:$0xff]  ;;  %v742_v56 = vpack.c.bf16 %v51_v50, %v50_v49  ;;  %v107_v58 = vld [vmem:[%s1180_s1 + $0xd0] sm:$0xff] }
   0xe   :  { %689 = vmatprep.subr.bf16.mxu0 %v688_v39  ;;  %v34_v55 = vld [vmem:[%s1181_s0 + $0x40] sm:$0xff]  ;;  %v35_v57 = vld [vmem:[%s1181_s0 + $0x48] sm:$0xff]  ;;  %v108_v59 = vld [vmem:[%s1180_s1 + $0xd8] sm:$0xff]  ;;  %v694_v62 = vpack.c.bf16 %v90_v54, %v89_v53 }
   0xf   :  { %737 = vmatpush3.bf16.msra.mxu1 %v736_v38  ;;  %v52_v60 = vld [vmem:[%s1181_s0 + $0xd0] sm:$0xff]  ;;  %v53_v61 = vld [vmem:[%s1181_s0 + $0xd8] sm:$0xff]  ;;  %v744_v63 = vpack.c.bf16 %v35_v57, %v34_v55  ;;  %v696_v0 = vpack.c.bf16 %v108_v59, %v107_v58  ;;  %v109_v6 = vld [vmem:[%s1180_s1 + $0xe0] sm:$0xff] }
  0x10   :  { %739 = vmatprep.subr.bf16.mxu1 %v738_v43  ;;  %v91_v1 = vld [vmem:[%s1180_s1 + $0x50] sm:$0xff]  ;;  %v92_v2 = vld [vmem:[%s1180_s1 + $0x58] sm:$0xff]  ;;  %v746_v4 = vpack.c.bf16 %v53_v61, %v52_v60  ;;  %v110_v7 = vld [vmem:[%s1180_s1 + $0xe8] sm:$0xff] }
  0x11   :  { %691 = vmatpush3.bf16.msra.mxu0 %v690_v48  ;;  %v36_v3 = vld [vmem:[%s1181_s0 + $0x50] sm:$0xff]  ;;  %v37_v5 = vld [vmem:[%s1181_s0 + $0x58] sm:$0xff]  ;;  %v54_v8 = vld [vmem:[%s1181_s0 + $0xe0] sm:$0xff]  ;;  %v698_v10 = vpack.c.bf16 %v92_v2, %v91_v1  ;;  %v700_v14 = vpack.c.bf16 %v110_v7, %v109_v6 }
  0x12   :  { %693 = vmatprep.subr.bf16.mxu0 %v692_v52  ;;  %v55_v9 = vld [vmem:[%s1181_s0 + $0xe8] sm:$0xff]  ;;  %v93_v11 = vld [vmem:[%s1180_s1 + $0x60] sm:$0xff]  ;;  %v748_v13 = vpack.c.bf16 %v37_v5, %v36_v3  ;;  %v111_v19 = vld [vmem:[%s1180_s1 + $0xf0] sm:$0xff] }
  0x13   :  { %741 = vmatpush3.bf16.msra.mxu1 %v740_v51  ;;  %v94_v12 = vld [vmem:[%s1180_s1 + $0x68] sm:$0xff]  ;;  %v38_v15 = vld [vmem:[%s1181_s0 + $0x60] sm:$0xff]  ;;  %v750_v18 = vpack.c.bf16 %v55_v9, %v54_v8  ;;  %v112_v20 = vld [vmem:[%s1180_s1 + $0xf8] sm:$0xff] }
  0x14   :  { %743 = vmatprep.subr.bf16.mxu1 %v742_v56  ;;  %v39_v16 = vld [vmem:[%s1181_s0 + $0x68] sm:$0xff]  ;;  %v56_v22 = vld [vmem:[%s1181_s0 + $0xf0] sm:$0xff]  ;;  %v57_v23 = vld [vmem:[%s1181_s0 + $0xf8] sm:$0xff]  ;;  %v702_v24 = vpack.c.bf16 %v94_v12, %v93_v11  ;;  %v704_v26 = vpack.c.bf16 %v112_v20, %v111_v19 }
  0x15   :  { %695 = vmatpush3.bf16.msra.mxu0 %v694_v62  ;;  %v73_v17 = vld [vmem:[%s1182_s3 + $0x8] sm:$0xff]  ;;  %v752_v25 = vpack.c.bf16 %v39_v16, %v38_v15  ;;  %v95_v27 = vld [vmem:[%s1180_s1 + $0x70] sm:$0xff]  ;;  %v96_v28 = vld [vmem:[%s1180_s1 + $0x78] sm:$0xff]  ;;  %v754_v29 = vpack.c.bf16 %v57_v23, %v56_v22 }
  0x16   :  { %697 = vmatprep.subr.bf16.mxu0 %v696_v0  ;;  %200 = vmatprep.mubr.f32.mxu0 %v73_v17  ;;  %v18_v21 = vld [vmem:[%s1183_s2 + $0x8] sm:$0xff]  ;;  %v40_v30 = vld [vmem:[%s1181_s0 + $0x70] sm:$0xff]  ;;  %v41_v31 = vld [vmem:[%s1181_s0 + $0x78] sm:$0xff]  ;;  %v706_v32 = vpack.c.bf16 %v96_v28, %v95_v27 }
  0x17   :  { %745 = vmatpush3.bf16.msra.mxu1 %v744_v63  ;;  %374 = vmatprep.mubr.f32.mxu1 %v18_v21  ;;  %v756_v33 = vpack.c.bf16 %v41_v31, %v40_v30  ;;  %v113_v34 = vld [vmem:[%s1180_s1 + $0x100] sm:$0xff]  ;;  %v114_v35 = vld [vmem:[%s1180_s1 + $0x108] sm:$0xff]  ;;  %v115_v43 = vld [vmem:[%s1180_s1 + $0x110] sm:$0xff] }
  0x18   :  { %747 = vmatprep.subr.bf16.mxu1 %v746_v4  ;;  %v58_v36 = vld [vmem:[%s1181_s0 + $0x100] sm:$0xff]  ;;  %v59_v37 = vld [vmem:[%s1181_s0 + $0x108] sm:$0xff]  ;;  %v709_v39 = vpack.c.bf16 %v114_v35, %v113_v34  ;;  %v116_v44 = vld [vmem:[%s1180_s1 + $0x118] sm:$0xff]  ;;  %v795_v4 = vmov 0.0  }
  0x19   :  { %699 = vmatpush3.bf16.msra.mxu0 %v698_v10  ;;  %v72_v38 = vld [vmem:[%s1182_s3] sm:$0xff]  ;;  %v759_v42 = vpack.c.bf16 %v59_v37, %v58_v36  ;;  %v60_v45 = vld [vmem:[%s1181_s0 + $0x110] sm:$0xff]  ;;  %v61_v46 = vld [vmem:[%s1181_s0 + $0x118] sm:$0xff]  ;;  %v712_v48 = vpack.c.bf16 %v116_v44, %v115_v43 }
  0x1a   :  { %701 = vmatprep.subr.bf16.mxu0 %v700_v14  ;;  %v17_v41 = vld [vmem:[%s1183_s2] sm:$0xff]  ;;  %v75_v49 = vld [vmem:[%s1182_s3 + $0x18] sm:$0xff]  ;;  %v762_v51 = vpack.c.bf16 %v61_v46, %v60_v45  ;;  %v118_v53 = vld [vmem:[%s1180_s1 + $0x128] sm:$0xff] }
  0x1b   :  { %749 = vmatpush3.bf16.msra.mxu1 %v748_v13  ;;  %v76_v47 = vld [vmem:[%s1182_s3 + $0x20] sm:$0xff]  ;;  %v79_v54 = vld [vmem:[%s1182_s3 + $0x38] sm:$0xf]  ;;  %v63_v56 = vld [vmem:[%s1181_s0 + $0x128] sm:$0xff] }
  0x1c   :  { %751 = vmatprep.subr.bf16.mxu1 %v750_v18  ;;  %v21_v50 = vld [vmem:[%s1183_s2 + $0x20] sm:$0xff]  ;;  %v20_v57 = vld [vmem:[%s1183_s2 + $0x18] sm:$0xff]  ;;  %v78_v59 = vld [vmem:[%s1182_s3 + $0x30] sm:$0xf] }
  0x1d   :  { %703 = vmatpush3.bf16.msra.mxu0 %v702_v24  ;;  %v117_v52 = vld [vmem:[%s1180_s1 + $0x120] sm:$0xff]  ;;  %v24_v60 = vld [vmem:[%s1183_s2 + $0x38] sm:$0xf]  ;;  %v119_v62 = vld [vmem:[%s1180_s1 + $0x130] sm:$0xff] }
  0x1e   :  { %705 = vmatprep.subr.bf16.mxu0 %v704_v26  ;;  %v62_v55 = vld [vmem:[%s1181_s0 + $0x120] sm:$0xff]  ;;  %v715_v58 = vpack.c.bf16 %v118_v53, %v117_v52  ;;  %v120_v63 = vld [vmem:[%s1180_s1 + $0x138] sm:$0xff]  ;;  %v64_v0 = vld [vmem:[%s1181_s0 + $0x130] sm:$0xff] }
  0x1f   :  { %753 = vmatpush3.bf16.msra.mxu1 %v752_v25  ;;  %v765_v61 = vpack.c.bf16 %v63_v56, %v62_v55  ;;  %v65_v1 = vld [vmem:[%s1181_s0 + $0x138] sm:$0xff]  ;;  %v23_v2 = vld [vmem:[%s1183_s2 + $0x30] sm:$0xf]  ;;  %v718_v3 = vpack.c.bf16 %v120_v63, %v119_v62  ;;  %v121_v6 = vld [vmem:[%s1180_s1 + $0x140] sm:$0xff] }
  0x20   :  { %755 = vmatprep.subr.bf16.mxu1 %v754_v29  ;;  %v768_v5 = vpack.c.bf16 %v65_v1, %v64_v0  ;;  %v122_v7 = vld [vmem:[%s1180_s1 + $0x148] sm:$0xff]  ;;  %v66_v8 = vld [vmem:[%s1181_s0 + $0x140] sm:$0xff]  ;;  %v123_v12 = vld [vmem:[%s1180_s1 + $0x150] sm:$0xff] }
  0x21   :  { %707 = vmatpush3.bf16.msra.mxu0 %v706_v32  ;;  %v67_v9 = vld [vmem:[%s1181_s0 + $0x148] sm:$0xff]  ;;  %v721_v10 = vpack.c.bf16 %v122_v7, %v121_v6  ;;  %v124_v13 = vld [vmem:[%s1180_s1 + $0x158] sm:$0xff]  ;;  %v68_v14 = vld [vmem:[%s1181_s0 + $0x150] sm:$0xff] }
  0x22   :  { %708 = vmatprep.subr.bf16.mxu0 %v793_v40  ;;  %v771_v11 = vpack.c.bf16 %v67_v9, %v66_v8  ;;  %v69_v15 = vld [vmem:[%s1181_s0 + $0x158] sm:$0xff]  ;;  %v724_v16 = vpack.c.bf16 %v124_v13, %v123_v12  ;;  %v70_v18 = vld [vmem:[%s1181_s0 + $0x160] sm:$0xff]  ;;  %v71_v19 = vld [vmem:[%s1181_s0 + $0x168] sm:$0x1] }
  0x23   :  { %757 = vmatpush3.bf16.msra.mxu1 %v756_v33  ;;  %v774_v17 = vpack.c.bf16 %v69_v15, %v68_v14  ;;  %v125_v20 = vld [vmem:[%s1180_s1 + $0x160] sm:$0xff]  ;;  %v777_v21 = vpack.c.bf16 %v71_v19, %v70_v18  ;;  %v74_v22 = vld [vmem:[%s1182_s3 + $0x10] sm:$0xff]  ;;  %vm778_vm4 = vmpackc.low %vm306_vm1, %vm796_vm3 }
  0x24   :  { %758 = vmatprep.subr.bf16.mxu1 %v793_v40  ;;  %201 = vmatmul.mubr.f32.vlgmr.msra.gmra.mrb[0].mxu0 %v72_v38  ;;  %v19_v23 = vld [vmem:[%s1183_s2 + $0x10] sm:$0xff]  ;;  %v77_v24 = vld [vmem:[%s1182_s3 + $0x28] sm:$0xff]  ;;  %v80_v26 = vld [vmem:[%s1182_s3 + $0x40] sm:$0xf] }
  0x25   :  { %710 = vmatpush3.bf16.msra.mxu0 %v709_v39  ;;  %205 = vmatprep.mubr.f32.mxu0 %v76_v47  ;;  %v22_v25 = vld [vmem:[%s1183_s2 + $0x28] sm:$0xff]  ;;  %v25_v27 = vld [vmem:[%s1183_s2 + $0x40] sm:$0xf] }
  0x26   :  { %375 = vmatmul.mubr.f32.vlgmr.msra.gmra.mrb[0].mxu1 %v17_v41  ;;  %711 = vmatprep.subr.bf16.mxu0 %v793_v40 }
  0x27   :  { %760 = vmatpush3.bf16.msra.mxu1 %v759_v42  ;;  %379 = vmatprep.mubr.f32.mxu1 %v21_v50 }
  0x28   :  { %761 = vmatprep.subr.bf16.mxu1 %v793_v40  ;;  %206 = vmatmul.mubr.f32.gmra.mrb[2].mxu0 %v75_v49 }
  0x29   :  { %713 = vmatpush3.bf16.msra.mxu0 %v712_v48  ;;  %210 = vmatprep.mubr.f32.mxu0 %v79_v54 }
  0x2a   :  { %714 = vmatprep.subr.bf16.mxu0 %v793_v40  ;;  %380 = vmatmul.mubr.f32.gmra.mrb[2].mxu1 %v20_v57 }
  0x2b   :  { %763 = vmatpush3.bf16.msra.mxu1 %v762_v51  ;;  %384 = vmatprep.mubr.f32.mxu1 %v24_v60 }
  0x2c   :  { %764 = vmatprep.subr.bf16.mxu1 %v793_v40  ;;  %211 = vmatmul.mubr.f32.gmra.mrb[4].mxu0 %v78_v59 }
  0x2d   :  { %716 = vmatpush3.bf16.msra.mxu0 %v715_v58  ;;  %630 = vmatprep.mubr.msk.f32.mxu0 %vm794_vm0, %v795_v4 }
  0x2e   :  { %717 = vmatprep.subr.bf16.mxu0 %v793_v40  ;;  %385 = vmatmul.mubr.f32.gmra.mrb[4].mxu1 %v23_v2 }
  0x2f   :  { %766 = vmatpush3.bf16.msra.mxu1 %v765_v61  ;;  %667 = vmatprep.mubr.msk.f32.mxu1 %vm794_vm0, %v795_v4 }
  0x30   :  { %767 = vmatprep.subr.bf16.mxu1 %v793_v40 }
  0x31   :  { %719 = vmatpush3.bf16.msra.mxu0 %v718_v3 }
  0x32   :  { %720 = vmatprep.subr.bf16.mxu0 %v793_v40 }
  0x33   :  { %769 = vmatpush3.bf16.msra.mxu1 %v768_v5 }
  0x34   :  { %770 = vmatprep.subr.bf16.mxu1 %v793_v40 }
  0x35   :  { %722 = vmatpush3.bf16.msra.mxu0 %v721_v10 }
  0x36   :  { %723 = vmatprep.subr.bf16.mxu0 %v793_v40 }
  0x37   :  { %772 = vmatpush3.bf16.msra.mxu1 %v771_v11 }
  0x38   :  { %773 = vmatprep.subr.bf16.mxu1 %v793_v40 }
  0x39   :  { %725 = vmatpush3.bf16.msra.mxu0 %v724_v16 }
  0x3a   :  { %628 = vmatprep.subr.mxu0 %v795_v4 }
  0x3b   :  { %775 = vmatpush3.bf16.msra.mxu1 %v774_v17 }
  0x3c   :  { %776 = vmatprep.subr.bf16.mxu1 %v793_v40 }
  0x3d   :  { %629 = vmatpush3.msra.mxu0 %v125_v20 }
  0x3e   :  { %631 = vmatmul.mubr.msk.f32.vlgmr.msra.gmra.mrb[6].mxu0 %vm126_vm2, %v74_v22 }
  0x3f   :  { %779 = vmatpush3.bf16.msk.msra.mxu1 %vm778_vm4, %v777_v21  ;;  %633 = vmatprep.mubr.msk.f32.mxu0 %vm794_vm0, %v795_v4 }
  0x42   :  { %668 = vmatmul.mubr.msk.f32.vlgmr.msra.gmra.mrb[6].mxu1 %vm296_vm5, %v19_v23  ;;  %634 = vmatmul.mubr.msk.f32.gmra.mrb[8].mxu0 %vm126_vm2, %v77_v24 }
  0x43   :  { %670 = vmatprep.mubr.msk.f32.mxu1 %vm794_vm0, %v795_v4  ;;  %636 = vmatprep.mubr.msk.f32.mxu0 %vm794_vm0, %v795_v4 }
  0x46   :  { %671 = vmatmul.mubr.msk.f32.gmra.mrb[8].mxu1 %vm296_vm5, %v22_v25  ;;  %637 = vmatmul.mubr.msk.f32.gmra.mrb[10].mxu0 %vm126_vm2, %v80_v26 }
  0x47   :  { %673 = vmatprep.mubr.msk.f32.mxu1 %vm794_vm0, %v795_v4 }
  0x4a   :  { %674 = vmatmul.mubr.msk.f32.gmra.mrb[10].mxu1 %vm296_vm5, %v25_v27 }
  0xf7   :  { %v521_v28 = vpop.f32.mrb[0].mxu0 }
  0xf8   :  { %v522_v29 = vpop.f32.mrb[1].mxu0 }
  0xf9   :  { %v578_v30 = vpop.f32.mrb[0].mxu1  ;;  %v523_v31 = vadd.f32 %v522_v29, %v521_v28 }
  0xfa   :  { %v579_v32 = vpop.f32.mrb[1].mxu1 }
  0xfb   :  { %v580_v33 = vadd.f32 %v579_v32, %v578_v30  ;;  %v524_v34 = vpop.f32.mrb[2].mxu0 }
  0xfc   :  { %v525_v35 = vpop.f32.mrb[3].mxu0 }
  0xfd   :  { %v526_v36 = vadd.f32 %v525_v35, %v524_v34  ;;  %v581_v37 = vpop.f32.mrb[2].mxu1 }
  0xfe   :  { %v582_v39 = vpop.f32.mrb[3].mxu1 }
  0xff   :  { %v527_v38 = vpop.f32.mrb[4].mxu0  ;;  %v583_v41 = vadd.f32 %v582_v39, %v581_v37 }
 0x100   :  { %v528_v40 = vpop.f32.mrb[5].mxu0 }
 0x101   :  { %v529_v42 = vadd.f32 %v528_v40, %v527_v38  ;;  %v584_v43 = vpop.f32.mrb[4].mxu1 }
 0x102   :  { %v585_v44 = vpop.f32.mrb[5].mxu1 }
 0x103   :  { %v586_v45 = vadd.f32 %v585_v44, %v584_v43 }
 0x111   :  { %v282_v46 = vpop.f32.mrb[6].mxu0 }
 0x112   :  { %v283_v47 = vadd.f32 %v523_v31, %v282_v46  ;;  %v632_v48 = vpop.f32.mrb[7].mxu0 }
 0x114   :  { %v377_v49 = vadd.f32 %v580_v33, %v283_v47 }
 0x115   :  { %v456_v50 = vpop.f32.mrb[6].mxu1  ;;  %v287_v51 = vpop.f32.mrb[8].mxu0 }
 0x116   :  { %v669_v52 = vpop.f32.mrb[7].mxu1  ;;  %v457_v53 = vadd.f32 %v456_v50, %v377_v49  ;;  %v288_v54 = vadd.f32 %v526_v36, %v287_v51  ;;  %v635_v55 = vpop.f32.mrb[9].mxu0 }
 0x118   :  { %v470_v56 = vmax.f32 %v457_v53, 0.0  ;;  %v382_v57 = vadd.f32 %v583_v41, %v288_v54 }
 0x119   :  { %v461_v58 = vpop.f32.mrb[8].mxu1  ;;  %v292_v59 = vpop.f32.mrb[10].mxu0 }
 0x11a   :  { %v672_v60 = vpop.f32.mrb[9].mxu1  ;;  %474 = vst.msk [vmem:[%s1184_s4] sm:$0xff] %vm473_vm6, %v470_v56  ;;  %v462_v61 = vadd.f32 %v461_v58, %v382_v57  ;;  %v293_v62 = vadd.f32 %v529_v42, %v292_v59  ;;  %v638_v63 = vpop.f32.mrb[11].mxu0 }
 0x11c   :  { %v471_v0 = vmax.f32 %v462_v61, 0.0  ;;  %v387_v1 = vadd.f32 %v586_v45, %v293_v62 }
 0x11d   :  { %v466_v2 = vpop.f32.mrb[10].mxu1 }
 0x11e   :  { %v675_v3 = vpop.f32.mrb[11].mxu1  ;;  %475 = vst.msk [vmem:[%s1184_s4 + $0x8] sm:$0xff] %vm473_vm6, %v471_v0  ;;  %v467_v4 = vadd.f32 %v466_v2, %v387_v1 }
 0x120   :  { %v472_v5 = vmax.f32 %v467_v4, 0.0 }
 0x122   :  { %477 = vst.msk [vmem:[%s1184_s4 + $0x10] sm:$0xf] %vm476_vm7, %v472_v5 }

// kernel: unet_forward.18
= control target key start
LH: loop header
LB: loop body
LE: loop exit
PB: predicated region body
PF: predicated region fallthrough
CT: control target
= control target key end

     0   :  { %v327_v0 = vmov 0.0|0.0   ;;  %vm71_vm0 = vcmask 424960   ;;  %vm157_vm1 = vcmask 433152   ;;  %vm78_vm2 = vcmask 1043456   ;;  %s548_s1 = inlined_call_operand.vmem [shape: f32[180,128], index: 1, kind: input, shape index: {}]   ;;  %s549_s0 = inlined_call_operand.vmem [shape: f32[181,128], index: 0, kind: input, shape index: {}]   ;;  %s550_s3 = inlined_call_operand.vmem [shape: f32[10,180], index: 3, kind: input, shape index: {}]   ;;  %s551_s2 = inlined_call_operand.vmem [shape: f32[10,181], index: 2, kind: input, shape index: {}]   ;;  %s552_s4 = inlined_call_operand.vmem [shape: f32[10,128], index: 4, kind: output, shape index: {}]  }
   0x1   :  { %257 = vmatprep.subr.bf16.mxu1 %v327_v0  ;;  %290 = vmatprep.subr.bf16.mxu0 %v327_v0  ;;  %v48_v1 = vld [vmem:[%s548_s1] sm:$0xff]  ;;  %v49_v2 = vld [vmem:[%s548_s1 + $0x8] sm:$0xff]  ;;  %v50_v6 = vld [vmem:[%s548_s1 + $0x10] sm:$0xff]  ;;  %vm164_vm3 = vcmask 1044480  }
   0x2   :  { %v21_v3 = vld [vmem:[%s549_s0] sm:$0xff]  ;;  %v258_v4 = vpack.c.bf16 %v49_v2, %v48_v1  ;;  %v22_v5 = vld [vmem:[%s549_s0 + $0x8] sm:$0xff]  ;;  %v51_v7 = vld [vmem:[%s548_s1 + $0x18] sm:$0xff] }
   0x3   :  { %v291_v8 = vpack.c.bf16 %v22_v5, %v21_v3  ;;  %v23_v9 = vld [vmem:[%s549_s0 + $0x10] sm:$0xff]  ;;  %v24_v10 = vld [vmem:[%s549_s0 + $0x18] sm:$0xff]  ;;  %v261_v11 = vpack.c.bf16 %v51_v7, %v50_v6  ;;  %v52_v13 = vld [vmem:[%s548_s1 + $0x20] sm:$0xff]  ;;  %v328_v6 = vmov 0.0  }
   0x4   :  { %259 = vmatpush1.bf16.msra.mxu1 %v258_v4  ;;  %v294_v12 = vpack.c.bf16 %v24_v10, %v23_v9  ;;  %v53_v14 = vld [vmem:[%s548_s1 + $0x28] sm:$0xff]  ;;  %v25_v15 = vld [vmem:[%s549_s0 + $0x20] sm:$0xff]  ;;  %v54_v19 = vld [vmem:[%s548_s1 + $0x30] sm:$0xff] }
   0x5   :  { %292 = vmatpush1.bf16.msra.mxu0 %v291_v8  ;;  %260 = vmatprep.subr.bf16.mxu1 %v327_v0  ;;  %v26_v16 = vld [vmem:[%s549_s0 + $0x28] sm:$0xff]  ;;  %v264_v17 = vpack.c.bf16 %v53_v14, %v52_v13  ;;  %v55_v20 = vld [vmem:[%s548_s1 + $0x38] sm:$0xff]  ;;  %v27_v21 = vld [vmem:[%s549_s0 + $0x30] sm:$0xff] }
   0x6   :  { %293 = vmatprep.subr.bf16.mxu0 %v327_v0  ;;  %v297_v18 = vpack.c.bf16 %v26_v16, %v25_v15  ;;  %v28_v22 = vld [vmem:[%s549_s0 + $0x38] sm:$0xff]  ;;  %v267_v23 = vpack.c.bf16 %v55_v20, %v54_v19  ;;  %v56_v25 = vld [vmem:[%s548_s1 + $0x40] sm:$0xff]  ;;  %v57_v26 = vld [vmem:[%s548_s1 + $0x48] sm:$0xff] }
   0x7   :  { %v300_v24 = vpack.c.bf16 %v28_v22, %v27_v21  ;;  %v29_v27 = vld [vmem:[%s549_s0 + $0x40] sm:$0xff]  ;;  %v30_v28 = vld [vmem:[%s549_s0 + $0x48] sm:$0xff]  ;;  %v270_v29 = vpack.c.bf16 %v57_v26, %v56_v25  ;;  %v58_v33 = vld [vmem:[%s548_s1 + $0x50] sm:$0xff] }
   0x8   :  { %262 = vmatpush1.bf16.msra.mxu1 %v261_v11  ;;  %v45_v30 = vld [vmem:[%s550_s3 + $0x8] sm:$0xff]  ;;  %v303_v32 = vpack.c.bf16 %v30_v28, %v29_v27  ;;  %v59_v34 = vld [vmem:[%s548_s1 + $0x58] sm:$0xff]  ;;  %v31_v35 = vld [vmem:[%s549_s0 + $0x50] sm:$0xff] }
   0x9   :  { %295 = vmatpush1.bf16.msra.mxu0 %v294_v12  ;;  %263 = vmatprep.subr.bf16.mxu1 %v327_v0  ;;  %v18_v31 = vld [vmem:[%s551_s2 + $0x8] sm:$0xff]  ;;  %v32_v36 = vld [vmem:[%s549_s0 + $0x58] sm:$0xff]  ;;  %v273_v37 = vpack.c.bf16 %v59_v34, %v58_v33  ;;  %v60_v39 = vld [vmem:[%s548_s1 + $0x60] sm:$0xff] }
   0xa   :  { %296 = vmatprep.subr.bf16.mxu0 %v327_v0  ;;  %252 = vmatprep.mubr.msk.f32.mxu1 %vm71_vm0, %v45_v30  ;;  %v306_v38 = vpack.c.bf16 %v32_v36, %v31_v35  ;;  %v61_v40 = vld [vmem:[%s548_s1 + $0x68] sm:$0xff]  ;;  %v33_v41 = vld [vmem:[%s549_s0 + $0x60] sm:$0xff]  ;;  %v62_v45 = vld [vmem:[%s548_s1 + $0x70] sm:$0xff] }
   0xb   :  { %255 = vmatprep.mubr.msk.f32.mxu0 %vm157_vm1, %v18_v31  ;;  %v34_v42 = vld [vmem:[%s549_s0 + $0x68] sm:$0xff]  ;;  %v276_v43 = vpack.c.bf16 %v61_v40, %v60_v39  ;;  %v63_v46 = vld [vmem:[%s548_s1 + $0x78] sm:$0xff]  ;;  %v35_v47 = vld [vmem:[%s549_s0 + $0x70] sm:$0xff] }
   0xc   :  { %265 = vmatpush1.bf16.msra.mxu1 %v264_v17  ;;  %v309_v44 = vpack.c.bf16 %v34_v42, %v33_v41  ;;  %v36_v48 = vld [vmem:[%s549_s0 + $0x78] sm:$0xff]  ;;  %v279_v49 = vpack.c.bf16 %v63_v46, %v62_v45  ;;  %v64_v51 = vld [vmem:[%s548_s1 + $0x80] sm:$0xff]  ;;  %v65_v52 = vld [vmem:[%s548_s1 + $0x88] sm:$0xff] }
   0xd   :  { %298 = vmatpush1.bf16.msra.mxu0 %v297_v18  ;;  %266 = vmatprep.subr.bf16.mxu1 %v327_v0  ;;  %v312_v50 = vpack.c.bf16 %v36_v48, %v35_v47  ;;  %v37_v53 = vld [vmem:[%s549_s0 + $0x80] sm:$0xff]  ;;  %v38_v54 = vld [vmem:[%s549_s0 + $0x88] sm:$0xff]  ;;  %v282_v55 = vpack.c.bf16 %v65_v52, %v64_v51  ;;  %v66_v57 = vld [vmem:[%s548_s1 + $0x90] sm:$0xff] }
   0xe   :  { %299 = vmatprep.subr.bf16.mxu0 %v327_v0  ;;  %v315_v56 = vpack.c.bf16 %v38_v54, %v37_v53  ;;  %v67_v58 = vld [vmem:[%s548_s1 + $0x98] sm:$0xff]  ;;  %v39_v59 = vld [vmem:[%s549_s0 + $0x90] sm:$0xff]  ;;  %v68_v63 = vld [vmem:[%s548_s1 + $0xa0] sm:$0xff] }
   0xf   :  { %v40_v60 = vld [vmem:[%s549_s0 + $0x98] sm:$0xff]  ;;  %v285_v61 = vpack.c.bf16 %v67_v58, %v66_v57  ;;  %v69_v1 = vld [vmem:[%s548_s1 + $0xa8] sm:$0xff]  ;;  %v41_v2 = vld [vmem:[%s549_s0 + $0xa0] sm:$0xff] }
  0x10   :  { %268 = vmatpush1.bf16.msra.mxu1 %v267_v23  ;;  %v318_v62 = vpack.c.bf16 %v40_v60, %v39_v59  ;;  %v42_v3 = vld [vmem:[%s549_s0 + $0xa8] sm:$0xff]  ;;  %v288_v4 = vpack.c.bf16 %v69_v1, %v68_v63  ;;  %v70_v7 = vld [vmem:[%s548_s1 + $0xb0] sm:$0xf]  ;;  %v44_v9 = vld [vmem:[%s550_s3] sm:$0xff] }
  0x11   :  { %301 = vmatpush1.bf16.msra.mxu0 %v300_v24  ;;  %269 = vmatprep.subr.bf16.mxu1 %v327_v0  ;;  %v321_v5 = vpack.c.bf16 %v42_v3, %v41_v2  ;;  %v43_v8 = vld [vmem:[%s549_s0 + $0xb0] sm:$0x1f]  ;;  %v47_v10 = vld [vmem:[%s550_s3 + $0x18] sm:$0x3] }
  0x12   :  { %302 = vmatprep.subr.bf16.mxu0 %v327_v0  ;;  %v20_v11 = vld [vmem:[%s551_s2 + $0x18] sm:$0x3]  ;;  %v46_v12 = vld [vmem:[%s550_s3 + $0x10] sm:$0x3] }
  0x13   :  { %v19_v13 = vld [vmem:[%s551_s2 + $0x10] sm:$0x3] }
  0x14   :  { %271 = vmatpush1.bf16.msra.mxu1 %v270_v29 }
  0x15   :  { %304 = vmatpush1.bf16.msra.mxu0 %v303_v32  ;;  %272 = vmatprep.subr.bf16.mxu1 %v327_v0 }
  0x16   :  { %305 = vmatprep.subr.bf16.mxu0 %v327_v0 }
  0x18   :  { %274 = vmatpush1.bf16.msra.mxu1 %v273_v37 }
  0x19   :  { %307 = vmatpush1.bf16.msra.mxu0 %v306_v38  ;;  %275 = vmatprep.subr.bf16.mxu1 %v327_v0 }
  0x1a   :  { %308 = vmatprep.subr.bf16.mxu0 %v327_v0 }
  0x1c   :  { %277 = vmatpush1.bf16.msra.mxu1 %v276_v43 }
  0x1d   :  { %310 = vmatpush1.bf16.msra.mxu0 %v309_v44  ;;  %278 = vmatprep.subr.bf16.mxu1 %v327_v0 }
  0x1e   :  { %311 = vmatprep.subr.bf16.mxu0 %v327_v0 }
  0x20   :  { %280 = vmatpush1.bf16.msra.mxu1 %v279_v49 }
  0x21   :  { %313 = vmatpush1.bf16.msra.mxu0 %v312_v50  ;;  %281 = vmatprep.subr.bf16.mxu1 %v327_v0 }
  0x22   :  { %314 = vmatprep.subr.bf16.mxu0 %v327_v0 }
  0x24   :  { %283 = vmatpush1.bf16.msra.mxu1 %v282_v55 }
  0x25   :  { %316 = vmatpush1.bf16.msra.mxu0 %v315_v56  ;;  %284 = vmatprep.subr.bf16.mxu1 %v327_v0 }
  0x26   :  { %317 = vmatprep.subr.bf16.mxu0 %v327_v0 }
  0x28   :  { %286 = vmatpush1.bf16.msra.mxu1 %v285_v61 }
  0x29   :  { %319 = vmatpush1.bf16.msra.mxu0 %v318_v62  ;;  %287 = vmatprep.subr.bf16.mxu1 %v327_v0 }
  0x2a   :  { %320 = vmatprep.subr.bf16.mxu0 %v327_v0  ;;  %v17_v0 = vld [vmem:[%s551_s2] sm:$0xff] }
  0x2c   :  { %289 = vmatpush1.bf16.msra.mxu1 %v288_v4 }
  0x2d   :  { %322 = vmatpush1.bf16.msra.mxu0 %v321_v5  ;;  %126 = vmatprep.subr.mxu1 %v328_v6 }
  0x2e   :  { %212 = vmatprep.subr.mxu0 %v328_v6 }
  0x30   :  { %251 = vmatpush1.msk.msra.mxu1 %vm78_vm2, %v70_v7 }
  0x31   :  { %254 = vmatpush1.msk.msra.mxu0 %vm164_vm3, %v43_v8  ;;  %147 = vmatmul.mubr.f32.vlgmr.msra.gmra.mrb[0].mxu1 %v44_v9 }
  0x32   :  { %233 = vmatmul.mubr.f32.vlgmr.msra.gmra.mrb[0].mxu0 %v17_v0  ;;  %253 = vmatprep.mubr.msk.f32.mxu1 %vm71_vm0, %v47_v10 }
  0x33   :  { %256 = vmatprep.mubr.msk.f32.mxu0 %vm157_vm1, %v20_v11 }
  0x35   :  { %152 = vmatmul.mubr.f32.gmra.mrb[2].mxu1 %v46_v12 }
  0x36   :  { %238 = vmatmul.mubr.f32.gmra.mrb[2].mxu0 %v19_v13 }
 0x104   :  { %v148_v14 = vpop.f32.mrb[0].mxu1 }
 0x105   :  { %v234_v15 = vpop.f32.mrb[0].mxu0  ;;  %v150_v16 = vpop.f32.mrb[1].mxu1 }
 0x106   :  { %v235_v17 = vadd.f32 %v234_v15, %v148_v14  ;;  %v236_v18 = vpop.f32.mrb[1].mxu0 }
 0x108   :  { %v243_v19 = vmax.f32 %v235_v17, 0.0  ;;  %v153_v20 = vpop.f32.mrb[2].mxu1 }
 0x109   :  { %v239_v21 = vpop.f32.mrb[2].mxu0  ;;  %v155_v22 = vpop.f32.mrb[3].mxu1 }
 0x10a   :  { %245 = vst [vmem:[%s552_s4] sm:$0xff] %v243_v19  ;;  %v240_v23 = vadd.f32 %v239_v21, %v153_v20  ;;  %v241_v24 = vpop.f32.mrb[3].mxu0 }
 0x10c   :  { %v244_v25 = vmax.f32 %v240_v23, 0.0 }
 0x10e   :  { %246 = vst [vmem:[%s552_s4 + $0x8] sm:$0x3] %v244_v25 }

// kernel: unet_forward.19
= control target key start
LH: loop header
LB: loop body
LE: loop exit
PB: predicated region body
PF: predicated region fallthrough
CT: control target
= control target key end

     0   :  { %v567_v3 = vmov 0.0   ;;  %vm119_vm0 = vcmask 1041408   ;;  %vm568_vm1 = vmmov 1   ;;  %vm115_vm3 = vcmask 736256   ;;  %s920_s1 = inlined_call_operand.vmem [shape: f32[90,512], index: 1, kind: input, shape index: {}]   ;;  %s921_s0 = inlined_call_operand.vmem [shape: f32[91,512], index: 0, kind: input, shape index: {}]   ;;  %s922_s3 = inlined_call_operand.vmem [shape: f32[5,90], index: 3, kind: input, shape index: {}]   ;;  %s923_s2 = inlined_call_operand.vmem [shape: f32[5,91], index: 2, kind: input, shape index: {}]   ;;  %s924_s4 = inlined_call_operand.vmem [shape: f32[5,512], index: 4, kind: output, shape index: {}]  }
   0x1   :  { %v68_v0 = vld [vmem:[%s920_s1 + $0x8] sm:$0xff]  ;;  %v70_v2 = vld [vmem:[%s920_s1 + $0x18] sm:$0xff]  ;;  %196 = vmatprep.mubr.f32.mxu0 %v567_v3  ;;  %267 = vmatprep.mubr.f32.mxu1 %v567_v3  ;;  %v67_v6 = vld [vmem:[%s920_s1] sm:$0xff]  ;;  %vm278_vm4 = vcmask 1042432   ;;  %vm274_vm6 = vcmask 744448  }
   0x2   :  { %v72_v1 = vld [vmem:[%s920_s1 + $0x28] sm:$0xff]  ;;  %v74_v5 = vld [vmem:[%s920_s1 + $0x38] sm:$0xff]  ;;  %v71_v7 = vld [vmem:[%s920_s1 + $0x20] sm:$0xff] }
   0x3   :  { %v457_v4 = vpack.c.bf16 %v72_v1, %v68_v0  ;;  %v483_v8 = vpack.c.bf16 %v74_v5, %v70_v2  ;;  %v459_v9 = vpack.c.bf16 %v71_v7, %v67_v6  ;;  %v69_v10 = vld [vmem:[%s920_s1 + $0x10] sm:$0xff]  ;;  %v76_v12 = vld [vmem:[%s920_s1 + $0x48] sm:$0xff]  ;;  %v78_v15 = vld [vmem:[%s920_s1 + $0x58] sm:$0xff] }
   0x4   :  { %v73_v11 = vld [vmem:[%s920_s1 + $0x30] sm:$0xff]  ;;  %v80_v14 = vld [vmem:[%s920_s1 + $0x68] sm:$0xff]  ;;  %v82_v16 = vld [vmem:[%s920_s1 + $0x78] sm:$0xff] }
   0x5   :  { %458 = vmatprep.subr.bf16.mxu0 %v457_v4  ;;  %v485_v13 = vpack.c.bf16 %v73_v11, %v69_v10  ;;  %484 = vmatprep.subr.bf16.mxu1 %v483_v8  ;;  %v461_v17 = vpack.c.bf16 %v80_v14, %v76_v12  ;;  %v487_v18 = vpack.c.bf16 %v82_v16, %v78_v15  ;;  %v75_v19 = vld [vmem:[%s920_s1 + $0x40] sm:$0xff]  ;;  %v77_v21 = vld [vmem:[%s920_s1 + $0x50] sm:$0xff]  ;;  %v84_v24 = vld [vmem:[%s920_s1 + $0x88] sm:$0xff] }
   0x6   :  { %460 = vmatpush1.bf16.msra.mxu0 %v459_v9  ;;  %v79_v20 = vld [vmem:[%s920_s1 + $0x60] sm:$0xff]  ;;  %v81_v23 = vld [vmem:[%s920_s1 + $0x70] sm:$0xff]  ;;  %v88_v25 = vld [vmem:[%s920_s1 + $0xa8] sm:$0xff] }
   0x7   :  { %486 = vmatpush1.bf16.msra.mxu1 %v485_v13  ;;  %v463_v22 = vpack.c.bf16 %v79_v20, %v75_v19  ;;  %462 = vmatprep.subr.bf16.mxu0 %v461_v17  ;;  %v489_v26 = vpack.c.bf16 %v81_v23, %v77_v21  ;;  %v465_v27 = vpack.c.bf16 %v88_v25, %v84_v24  ;;  %v86_v28 = vld [vmem:[%s920_s1 + $0x98] sm:$0xff]  ;;  %v83_v30 = vld [vmem:[%s920_s1 + $0x80] sm:$0xff]  ;;  %v85_v33 = vld [vmem:[%s920_s1 + $0x90] sm:$0xff] }
   0x8   :  { %488 = vmatprep.subr.bf16.mxu1 %v487_v18  ;;  %v90_v29 = vld [vmem:[%s920_s1 + $0xb8] sm:$0xff]  ;;  %v87_v32 = vld [vmem:[%s920_s1 + $0xa0] sm:$0xff]  ;;  %v89_v34 = vld [vmem:[%s920_s1 + $0xb0] sm:$0xff] }
   0x9   :  { %v491_v31 = vpack.c.bf16 %v90_v29, %v86_v28  ;;  %v467_v35 = vpack.c.bf16 %v87_v32, %v83_v30  ;;  %v92_v36 = vld [vmem:[%s920_s1 + $0xc8] sm:$0xff]  ;;  %v94_v38 = vld [vmem:[%s920_s1 + $0xd8] sm:$0xff]  ;;  %v493_v39 = vpack.c.bf16 %v89_v34, %v85_v33  ;;  %v91_v42 = vld [vmem:[%s920_s1 + $0xc0] sm:$0xff] }
   0xa   :  { %464 = vmatpush1.bf16.msra.mxu0 %v463_v22  ;;  %v96_v37 = vld [vmem:[%s920_s1 + $0xe8] sm:$0xff]  ;;  %v98_v41 = vld [vmem:[%s920_s1 + $0xf8] sm:$0xff]  ;;  %v95_v43 = vld [vmem:[%s920_s1 + $0xe0] sm:$0xff] }
   0xb   :  { %490 = vmatpush1.bf16.msra.mxu1 %v489_v26  ;;  %466 = vmatprep.subr.bf16.mxu0 %v465_v27  ;;  %v469_v40 = vpack.c.bf16 %v96_v37, %v92_v36  ;;  %v495_v44 = vpack.c.bf16 %v98_v41, %v94_v38  ;;  %v93_v45 = vld [vmem:[%s920_s1 + $0xd0] sm:$0xff]  ;;  %v100_v47 = vld [vmem:[%s920_s1 + $0x108] sm:$0xff]  ;;  %v102_v49 = vld [vmem:[%s920_s1 + $0x118] sm:$0xff]  ;;  %v471_v51 = vpack.c.bf16 %v95_v43, %v91_v42 }
   0xc   :  { %492 = vmatprep.subr.bf16.mxu1 %v491_v31  ;;  %v97_v46 = vld [vmem:[%s920_s1 + $0xf0] sm:$0xff]  ;;  %v104_v48 = vld [vmem:[%s920_s1 + $0x128] sm:$0xff]  ;;  %v106_v50 = vld [vmem:[%s920_s1 + $0x138] sm:$0xff] }
   0xd   :  { %v497_v52 = vpack.c.bf16 %v97_v46, %v93_v45  ;;  %v473_v53 = vpack.c.bf16 %v104_v48, %v100_v47  ;;  %v99_v54 = vld [vmem:[%s920_s1 + $0x100] sm:$0xff]  ;;  %v101_v56 = vld [vmem:[%s920_s1 + $0x110] sm:$0xff]  ;;  %v499_v57 = vpack.c.bf16 %v106_v50, %v102_v49  ;;  %v108_v59 = vld [vmem:[%s920_s1 + $0x148] sm:$0xff] }
   0xe   :  { %468 = vmatpush1.bf16.msra.mxu0 %v467_v35  ;;  %v103_v55 = vld [vmem:[%s920_s1 + $0x120] sm:$0xff]  ;;  %v105_v58 = vld [vmem:[%s920_s1 + $0x130] sm:$0xff]  ;;  %v112_v60 = vld [vmem:[%s920_s1 + $0x168] sm:$0x3] }
   0xf   :  { %494 = vmatpush1.bf16.msra.mxu1 %v493_v39  ;;  %470 = vmatprep.subr.bf16.mxu0 %v469_v40  ;;  %v110_v61 = vld [vmem:[%s920_s1 + $0x158] sm:$0xff]  ;;  %v475_v63 = vpack.c.bf16 %v103_v55, %v99_v54  ;;  %vm729_vm2 = vmpackc.low %vm119_vm0, %vm568_vm1  ;;  %v501_v1 = vpack.c.bf16 %v105_v58, %v101_v56  ;;  %v477_v2 = vpack.c.bf16 %v112_v60, %v108_v59  ;;  %v107_v4 = vld [vmem:[%s920_s1 + $0x140] sm:$0xff] }
  0x10   :  { %496 = vmatprep.subr.bf16.mxu1 %v495_v44  ;;  %v114_v62 = vld [vmem:[%s920_s1 + $0x178] sm:$0x3]  ;;  %v111_v5 = vld [vmem:[%s920_s1 + $0x160] sm:$0x3]  ;;  %v109_v6 = vld [vmem:[%s920_s1 + $0x150] sm:$0xff] }
  0x11   :  { %v503_v7 = vpack.c.bf16 %v114_v62, %v110_v61  ;;  %v113_v8 = vld [vmem:[%s920_s1 + $0x170] sm:$0x3]  ;;  %v19_v9 = vld [vmem:[%s921_s0 + $0x8] sm:$0xff]  ;;  %v21_v11 = vld [vmem:[%s921_s0 + $0x18] sm:$0xff]  ;;  %v480_v13 = vpack.c.bf16 %v111_v5, %v107_v4 }
  0x12   :  { %472 = vmatpush1.bf16.msra.mxu0 %v471_v51  ;;  %v23_v10 = vld [vmem:[%s921_s0 + $0x28] sm:$0xff]  ;;  %v25_v12 = vld [vmem:[%s921_s0 + $0x38] sm:$0xff]  ;;  %v506_v14 = vpack.c.bf16 %v113_v8, %v109_v6  ;;  %v18_v16 = vld [vmem:[%s921_s0] sm:$0xff] }
  0x13   :  { %498 = vmatpush1.bf16.msra.mxu1 %v497_v52  ;;  %474 = vmatprep.subr.bf16.mxu0 %v473_v53  ;;  %v509_v15 = vpack.c.bf16 %v23_v10, %v19_v9  ;;  %v22_v17 = vld [vmem:[%s921_s0 + $0x20] sm:$0xff]  ;;  %v20_v18 = vld [vmem:[%s921_s0 + $0x10] sm:$0xff]  ;;  %v535_v19 = vpack.c.bf16 %v25_v12, %v21_v11  ;;  %v27_v21 = vld [vmem:[%s921_s0 + $0x48] sm:$0xff] }
  0x14   :  { %500 = vmatprep.subr.bf16.mxu1 %v499_v57  ;;  %v24_v20 = vld [vmem:[%s921_s0 + $0x30] sm:$0xff]  ;;  %v31_v22 = vld [vmem:[%s921_s0 + $0x68] sm:$0xff]  ;;  %v29_v23 = vld [vmem:[%s921_s0 + $0x58] sm:$0xff]  ;;  %v511_v26 = vpack.c.bf16 %v22_v17, %v18_v16 }
  0x15   :  { %v33_v24 = vld [vmem:[%s921_s0 + $0x78] sm:$0xff]  ;;  %v66_v25 = vld [vmem:[%s922_s3] sm:$0x1f]  ;;  %v537_v27 = vpack.c.bf16 %v24_v20, %v20_v18  ;;  %v513_v28 = vpack.c.bf16 %v31_v22, %v27_v21  ;;  %v28_v31 = vld [vmem:[%s921_s0 + $0x50] sm:$0xff] }
  0x16   :  { %476 = vmatpush1.bf16.msra.mxu0 %v475_v63  ;;  %v26_v29 = vld [vmem:[%s921_s0 + $0x40] sm:$0xff]  ;;  %v539_v32 = vpack.c.bf16 %v33_v24, %v29_v23  ;;  %v32_v33 = vld [vmem:[%s921_s0 + $0x70] sm:$0xff]  ;;  %v35_v34 = vld [vmem:[%s921_s0 + $0x88] sm:$0xff] }
  0x17   :  { %502 = vmatpush1.bf16.msra.mxu1 %v501_v1  ;;  %479 = vmatprep.subr.msk.bf16.mxu0 %vm729_vm2, %v477_v2  ;;  %v30_v30 = vld [vmem:[%s921_s0 + $0x60] sm:$0xff]  ;;  %v39_v35 = vld [vmem:[%s921_s0 + $0xa8] sm:$0xff]  ;;  %v37_v36 = vld [vmem:[%s921_s0 + $0x98] sm:$0xff]  ;;  %v541_v39 = vpack.c.bf16 %v32_v33, %v28_v31 }
  0x18   :  { %505 = vmatprep.subr.msk.bf16.mxu1 %vm729_vm2, %v503_v7  ;;  %v41_v37 = vld [vmem:[%s921_s0 + $0xb8] sm:$0xff]  ;;  %v515_v38 = vpack.c.bf16 %v30_v30, %v26_v29  ;;  %v517_v40 = vpack.c.bf16 %v39_v35, %v35_v34  ;;  %v34_v41 = vld [vmem:[%s921_s0 + $0x80] sm:$0xff]  ;;  %v36_v43 = vld [vmem:[%s921_s0 + $0x90] sm:$0xff] }
  0x19   :  { %v38_v42 = vld [vmem:[%s921_s0 + $0xa0] sm:$0xff]  ;;  %v543_v44 = vpack.c.bf16 %v41_v37, %v37_v36  ;;  %v40_v45 = vld [vmem:[%s921_s0 + $0xb0] sm:$0xff]  ;;  %v43_v46 = vld [vmem:[%s921_s0 + $0xc8] sm:$0xff] }
  0x1a   :  { %482 = vmatpush1.bf16.msk.msra.mxu0 %vm729_vm2, %v480_v13  ;;  %v47_v47 = vld [vmem:[%s921_s0 + $0xe8] sm:$0xff]  ;;  %v45_v48 = vld [vmem:[%s921_s0 + $0xd8] sm:$0xff]  ;;  %v519_v50 = vpack.c.bf16 %v38_v42, %v34_v41  ;;  %v545_v51 = vpack.c.bf16 %v40_v45, %v36_v43  ;;  %v42_v53 = vld [vmem:[%s921_s0 + $0xc0] sm:$0xff] }
  0x1b   :  { %508 = vmatpush1.bf16.msk.msra.mxu1 %vm729_vm2, %v506_v14  ;;  %510 = vmatprep.subr.bf16.mxu0 %v509_v15  ;;  %v49_v49 = vld [vmem:[%s921_s0 + $0xf8] sm:$0xff]  ;;  %v521_v52 = vpack.c.bf16 %v47_v47, %v43_v46  ;;  %v46_v54 = vld [vmem:[%s921_s0 + $0xe0] sm:$0xff]  ;;  %v44_v55 = vld [vmem:[%s921_s0 + $0xd0] sm:$0xff] }
  0x1c   :  { %536 = vmatprep.subr.bf16.mxu1 %v535_v19  ;;  %v48_v56 = vld [vmem:[%s921_s0 + $0xf0] sm:$0xff]  ;;  %v51_v57 = vld [vmem:[%s921_s0 + $0x108] sm:$0xff]  ;;  %v53_v59 = vld [vmem:[%s921_s0 + $0x118] sm:$0xff]  ;;  %v523_v61 = vpack.c.bf16 %v46_v54, %v42_v53 }
  0x1d   :  { %447 = vmatmul.mubr.msk.f32.vlgmr.msra.gmra.mrb[0].mxu0 %vm115_vm3, %v66_v25  ;;  %v55_v58 = vld [vmem:[%s921_s0 + $0x128] sm:$0xff]  ;;  %v57_v60 = vld [vmem:[%s921_s0 + $0x138] sm:$0xff]  ;;  %v549_v62 = vpack.c.bf16 %v48_v56, %v44_v55  ;;  %v50_v0 = vld [vmem:[%s921_s0 + $0x100] sm:$0xff] }
  0x1e   :  { %450 = vmatmul.mubr.msk.f32.vlgmr.msra.gmra.mrb[0].mxu1 %vm115_vm3, %v66_v25  ;;  %512 = vmatpush1.bf16.msra.mxu0 %v511_v26  ;;  %v525_v63 = vpack.c.bf16 %v55_v58, %v51_v57  ;;  %v54_v1 = vld [vmem:[%s921_s0 + $0x120] sm:$0xff]  ;;  %v52_v2 = vld [vmem:[%s921_s0 + $0x110] sm:$0xff]  ;;  %v551_v4 = vpack.c.bf16 %v57_v60, %v53_v59  ;;  %v59_v6 = vld [vmem:[%s921_s0 + $0x148] sm:$0xff] }
  0x1f   :  { %538 = vmatpush1.bf16.msra.mxu1 %v537_v27  ;;  %514 = vmatprep.subr.bf16.mxu0 %v513_v28  ;;  %v56_v5 = vld [vmem:[%s921_s0 + $0x130] sm:$0xff]  ;;  %v63_v7 = vld [vmem:[%s921_s0 + $0x168] sm:$0x7]  ;;  %v61_v8 = vld [vmem:[%s921_s0 + $0x158] sm:$0xff]  ;;  %v527_v10 = vpack.c.bf16 %v54_v1, %v50_v0 }
  0x20   :  { %540 = vmatprep.subr.bf16.mxu1 %v539_v32  ;;  %355 = vmatprep.mubr.f32.mxu0 %v567_v3  ;;  %v65_v9 = vld [vmem:[%s921_s0 + $0x178] sm:$0x7]  ;;  %v553_v11 = vpack.c.bf16 %v56_v5, %v52_v2  ;;  %v529_v12 = vpack.c.bf16 %v63_v7, %v59_v6  ;;  %v58_v13 = vld [vmem:[%s921_s0 + $0x140] sm:$0xff]  ;;  %vm530_vm5 = vmpackc.low %vm278_vm4, %vm568_vm1 }
  0x21   :  { %426 = vmatprep.mubr.f32.mxu1 %v567_v3  ;;  %v547_v3 = vpack.c.bf16 %v49_v49, %v45_v48  ;;  %v62_v14 = vld [vmem:[%s921_s0 + $0x160] sm:$0x7]  ;;  %v555_v15 = vpack.c.bf16 %v65_v9, %v61_v8  ;;  %v60_v16 = vld [vmem:[%s921_s0 + $0x150] sm:$0xff] }
  0x22   :  { %516 = vmatpush1.bf16.msra.mxu0 %v515_v38  ;;  %v64_v17 = vld [vmem:[%s921_s0 + $0x170] sm:$0x7]  ;;  %v532_v18 = vpack.c.bf16 %v62_v14, %v58_v13  ;;  %v17_v20 = vld [vmem:[%s923_s2] sm:$0x1f] }
  0x23   :  { %542 = vmatpush1.bf16.msra.mxu1 %v541_v39  ;;  %518 = vmatprep.subr.bf16.mxu0 %v517_v40  ;;  %v558_v19 = vpack.c.bf16 %v64_v17, %v60_v16 }
  0x24   :  { %544 = vmatprep.subr.bf16.mxu1 %v543_v44 }
  0x26   :  { %520 = vmatpush1.bf16.msra.mxu0 %v519_v50 }
  0x27   :  { %546 = vmatpush1.bf16.msra.mxu1 %v545_v51  ;;  %522 = vmatprep.subr.bf16.mxu0 %v521_v52 }
  0x28   :  { %548 = vmatprep.subr.bf16.mxu1 %v547_v3 }
  0x2a   :  { %524 = vmatpush1.bf16.msra.mxu0 %v523_v61 }
  0x2b   :  { %550 = vmatpush1.bf16.msra.mxu1 %v549_v62  ;;  %526 = vmatprep.subr.bf16.mxu0 %v525_v63 }
  0x2c   :  { %552 = vmatprep.subr.bf16.mxu1 %v551_v4 }
  0x2e   :  { %528 = vmatpush1.bf16.msra.mxu0 %v527_v10 }
  0x2f   :  { %554 = vmatpush1.bf16.msra.mxu1 %v553_v11  ;;  %531 = vmatprep.subr.msk.bf16.mxu0 %vm530_vm5, %v529_v12 }
  0x30   :  { %557 = vmatprep.subr.msk.bf16.mxu1 %vm530_vm5, %v555_v15 }
  0x32   :  { %534 = vmatpush1.bf16.msk.msra.mxu0 %vm530_vm5, %v532_v18 }
  0x33   :  { %560 = vmatpush1.bf16.msk.msra.mxu1 %vm530_vm5, %v558_v19 }
  0x35   :  { %453 = vmatmul.mubr.msk.f32.vlgmr.msra.gmra.mrb[0].mxu0 %vm274_vm6, %v17_v20 }
  0x36   :  { %456 = vmatmul.mubr.msk.f32.vlgmr.msra.gmra.mrb[0].mxu1 %vm274_vm6, %v17_v20 }
 0x108   :  { %v357_v21 = vpop.f32.mrb[0].mxu0 }
 0x109   :  { %v433_v22 = vmax.f32 %v357_v21, 0.0  ;;  %v428_v23 = vpop.f32.mrb[0].mxu1  ;;  %v359_v24 = vpop.f32.mrb[1].mxu0 }
 0x10a   :  { %v435_v25 = vmax.f32 %v428_v23, 0.0  ;;  %v434_v26 = vmax.f32 %v359_v24, 0.0  ;;  %v430_v27 = vpop.f32.mrb[1].mxu1 }
 0x10b   :  { %437 = vst [vmem:[%s924_s4] sm:$0x1f] %v433_v22  ;;  %v436_v28 = vmax.f32 %v430_v27, 0.0 }
 0x10c   :  { %439 = vst [vmem:[%s924_s4 + $0x10] sm:$0x1f] %v435_v25  ;;  %438 = vst [vmem:[%s924_s4 + $0x8] sm:$0x1f] %v434_v26 }
 0x10d   :  { %440 = vst [vmem:[%s924_s4 + $0x18] sm:$0x1f] %v436_v28 }

// kernel: unet_forward.21
= control target key start
LH: loop header
LB: loop body
LE: loop exit
PB: predicated region body
PF: predicated region fallthrough
CT: control target
= control target key end

     0   :  { %vm48_vm0 = vcmask 1041408   ;;  %vm862_vm1 = vmmov 1   ;;  %v863_v3 = vmov 0.0   ;;  %vm44_vm3 = vcmask 80896   ;;  %s1047_s0 = inlined_call_operand.vmem [shape: f32[10,2048], index: 0, kind: input, shape index: {}]   ;;  %s1048_s1 = inlined_call_operand.vmem [shape: f32[1,10], index: 1, kind: input, shape index: {}]   ;;  %s1049_s2 = inlined_call_operand.vmem [shape: f32[1,2048], index: 2, kind: output, shape index: {}]  }
   0x1   :  { %v13_v0 = vld [vmem:[%s1047_s0 + $0x8] sm:$0xff]  ;;  %vm886_vm2 = vmpackc.low %vm48_vm0, %vm862_vm1  ;;  %161 = vmatprep.mubr.f32.mxu0 %v863_v3  ;;  %232 = vmatprep.mubr.f32.mxu1 %v863_v3  ;;  %v15_v5 = vld [vmem:[%s1047_s0 + $0x18] sm:$0xff]  ;;  %v864_v51 = vmov 1966171168   ;;  %v688_v53 = vlaneseq }
   0x2   :  { %v29_v1 = vld [vmem:[%s1047_s0 + $0x88] sm:$0x3]  ;;  %v31_v6 = vld [vmem:[%s1047_s0 + $0x98] sm:$0x3]  ;;  %v12_v7 = vld [vmem:[%s1047_s0] sm:$0xff]  ;;  %v686_v52 = vunpack.c.l.s4 %v864_v51 }
   0x3   :  { %v811_v4 = vpack.c.bf16 %v29_v1, %v13_v0  ;;  %v817_v8 = vpack.c.bf16 %v31_v6, %v15_v5  ;;  %v28_v9 = vld [vmem:[%s1047_s0 + $0x80] sm:$0x3]  ;;  %v14_v10 = vld [vmem:[%s1047_s0 + $0x10] sm:$0xff]  ;;  %v17_v15 = vld [vmem:[%s1047_s0 + $0x28] sm:$0xff]  ;;  %v689_v55 = vshrl.u32 %v688_v53, 7 }
   0x4   :  { %v30_v11 = vld [vmem:[%s1047_s0 + $0x90] sm:$0x3]  ;;  %v814_v12 = vpack.c.bf16 %v28_v9, %v12_v7  ;;  %v915_v14 = vld [vmem:[%s1048_s1] sm:$0x1]  ;;  %v33_v16 = vld [vmem:[%s1047_s0 + $0xa8] sm:$0x3]  ;;  %v687_v54 = vunpack.c.0.s8 %v686_v52 }
   0x5   :  { %813 = vmatprep.subr.msk.bf16.mxu0 %vm886_vm2, %v811_v4  ;;  %v820_v13 = vpack.c.bf16 %v30_v11, %v14_v10  ;;  %819 = vmatprep.subr.msk.bf16.mxu1 %vm886_vm2, %v817_v8  ;;  %v823_v17 = vpack.c.bf16 %v33_v16, %v17_v15  ;;  %v19_v18 = vld [vmem:[%s1047_s0 + $0x38] sm:$0xff]  ;;  %v16_v20 = vld [vmem:[%s1047_s0 + $0x20] sm:$0xff]  ;;  %v18_v23 = vld [vmem:[%s1047_s0 + $0x30] sm:$0xff] }
   0x6   :  { %v35_v19 = vld [vmem:[%s1047_s0 + $0xb8] sm:$0x3]  ;;  %816 = vmatpush1.bf16.msk.msra.mxu0 %vm886_vm2, %v814_v12  ;;  %v32_v22 = vld [vmem:[%s1047_s0 + $0xa0] sm:$0x3]  ;;  %v34_v24 = vld [vmem:[%s1047_s0 + $0xb0] sm:$0x3]  ;;  %v690_v58 = vsub.s32 %v687_v54, %v689_v55 }
   0x7   :  { %822 = vmatpush1.bf16.msk.msra.mxu1 %vm886_vm2, %v820_v13  ;;  %v829_v21 = vpack.c.bf16 %v35_v19, %v19_v18  ;;  %825 = vmatprep.subr.msk.bf16.mxu0 %vm886_vm2, %v823_v17  ;;  %v826_v25 = vpack.c.bf16 %v32_v22, %v16_v20  ;;  %v832_v26 = vpack.c.bf16 %v34_v24, %v18_v23  ;;  %v21_v27 = vld [vmem:[%s1047_s0 + $0x48] sm:$0xff]  ;;  %v23_v29 = vld [vmem:[%s1047_s0 + $0x58] sm:$0xff]  ;;  %v20_v32 = vld [vmem:[%s1047_s0 + $0x40] sm:$0xff] }
   0x8   :  { %v37_v28 = vld [vmem:[%s1047_s0 + $0xc8] sm:$0x3]  ;;  %v39_v31 = vld [vmem:[%s1047_s0 + $0xd8] sm:$0x3]  ;;  %v36_v33 = vld [vmem:[%s1047_s0 + $0xc0] sm:$0x3] }
   0x9   :  { %831 = vmatprep.subr.msk.bf16.mxu1 %vm886_vm2, %v829_v21  ;;  %v835_v30 = vpack.c.bf16 %v37_v28, %v21_v27  ;;  %789 = vmatmul.mubr.msk.f32.vlgmr.msra.gmra.mrb[0].mxu0 %vm44_vm3, %v915_v14  ;;  %v841_v34 = vpack.c.bf16 %v39_v31, %v23_v29  ;;  %v22_v35 = vld [vmem:[%s1047_s0 + $0x50] sm:$0xff]  ;;  %v25_v37 = vld [vmem:[%s1047_s0 + $0x68] sm:$0xff]  ;;  %v838_v38 = vpack.c.bf16 %v36_v33, %v20_v32  ;;  %v27_v41 = vld [vmem:[%s1047_s0 + $0x78] sm:$0xff] }
   0xa   :  { %792 = vmatmul.mubr.msk.f32.vlgmr.msra.gmra.mrb[0].mxu1 %vm44_vm3, %v915_v14  ;;  %v38_v36 = vld [vmem:[%s1047_s0 + $0xd0] sm:$0x3]  ;;  %828 = vmatpush1.bf16.msk.msra.mxu0 %vm886_vm2, %v826_v25  ;;  %v41_v40 = vld [vmem:[%s1047_s0 + $0xe8] sm:$0x3]  ;;  %v43_v42 = vld [vmem:[%s1047_s0 + $0xf8] sm:$0x3] }
   0xb   :  { %834 = vmatpush1.bf16.msk.msra.mxu1 %vm886_vm2, %v832_v26  ;;  %v844_v39 = vpack.c.bf16 %v38_v36, %v22_v35  ;;  %303 = vmatprep.mubr.f32.mxu0 %v863_v3  ;;  %v24_v43 = vld [vmem:[%s1047_s0 + $0x60] sm:$0xff]  ;;  %v26_v45 = vld [vmem:[%s1047_s0 + $0x70] sm:$0xff]  ;;  %v847_v46 = vpack.c.bf16 %v41_v40, %v25_v37  ;;  %v853_v47 = vpack.c.bf16 %v43_v42, %v27_v41 }
   0xc   :  { %374 = vmatprep.mubr.f32.mxu1 %v863_v3  ;;  %v40_v44 = vld [vmem:[%s1047_s0 + $0xe0] sm:$0x3]  ;;  %837 = vmatprep.subr.msk.bf16.mxu0 %vm886_vm2, %v835_v30  ;;  %v42_v48 = vld [vmem:[%s1047_s0 + $0xf0] sm:$0x3] }
   0xd   :  { %843 = vmatprep.subr.msk.bf16.mxu1 %vm886_vm2, %v841_v34  ;;  %795 = vmatmul.mubr.msk.f32.vlgmr.msra.gmra.mrb[2].mxu0 %vm44_vm3, %v915_v14  ;;  %v850_v49 = vpack.c.bf16 %v40_v44, %v24_v43  ;;  %v856_v50 = vpack.c.bf16 %v42_v48, %v26_v45 }
   0xe   :  { %798 = vmatmul.mubr.msk.f32.vlgmr.msra.gmra.mrb[2].mxu1 %vm44_vm3, %v915_v14  ;;  %840 = vmatpush1.bf16.msk.msra.mxu0 %vm886_vm2, %v838_v38 }
   0xf   :  { %846 = vmatpush1.bf16.msk.msra.mxu1 %vm886_vm2, %v844_v39  ;;  %445 = vmatprep.mubr.f32.mxu0 %v863_v3 }
  0x10   :  { %516 = vmatprep.mubr.f32.mxu1 %v863_v3  ;;  %849 = vmatprep.subr.msk.bf16.mxu0 %vm886_vm2, %v847_v46 }
  0x11   :  { %855 = vmatprep.subr.msk.bf16.mxu1 %vm886_vm2, %v853_v47  ;;  %801 = vmatmul.mubr.msk.f32.vlgmr.msra.gmra.mrb[4].mxu0 %vm44_vm3, %v915_v14 }
  0x12   :  { %804 = vmatmul.mubr.msk.f32.vlgmr.msra.gmra.mrb[4].mxu1 %vm44_vm3, %v915_v14  ;;  %852 = vmatpush1.bf16.msk.msra.mxu0 %vm886_vm2, %v850_v49 }
  0x13   :  { %858 = vmatpush1.bf16.msk.msra.mxu1 %vm886_vm2, %v856_v50  ;;  %587 = vmatprep.mubr.f32.mxu0 %v863_v3 }
  0x14   :  { %658 = vmatprep.mubr.f32.mxu1 %v863_v3 }
  0x15   :  { %807 = vmatmul.mubr.msk.f32.vlgmr.msra.gmra.mrb[6].mxu0 %vm44_vm3, %v915_v14 }
  0x16   :  { %810 = vmatmul.mubr.msk.f32.vlgmr.msra.gmra.mrb[6].mxu1 %vm44_vm3, %v915_v14 }
  0xdc   :  { %v163_v56 = vpop.f32.mrb[0].mxu0 }
  0xdd   :  { %v234_v57 = vpop.f32.mrb[0].mxu1  ;;  %v165_v59 = vpop.f32.mrb[1].mxu0 }
  0xde   :  { %v236_v60 = vpop.f32.mrb[1].mxu1  ;;  %v681_v61 = vcombine.low %v163_v56, %v165_v59 }
  0xdf   :  { %v682_v62 = vcombine.low %v234_v57, %v236_v60 }
  0xe0   :  { %v691_v63 = vrot.slane %v681_v61, %v690_v58  ;;  %v305_v1 = vpop.f32.mrb[2].mxu0 }
  0xe1   :  { %v698_v0 = vrot.slane %v682_v62, %v690_v58  ;;  %v376_v2 = vpop.f32.mrb[2].mxu1  ;;  %v307_v3 = vpop.f32.mrb[3].mxu0 }
  0xe2   :  { %v378_v4 = vpop.f32.mrb[3].mxu1  ;;  %v683_v6 = vcombine.low %v305_v1, %v307_v3 }
  0xe3   :  { %v713_v5 = vcombine.low %v691_v63, %v698_v0  ;;  %v684_v7 = vcombine.low %v376_v2, %v378_v4 }
  0xe4   :  { %v705_v8 = vrot.slane %v683_v6, %v690_v58  ;;  %v447_v10 = vpop.f32.mrb[4].mxu0 }
  0xe5   :  { %v712_v9 = vrot.slane %v684_v7, %v690_v58  ;;  %v518_v11 = vpop.f32.mrb[4].mxu1  ;;  %v449_v12 = vpop.f32.mrb[5].mxu0  ;;  %v721_v17 = vrot.slane %v713_v5, %v690_v58 }
  0xe6   :  { %v520_v13 = vpop.f32.mrb[5].mxu1  ;;  %v730_v15 = vcombine.low %v447_v10, %v449_v12 }
  0xe7   :  { %v714_v14 = vcombine.low %v705_v8, %v712_v9  ;;  %v731_v16 = vcombine.low %v518_v11, %v520_v13 }
  0xe8   :  { %v740_v19 = vrot.slane %v730_v15, %v690_v58  ;;  %v589_v21 = vpop.f32.mrb[6].mxu0 }
  0xe9   :  { %v728_v18 = vrot.slane %v714_v14, %v690_v58  ;;  %v747_v20 = vrot.slane %v731_v16, %v690_v58  ;;  %v660_v22 = vpop.f32.mrb[6].mxu1  ;;  %v591_v23 = vpop.f32.mrb[7].mxu0 }
  0xea   :  { %v662_v24 = vpop.f32.mrb[7].mxu1  ;;  %v732_v27 = vcombine.low %v589_v21, %v591_v23 }
  0xeb   :  { %v729_v25 = vcombine.low %v721_v17, %v728_v18  ;;  %v762_v26 = vcombine.low %v740_v19, %v747_v20  ;;  %v733_v28 = vcombine.low %v660_v22, %v662_v24 }
  0xec   :  { %v754_v29 = vrot.slane %v732_v27, %v690_v58 }
  0xed   :  { %781 = vst [vmem:[%s1049_s2] sm:$0xff] %v729_v25  ;;  %v761_v30 = vrot.slane %v733_v28, %v690_v58  ;;  %v770_v32 = vrot.slane %v762_v26, %v690_v58 }
  0xef   :  { %v763_v31 = vcombine.low %v754_v29, %v761_v30 }
  0xf1   :  { %v777_v33 = vrot.slane %v763_v31, %v690_v58 }
  0xf3   :  { %v778_v34 = vcombine.low %v770_v32, %v777_v33 }
  0xf5   :  { %782 = vst [vmem:[%s1049_s2 + $0x8] sm:$0xff] %v778_v34 }

// kernel: unet_forward.20
= control target key start
LH: loop header
LB: loop body
LE: loop exit
PB: predicated region body
PF: predicated region fallthrough
CT: control target
= control target key end

     0   :  { %v1882_v3 = vmov 0.0   ;;  %vm215_vm0 = vcmask 1044480   ;;  %vm1883_vm1 = vmmov 1   ;;  %vm211_vm3 = vcmask 367616   ;;  %s2625_s1 = inlined_call_operand.vmem [shape: f32[45,2048], index: 1, kind: input, shape index: {}]   ;;  %s2626_s3 = inlined_call_operand.vmem [shape: f32[1,45], index: 3, kind: input, shape index: {}]   ;;  %s2627_s0 = inlined_call_operand.vmem [shape: f32[46,2048], index: 0, kind: input, shape index: {}]   ;;  %s2628_s2 = inlined_call_operand.vmem [shape: f32[1,46], index: 2, kind: input, shape index: {}]   ;;  %s2629_s4 = inlined_call_operand.vmem [shape: f32[1,2048], index: 4, kind: output, shape index: {}]  }
   0x1   :  { %v116_v0 = vld [vmem:[%s2625_s1 + $0x8] sm:$0xff]  ;;  %v118_v2 = vld [vmem:[%s2625_s1 + $0x18] sm:$0xff]  ;;  %328 = vmatprep.mubr.f32.mxu0 %v1882_v3  ;;  %399 = vmatprep.mubr.f32.mxu1 %v1882_v3  ;;  %v115_v6 = vld [vmem:[%s2625_s1] sm:$0xff]  ;;  %vm836_vm4 = vcmask 1045504   ;;  %vm832_vm6 = vcmask 375808  }
   0x2   :  { %v132_v1 = vld [vmem:[%s2625_s1 + $0x88] sm:$0xff]  ;;  %v134_v5 = vld [vmem:[%s2625_s1 + $0x98] sm:$0xff]  ;;  %v131_v7 = vld [vmem:[%s2625_s1 + $0x80] sm:$0xff] }
   0x3   :  { %v1639_v4 = vpack.c.bf16 %v132_v1, %v116_v0  ;;  %v1653_v8 = vpack.c.bf16 %v134_v5, %v118_v2  ;;  %v1641_v9 = vpack.c.bf16 %v131_v7, %v115_v6  ;;  %v117_v10 = vld [vmem:[%s2625_s1 + $0x10] sm:$0xff]  ;;  %v148_v12 = vld [vmem:[%s2625_s1 + $0x108] sm:$0xff]  ;;  %v150_v15 = vld [vmem:[%s2625_s1 + $0x118] sm:$0xff] }
   0x4   :  { %v133_v11 = vld [vmem:[%s2625_s1 + $0x90] sm:$0xff]  ;;  %v164_v14 = vld [vmem:[%s2625_s1 + $0x188] sm:$0xff]  ;;  %v166_v16 = vld [vmem:[%s2625_s1 + $0x198] sm:$0xff] }
   0x5   :  { %1640 = vmatprep.subr.bf16.mxu0 %v1639_v4  ;;  %v1655_v13 = vpack.c.bf16 %v133_v11, %v117_v10  ;;  %1654 = vmatprep.subr.bf16.mxu1 %v1653_v8  ;;  %v1643_v17 = vpack.c.bf16 %v164_v14, %v148_v12  ;;  %v1657_v18 = vpack.c.bf16 %v166_v16, %v150_v15  ;;  %v147_v19 = vld [vmem:[%s2625_s1 + $0x100] sm:$0xff]  ;;  %v149_v21 = vld [vmem:[%s2625_s1 + $0x110] sm:$0xff]  ;;  %v180_v24 = vld [vmem:[%s2625_s1 + $0x208] sm:$0xff] }
   0x6   :  { %1642 = vmatpush1.bf16.msra.mxu0 %v1641_v9  ;;  %v163_v20 = vld [vmem:[%s2625_s1 + $0x180] sm:$0xff]  ;;  %v165_v23 = vld [vmem:[%s2625_s1 + $0x190] sm:$0xff]  ;;  %v196_v25 = vld [vmem:[%s2625_s1 + $0x288] sm:$0x1f] }
   0x7   :  { %1656 = vmatpush1.bf16.msra.mxu1 %v1655_v13  ;;  %v1645_v22 = vpack.c.bf16 %v163_v20, %v147_v19  ;;  %1644 = vmatprep.subr.bf16.mxu0 %v1643_v17  ;;  %v1659_v26 = vpack.c.bf16 %v165_v23, %v149_v21  ;;  %v1647_v27 = vpack.c.bf16 %v196_v25, %v180_v24  ;;  %vm1968_vm2 = vmpackc.low %vm215_vm0, %vm1883_vm1  ;;  %v182_v29 = vld [vmem:[%s2625_s1 + $0x218] sm:$0xff]  ;;  %v179_v32 = vld [vmem:[%s2625_s1 + $0x200] sm:$0xff] }
   0x8   :  { %1658 = vmatprep.subr.bf16.mxu1 %v1657_v18  ;;  %v198_v30 = vld [vmem:[%s2625_s1 + $0x298] sm:$0x1f]  ;;  %v195_v33 = vld [vmem:[%s2625_s1 + $0x280] sm:$0x1f]  ;;  %v181_v34 = vld [vmem:[%s2625_s1 + $0x210] sm:$0xff] }
   0x9   :  { %v1661_v31 = vpack.c.bf16 %v198_v30, %v182_v29  ;;  %v1650_v35 = vpack.c.bf16 %v195_v33, %v179_v32  ;;  %v197_v36 = vld [vmem:[%s2625_s1 + $0x290] sm:$0x1f]  ;;  %v120_v37 = vld [vmem:[%s2625_s1 + $0x28] sm:$0xff]  ;;  %v122_v41 = vld [vmem:[%s2625_s1 + $0x38] sm:$0xff] }
   0xa   :  { %1646 = vmatpush1.bf16.msra.mxu0 %v1645_v22  ;;  %v136_v38 = vld [vmem:[%s2625_s1 + $0xa8] sm:$0xff]  ;;  %v1664_v39 = vpack.c.bf16 %v197_v36, %v181_v34  ;;  %v138_v42 = vld [vmem:[%s2625_s1 + $0xb8] sm:$0xff]  ;;  %v119_v44 = vld [vmem:[%s2625_s1 + $0x20] sm:$0xff] }
   0xb   :  { %1660 = vmatpush1.bf16.msra.mxu1 %v1659_v26  ;;  %1649 = vmatprep.subr.msk.bf16.mxu0 %vm1968_vm2, %v1647_v27  ;;  %v1667_v40 = vpack.c.bf16 %v136_v38, %v120_v37  ;;  %v1681_v43 = vpack.c.bf16 %v138_v42, %v122_v41  ;;  %v135_v45 = vld [vmem:[%s2625_s1 + $0xa0] sm:$0xff]  ;;  %v121_v46 = vld [vmem:[%s2625_s1 + $0x30] sm:$0xff]  ;;  %v152_v48 = vld [vmem:[%s2625_s1 + $0x128] sm:$0xff] }
   0xc   :  { %1663 = vmatprep.subr.msk.bf16.mxu1 %vm1968_vm2, %v1661_v31  ;;  %v137_v47 = vld [vmem:[%s2625_s1 + $0xb0] sm:$0xff]  ;;  %v168_v49 = vld [vmem:[%s2625_s1 + $0x1a8] sm:$0xff]  ;;  %v2029_v50 = vld [vmem:[%s2626_s3] sm:$0x1]  ;;  %v1669_v51 = vpack.c.bf16 %v135_v45, %v119_v44 }
   0xd   :  { %v154_v52 = vld [vmem:[%s2625_s1 + $0x138] sm:$0xff]  ;;  %v1683_v54 = vpack.c.bf16 %v137_v47, %v121_v46  ;;  %v1671_v55 = vpack.c.bf16 %v168_v49, %v152_v48  ;;  %v151_v56 = vld [vmem:[%s2625_s1 + $0x120] sm:$0xff]  ;;  %v153_v58 = vld [vmem:[%s2625_s1 + $0x130] sm:$0xff] }
   0xe   :  { %1652 = vmatpush1.bf16.msk.msra.mxu0 %vm1968_vm2, %v1650_v35  ;;  %v170_v53 = vld [vmem:[%s2625_s1 + $0x1b8] sm:$0xff]  ;;  %v167_v57 = vld [vmem:[%s2625_s1 + $0x1a0] sm:$0xff]  ;;  %v169_v60 = vld [vmem:[%s2625_s1 + $0x1b0] sm:$0xff] }
   0xf   :  { %1666 = vmatpush1.bf16.msk.msra.mxu1 %vm1968_vm2, %v1664_v39  ;;  %1668 = vmatprep.subr.bf16.mxu0 %v1667_v40  ;;  %v1685_v59 = vpack.c.bf16 %v170_v53, %v154_v52  ;;  %v184_v61 = vld [vmem:[%s2625_s1 + $0x228] sm:$0xff]  ;;  %v186_v63 = vld [vmem:[%s2625_s1 + $0x238] sm:$0xff]  ;;  %v1673_v1 = vpack.c.bf16 %v167_v57, %v151_v56  ;;  %v1687_v2 = vpack.c.bf16 %v169_v60, %v153_v58  ;;  %v183_v5 = vld [vmem:[%s2625_s1 + $0x220] sm:$0xff] }
  0x10   :  { %1682 = vmatprep.subr.bf16.mxu1 %v1681_v43  ;;  %v200_v62 = vld [vmem:[%s2625_s1 + $0x2a8] sm:$0x1f]  ;;  %v202_v0 = vld [vmem:[%s2625_s1 + $0x2b8] sm:$0x1f]  ;;  %v199_v6 = vld [vmem:[%s2625_s1 + $0x2a0] sm:$0x1f] }
  0x11   :  { %1593 = vmatmul.mubr.msk.f32.vlgmr.msra.gmra.mrb[0].mxu0 %vm211_vm3, %v2029_v50  ;;  %v1675_v4 = vpack.c.bf16 %v200_v62, %v184_v61  ;;  %v185_v7 = vld [vmem:[%s2625_s1 + $0x230] sm:$0xff]  ;;  %v1689_v8 = vpack.c.bf16 %v202_v0, %v186_v63  ;;  %v124_v10 = vld [vmem:[%s2625_s1 + $0x48] sm:$0xff]  ;;  %v126_v12 = vld [vmem:[%s2625_s1 + $0x58] sm:$0xff]  ;;  %v1678_v14 = vpack.c.bf16 %v199_v6, %v183_v5 }
  0x12   :  { %1596 = vmatmul.mubr.msk.f32.vlgmr.msra.gmra.mrb[0].mxu1 %vm211_vm3, %v2029_v50  ;;  %1670 = vmatpush1.bf16.msra.mxu0 %v1669_v51  ;;  %v201_v9 = vld [vmem:[%s2625_s1 + $0x2b0] sm:$0x1f]  ;;  %v140_v11 = vld [vmem:[%s2625_s1 + $0xc8] sm:$0xff]  ;;  %v142_v13 = vld [vmem:[%s2625_s1 + $0xd8] sm:$0xff] }
  0x13   :  { %1684 = vmatpush1.bf16.msra.mxu1 %v1683_v54  ;;  %1672 = vmatprep.subr.bf16.mxu0 %v1671_v55  ;;  %v1692_v15 = vpack.c.bf16 %v201_v9, %v185_v7  ;;  %v1695_v16 = vpack.c.bf16 %v140_v11, %v124_v10  ;;  %v123_v17 = vld [vmem:[%s2625_s1 + $0x40] sm:$0xff]  ;;  %v125_v19 = vld [vmem:[%s2625_s1 + $0x50] sm:$0xff]  ;;  %v1709_v20 = vpack.c.bf16 %v142_v13, %v126_v12  ;;  %v156_v22 = vld [vmem:[%s2625_s1 + $0x148] sm:$0xff] }
  0x14   :  { %1686 = vmatprep.subr.bf16.mxu1 %v1685_v59  ;;  %470 = vmatprep.mubr.f32.mxu0 %v1882_v3  ;;  %v139_v18 = vld [vmem:[%s2625_s1 + $0xc0] sm:$0xff]  ;;  %v141_v21 = vld [vmem:[%s2625_s1 + $0xd0] sm:$0xff]  ;;  %v172_v23 = vld [vmem:[%s2625_s1 + $0x1c8] sm:$0xff] }
  0x15   :  { %541 = vmatprep.mubr.f32.mxu1 %v1882_v3  ;;  %v158_v24 = vld [vmem:[%s2625_s1 + $0x158] sm:$0xff]  ;;  %v1697_v26 = vpack.c.bf16 %v139_v18, %v123_v17  ;;  %v1711_v27 = vpack.c.bf16 %v141_v21, %v125_v19  ;;  %v1699_v29 = vpack.c.bf16 %v172_v23, %v156_v22  ;;  %v155_v30 = vld [vmem:[%s2625_s1 + $0x140] sm:$0xff]  ;;  %v157_v32 = vld [vmem:[%s2625_s1 + $0x150] sm:$0xff] }
  0x16   :  { %1674 = vmatpush1.bf16.msra.mxu0 %v1673_v1  ;;  %v174_v25 = vld [vmem:[%s2625_s1 + $0x1d8] sm:$0xff]  ;;  %v171_v31 = vld [vmem:[%s2625_s1 + $0x1c0] sm:$0xff]  ;;  %v173_v34 = vld [vmem:[%s2625_s1 + $0x1d0] sm:$0xff] }
  0x17   :  { %1688 = vmatpush1.bf16.msra.mxu1 %v1687_v2  ;;  %1677 = vmatprep.subr.msk.bf16.mxu0 %vm1968_vm2, %v1675_v4  ;;  %v1713_v33 = vpack.c.bf16 %v174_v25, %v158_v24  ;;  %v188_v35 = vld [vmem:[%s2625_s1 + $0x248] sm:$0xff]  ;;  %v190_v37 = vld [vmem:[%s2625_s1 + $0x258] sm:$0xff]  ;;  %v1701_v39 = vpack.c.bf16 %v171_v31, %v155_v30  ;;  %v1715_v40 = vpack.c.bf16 %v173_v34, %v157_v32  ;;  %v187_v42 = vld [vmem:[%s2625_s1 + $0x240] sm:$0xff] }
  0x18   :  { %1691 = vmatprep.subr.msk.bf16.mxu1 %vm1968_vm2, %v1689_v8  ;;  %v204_v36 = vld [vmem:[%s2625_s1 + $0x2c8] sm:$0x1f]  ;;  %v206_v38 = vld [vmem:[%s2625_s1 + $0x2d8] sm:$0x1f]  ;;  %v203_v43 = vld [vmem:[%s2625_s1 + $0x2c0] sm:$0x1f] }
  0x19   :  { %v1703_v41 = vpack.c.bf16 %v204_v36, %v188_v35  ;;  %v189_v44 = vld [vmem:[%s2625_s1 + $0x250] sm:$0xff]  ;;  %v1717_v45 = vpack.c.bf16 %v206_v38, %v190_v37  ;;  %v128_v47 = vld [vmem:[%s2625_s1 + $0x68] sm:$0xff]  ;;  %v130_v49 = vld [vmem:[%s2625_s1 + $0x78] sm:$0xff]  ;;  %v1706_v52 = vpack.c.bf16 %v203_v43, %v187_v42 }
  0x1a   :  { %1680 = vmatpush1.bf16.msk.msra.mxu0 %vm1968_vm2, %v1678_v14  ;;  %v205_v46 = vld [vmem:[%s2625_s1 + $0x2d0] sm:$0x1f]  ;;  %v144_v48 = vld [vmem:[%s2625_s1 + $0xe8] sm:$0xff]  ;;  %v146_v51 = vld [vmem:[%s2625_s1 + $0xf8] sm:$0xff] }
  0x1b   :  { %1694 = vmatpush1.bf16.msk.msra.mxu1 %vm1968_vm2, %v1692_v15  ;;  %1696 = vmatprep.subr.bf16.mxu0 %v1695_v16  ;;  %v1720_v53 = vpack.c.bf16 %v205_v46, %v189_v44  ;;  %v1723_v54 = vpack.c.bf16 %v144_v48, %v128_v47  ;;  %v127_v55 = vld [vmem:[%s2625_s1 + $0x60] sm:$0xff]  ;;  %v129_v57 = vld [vmem:[%s2625_s1 + $0x70] sm:$0xff]  ;;  %v1737_v58 = vpack.c.bf16 %v146_v51, %v130_v49  ;;  %v160_v60 = vld [vmem:[%s2625_s1 + $0x168] sm:$0xff] }
  0x1c   :  { %1710 = vmatprep.subr.bf16.mxu1 %v1709_v20  ;;  %v143_v56 = vld [vmem:[%s2625_s1 + $0xe0] sm:$0xff]  ;;  %v145_v59 = vld [vmem:[%s2625_s1 + $0xf0] sm:$0xff]  ;;  %v176_v61 = vld [vmem:[%s2625_s1 + $0x1e8] sm:$0xff] }
  0x1d   :  { %1599 = vmatmul.mubr.msk.f32.vlgmr.msra.gmra.mrb[2].mxu0 %vm211_vm3, %v2029_v50  ;;  %v162_v62 = vld [vmem:[%s2625_s1 + $0x178] sm:$0xff]  ;;  %v1725_v0 = vpack.c.bf16 %v143_v56, %v127_v55  ;;  %v1739_v1 = vpack.c.bf16 %v145_v59, %v129_v57  ;;  %v1727_v2 = vpack.c.bf16 %v176_v61, %v160_v60  ;;  %v159_v4 = vld [vmem:[%s2625_s1 + $0x160] sm:$0xff]  ;;  %v161_v6 = vld [vmem:[%s2625_s1 + $0x170] sm:$0xff] }
  0x1e   :  { %1602 = vmatmul.mubr.msk.f32.vlgmr.msra.gmra.mrb[2].mxu1 %vm211_vm3, %v2029_v50  ;;  %1698 = vmatpush1.bf16.msra.mxu0 %v1697_v26  ;;  %v178_v63 = vld [vmem:[%s2625_s1 + $0x1f8] sm:$0xff]  ;;  %v175_v5 = vld [vmem:[%s2625_s1 + $0x1e0] sm:$0xff]  ;;  %v177_v8 = vld [vmem:[%s2625_s1 + $0x1f0] sm:$0xff] }
  0x1f   :  { %1712 = vmatpush1.bf16.msra.mxu1 %v1711_v27  ;;  %1700 = vmatprep.subr.bf16.mxu0 %v1699_v29  ;;  %v1741_v7 = vpack.c.bf16 %v178_v63, %v162_v62  ;;  %v192_v9 = vld [vmem:[%s2625_s1 + $0x268] sm:$0xff]  ;;  %v194_v11 = vld [vmem:[%s2625_s1 + $0x278] sm:$0xff]  ;;  %v1729_v13 = vpack.c.bf16 %v175_v5, %v159_v4  ;;  %v1743_v14 = vpack.c.bf16 %v177_v8, %v161_v6  ;;  %v191_v16 = vld [vmem:[%s2625_s1 + $0x260] sm:$0xff] }
  0x20   :  { %1714 = vmatprep.subr.bf16.mxu1 %v1713_v33  ;;  %612 = vmatprep.mubr.f32.mxu0 %v1882_v3  ;;  %v208_v10 = vld [vmem:[%s2625_s1 + $0x2e8] sm:$0x1f]  ;;  %v210_v12 = vld [vmem:[%s2625_s1 + $0x2f8] sm:$0x1f]  ;;  %v207_v17 = vld [vmem:[%s2625_s1 + $0x2e0] sm:$0x1f] }
  0x21   :  { %683 = vmatprep.mubr.f32.mxu1 %v1882_v3  ;;  %v1731_v15 = vpack.c.bf16 %v208_v10, %v192_v9  ;;  %v193_v18 = vld [vmem:[%s2625_s1 + $0x270] sm:$0xff]  ;;  %v1745_v19 = vpack.c.bf16 %v210_v12, %v194_v11  ;;  %v19_v21 = vld [vmem:[%s2627_s0 + $0x8] sm:$0xff]  ;;  %v21_v23 = vld [vmem:[%s2627_s0 + $0x18] sm:$0xff]  ;;  %v1734_v25 = vpack.c.bf16 %v207_v17, %v191_v16 }
  0x22   :  { %1702 = vmatpush1.bf16.msra.mxu0 %v1701_v39  ;;  %v209_v20 = vld [vmem:[%s2625_s1 + $0x2f0] sm:$0x1f]  ;;  %v35_v22 = vld [vmem:[%s2627_s0 + $0x88] sm:$0xff]  ;;  %v37_v24 = vld [vmem:[%s2627_s0 + $0x98] sm:$0xff] }
  0x23   :  { %1716 = vmatpush1.bf16.msra.mxu1 %v1715_v40  ;;  %1705 = vmatprep.subr.msk.bf16.mxu0 %vm1968_vm2, %v1703_v41  ;;  %v1748_v26 = vpack.c.bf16 %v209_v20, %v193_v18  ;;  %v1751_v27 = vpack.c.bf16 %v35_v22, %v19_v21  ;;  %v18_v29 = vld [vmem:[%s2627_s0] sm:$0xff]  ;;  %v20_v31 = vld [vmem:[%s2627_s0 + $0x10] sm:$0xff]  ;;  %v1765_v32 = vpack.c.bf16 %v37_v24, %v21_v23  ;;  %v51_v34 = vld [vmem:[%s2627_s0 + $0x108] sm:$0xff] }
  0x24   :  { %1719 = vmatprep.subr.msk.bf16.mxu1 %vm1968_vm2, %v1717_v45  ;;  %v34_v30 = vld [vmem:[%s2627_s0 + $0x80] sm:$0xff]  ;;  %v36_v33 = vld [vmem:[%s2627_s0 + $0x90] sm:$0xff]  ;;  %v67_v35 = vld [vmem:[%s2627_s0 + $0x188] sm:$0xff] }
  0x25   :  { %v53_v36 = vld [vmem:[%s2627_s0 + $0x118] sm:$0xff]  ;;  %v1753_v38 = vpack.c.bf16 %v34_v30, %v18_v29  ;;  %v1767_v39 = vpack.c.bf16 %v36_v33, %v20_v31  ;;  %v1755_v40 = vpack.c.bf16 %v67_v35, %v51_v34  ;;  %v50_v41 = vld [vmem:[%s2627_s0 + $0x100] sm:$0xff]  ;;  %v52_v43 = vld [vmem:[%s2627_s0 + $0x110] sm:$0xff] }
  0x26   :  { %1708 = vmatpush1.bf16.msk.msra.mxu0 %vm1968_vm2, %v1706_v52  ;;  %v69_v37 = vld [vmem:[%s2627_s0 + $0x198] sm:$0xff]  ;;  %v66_v42 = vld [vmem:[%s2627_s0 + $0x180] sm:$0xff]  ;;  %v68_v28 = vld [vmem:[%s2627_s0 + $0x190] sm:$0xff] }
  0x27   :  { %1722 = vmatpush1.bf16.msk.msra.mxu1 %vm1968_vm2, %v1720_v53  ;;  %1724 = vmatprep.subr.bf16.mxu0 %v1723_v54  ;;  %v1769_v44 = vpack.c.bf16 %v69_v37, %v53_v36  ;;  %v83_v45 = vld [vmem:[%s2627_s0 + $0x208] sm:$0xff]  ;;  %v85_v47 = vld [vmem:[%s2627_s0 + $0x218] sm:$0xff]  ;;  %v1757_v49 = vpack.c.bf16 %v66_v42, %v50_v41  ;;  %vm2326_vm5 = vmpackc.low %vm836_vm4, %vm1883_vm1  ;;  %v1771_v52 = vpack.c.bf16 %v68_v28, %v52_v43 }
  0x28   :  { %1738 = vmatprep.subr.bf16.mxu1 %v1737_v58  ;;  %v99_v46 = vld [vmem:[%s2627_s0 + $0x288] sm:$0x3f]  ;;  %v101_v48 = vld [vmem:[%s2627_s0 + $0x298] sm:$0x3f]  ;;  %v82_v54 = vld [vmem:[%s2627_s0 + $0x200] sm:$0xff] }
  0x29   :  { %1605 = vmatmul.mubr.msk.f32.vlgmr.msra.gmra.mrb[4].mxu0 %vm211_vm3, %v2029_v50  ;;  %v1759_v53 = vpack.c.bf16 %v99_v46, %v83_v45  ;;  %v98_v55 = vld [vmem:[%s2627_s0 + $0x280] sm:$0x3f]  ;;  %v1773_v56 = vpack.c.bf16 %v101_v48, %v85_v47  ;;  %v100_v57 = vld [vmem:[%s2627_s0 + $0x290] sm:$0x3f]  ;;  %v23_v58 = vld [vmem:[%s2627_s0 + $0x28] sm:$0xff] }
  0x2a   :  { %1608 = vmatmul.mubr.msk.f32.vlgmr.msra.gmra.mrb[4].mxu1 %vm211_vm3, %v2029_v50  ;;  %1726 = vmatpush1.bf16.msra.mxu0 %v1725_v0  ;;  %v39_v59 = vld [vmem:[%s2627_s0 + $0xa8] sm:$0xff]  ;;  %v25_v60 = vld [vmem:[%s2627_s0 + $0x38] sm:$0xff]  ;;  %v1762_v62 = vpack.c.bf16 %v98_v55, %v82_v54  ;;  %v24_v4 = vld [vmem:[%s2627_s0 + $0x30] sm:$0xff] }
  0x2b   :  { %1740 = vmatpush1.bf16.msra.mxu1 %v1739_v1  ;;  %1728 = vmatprep.subr.bf16.mxu0 %v1727_v2  ;;  %v41_v61 = vld [vmem:[%s2627_s0 + $0xb8] sm:$0xff]  ;;  %v1779_v0 = vpack.c.bf16 %v39_v59, %v23_v58  ;;  %v22_v1 = vld [vmem:[%s2627_s0 + $0x20] sm:$0xff]  ;;  %v40_v6 = vld [vmem:[%s2627_s0 + $0xb0] sm:$0xff] }
  0x2c   :  { %1742 = vmatprep.subr.bf16.mxu1 %v1741_v7  ;;  %754 = vmatprep.mubr.f32.mxu0 %v1882_v3  ;;  %v38_v2 = vld [vmem:[%s2627_s0 + $0xa0] sm:$0xff]  ;;  %v1793_v5 = vpack.c.bf16 %v41_v61, %v25_v60  ;;  %v55_v7 = vld [vmem:[%s2627_s0 + $0x128] sm:$0xff]  ;;  %v57_v9 = vld [vmem:[%s2627_s0 + $0x138] sm:$0xff] }
  0x2d   :  { %825 = vmatprep.mubr.f32.mxu1 %v1882_v3  ;;  %v71_v8 = vld [vmem:[%s2627_s0 + $0x1a8] sm:$0xff]  ;;  %v73_v10 = vld [vmem:[%s2627_s0 + $0x1b8] sm:$0xff]  ;;  %v2389_v11 = vld [vmem:[%s2628_s2] sm:$0x1]  ;;  %v1781_v12 = vpack.c.bf16 %v38_v2, %v22_v1 }
  0x2e   :  { %1730 = vmatpush1.bf16.msra.mxu0 %v1729_v13  ;;  %v1795_v13 = vpack.c.bf16 %v40_v6, %v24_v4  ;;  %v70_v16 = vld [vmem:[%s2627_s0 + $0x1a0] sm:$0xff]  ;;  %v56_v17 = vld [vmem:[%s2627_s0 + $0x130] sm:$0xff]  ;;  %v1797_v18 = vpack.c.bf16 %v73_v10, %v57_v9  ;;  %v87_v20 = vld [vmem:[%s2627_s0 + $0x228] sm:$0xff] }
  0x2f   :  { %1744 = vmatpush1.bf16.msra.mxu1 %v1743_v14  ;;  %1733 = vmatprep.subr.msk.bf16.mxu0 %vm1968_vm2, %v1731_v15  ;;  %v1783_v14 = vpack.c.bf16 %v71_v8, %v55_v7  ;;  %v54_v15 = vld [vmem:[%s2627_s0 + $0x120] sm:$0xff]  ;;  %v103_v21 = vld [vmem:[%s2627_s0 + $0x2a8] sm:$0x3f]  ;;  %v89_v22 = vld [vmem:[%s2627_s0 + $0x238] sm:$0xff] }
  0x30   :  { %1747 = vmatprep.subr.msk.bf16.mxu1 %vm1968_vm2, %v1745_v19  ;;  %v72_v19 = vld [vmem:[%s2627_s0 + $0x1b0] sm:$0xff]  ;;  %v105_v23 = vld [vmem:[%s2627_s0 + $0x2b8] sm:$0x3f]  ;;  %v1785_v24 = vpack.c.bf16 %v70_v16, %v54_v15  ;;  %v102_v29 = vld [vmem:[%s2627_s0 + $0x2a0] sm:$0x3f] }
  0x31   :  { %v88_v30 = vld [vmem:[%s2627_s0 + $0x230] sm:$0xff]  ;;  %v1801_v31 = vpack.c.bf16 %v105_v23, %v89_v22  ;;  %v27_v33 = vld [vmem:[%s2627_s0 + $0x48] sm:$0xff]  ;;  %v29_v35 = vld [vmem:[%s2627_s0 + $0x58] sm:$0xff] }
  0x32   :  { %1736 = vmatpush1.bf16.msk.msra.mxu0 %vm1968_vm2, %v1734_v25  ;;  %v1799_v25 = vpack.c.bf16 %v72_v19, %v56_v17  ;;  %v43_v34 = vld [vmem:[%s2627_s0 + $0xc8] sm:$0xff]  ;;  %v45_v36 = vld [vmem:[%s2627_s0 + $0xd8] sm:$0xff]  ;;  %v42_v41 = vld [vmem:[%s2627_s0 + $0xc0] sm:$0xff] }
  0x33   :  { %1750 = vmatpush1.bf16.msk.msra.mxu1 %vm1968_vm2, %v1748_v26  ;;  %1752 = vmatprep.subr.bf16.mxu0 %v1751_v27  ;;  %v1787_v26 = vpack.c.bf16 %v103_v21, %v87_v20  ;;  %v86_v27 = vld [vmem:[%s2627_s0 + $0x220] sm:$0xff]  ;;  %v28_v42 = vld [vmem:[%s2627_s0 + $0x50] sm:$0xff]  ;;  %v1821_v43 = vpack.c.bf16 %v45_v36, %v29_v35  ;;  %v59_v28 = vld [vmem:[%s2627_s0 + $0x148] sm:$0xff] }
  0x34   :  { %1766 = vmatprep.subr.bf16.mxu1 %v1765_v32  ;;  %v104_v32 = vld [vmem:[%s2627_s0 + $0x2b0] sm:$0x3f]  ;;  %v1790_v37 = vpack.c.bf16 %v102_v29, %v86_v27  ;;  %v75_v45 = vld [vmem:[%s2627_s0 + $0x1c8] sm:$0xff]  ;;  %v61_v46 = vld [vmem:[%s2627_s0 + $0x158] sm:$0xff] }
  0x35   :  { %1611 = vmatmul.mubr.msk.f32.vlgmr.msra.gmra.mrb[6].mxu0 %vm211_vm3, %v2029_v50  ;;  %v77_v47 = vld [vmem:[%s2627_s0 + $0x1d8] sm:$0xff]  ;;  %v74_v54 = vld [vmem:[%s2627_s0 + $0x1c0] sm:$0xff]  ;;  %v60_v55 = vld [vmem:[%s2627_s0 + $0x150] sm:$0xff] }
  0x36   :  { %1614 = vmatmul.mubr.msk.f32.vlgmr.msra.gmra.mrb[6].mxu1 %vm211_vm3, %v2029_v50  ;;  %1754 = vmatpush1.bf16.msra.mxu0 %v1753_v38  ;;  %v84_v50 = vld [vmem:[%s2627_s0 + $0x210] sm:$0xff]  ;;  %v1804_v38 = vpack.c.bf16 %v104_v32, %v88_v30  ;;  %v107_v58 = vld [vmem:[%s2627_s0 + $0x2c8] sm:$0x3f]  ;;  %v93_v59 = vld [vmem:[%s2627_s0 + $0x258] sm:$0xff] }
  0x37   :  { %1768 = vmatpush1.bf16.msra.mxu1 %v1767_v39  ;;  %1756 = vmatprep.subr.bf16.mxu0 %v1755_v40  ;;  %v1776_v63 = vpack.c.bf16 %v100_v57, %v84_v50  ;;  %v1807_v39 = vpack.c.bf16 %v43_v34, %v27_v33  ;;  %v26_v40 = vld [vmem:[%s2627_s0 + $0x40] sm:$0xff]  ;;  %v1825_v50 = vpack.c.bf16 %v77_v47, %v61_v46  ;;  %v91_v57 = vld [vmem:[%s2627_s0 + $0x248] sm:$0xff]  ;;  %v109_v60 = vld [vmem:[%s2627_s0 + $0x2d8] sm:$0x3f]  ;;  %v1492_v46 = vlaneseq }
  0x38   :  { %1770 = vmatprep.subr.bf16.mxu1 %v1769_v44  ;;  %949 = vmatprep.mubr.f32.mxu0 %v1882_v3  ;;  %v44_v44 = vld [vmem:[%s2627_s0 + $0xd0] sm:$0xff]  ;;  %v1809_v48 = vpack.c.bf16 %v42_v41, %v26_v40  ;;  %v106_v1 = vld [vmem:[%s2627_s0 + $0x2c0] sm:$0x3f]  ;;  %v1829_v4 = vpack.c.bf16 %v109_v60, %v93_v59  ;;  %v31_v6 = vld [vmem:[%s2627_s0 + $0x68] sm:$0xff] }
  0x39   :  { %1020 = vmatprep.mubr.f32.mxu1 %v1882_v3  ;;  %v92_v2 = vld [vmem:[%s2627_s0 + $0x250] sm:$0xff]  ;;  %v47_v7 = vld [vmem:[%s2627_s0 + $0xe8] sm:$0xff]  ;;  %v33_v8 = vld [vmem:[%s2627_s0 + $0x78] sm:$0xff] }
  0x3a   :  { %1758 = vmatpush1.bf16.msra.mxu0 %v1757_v49  ;;  %v1823_v49 = vpack.c.bf16 %v44_v44, %v28_v42  ;;  %v49_v9 = vld [vmem:[%s2627_s0 + $0xf8] sm:$0xff]  ;;  %v46_v15 = vld [vmem:[%s2627_s0 + $0xe0] sm:$0xff]  ;;  %v32_v16 = vld [vmem:[%s2627_s0 + $0x70] sm:$0xff] }
  0x3b   :  { %1772 = vmatpush1.bf16.msra.mxu1 %v1771_v52  ;;  %1761 = vmatprep.subr.msk.bf16.mxu0 %vm2326_vm5, %v1759_v53  ;;  %v1811_v52 = vpack.c.bf16 %v75_v45, %v59_v28  ;;  %v58_v53 = vld [vmem:[%s2627_s0 + $0x140] sm:$0xff]  ;;  %v1849_v17 = vpack.c.bf16 %v49_v9, %v33_v8  ;;  %v63_v19 = vld [vmem:[%s2627_s0 + $0x168] sm:$0xff]  ;;  %v65_v21 = vld [vmem:[%s2627_s0 + $0x178] sm:$0xff] }
  0x3c   :  { %1775 = vmatprep.subr.msk.bf16.mxu1 %vm2326_vm5, %v1773_v56  ;;  %v76_v56 = vld [vmem:[%s2627_s0 + $0x1d0] sm:$0xff]  ;;  %v1813_v61 = vpack.c.bf16 %v74_v54, %v58_v53  ;;  %v79_v20 = vld [vmem:[%s2627_s0 + $0x1e8] sm:$0xff]  ;;  %v81_v22 = vld [vmem:[%s2627_s0 + $0x1f8] sm:$0xff] }
  0x3d   :  { %v78_v27 = vld [vmem:[%s2627_s0 + $0x1e0] sm:$0xff]  ;;  %v64_v29 = vld [vmem:[%s2627_s0 + $0x170] sm:$0xff]  ;;  %v1853_v30 = vpack.c.bf16 %v81_v22, %v65_v21  ;;  %v95_v32 = vld [vmem:[%s2627_s0 + $0x268] sm:$0xff] }
  0x3e   :  { %1764 = vmatpush1.bf16.msk.msra.mxu0 %vm2326_vm5, %v1762_v62  ;;  %v1827_v62 = vpack.c.bf16 %v76_v56, %v60_v55  ;;  %v111_v33 = vld [vmem:[%s2627_s0 + $0x2e8] sm:$0x3f]  ;;  %v97_v34 = vld [vmem:[%s2627_s0 + $0x278] sm:$0xff]  ;;  %v110_v40 = vld [vmem:[%s2627_s0 + $0x2e0] sm:$0x3f] }
  0x3f   :  { %1778 = vmatpush1.bf16.msk.msra.mxu1 %vm2326_vm5, %v1776_v63  ;;  %1780 = vmatprep.subr.bf16.mxu0 %v1779_v0  ;;  %v1815_v63 = vpack.c.bf16 %v107_v58, %v91_v57  ;;  %v90_v0 = vld [vmem:[%s2627_s0 + $0x240] sm:$0xff]  ;;  %v113_v35 = vld [vmem:[%s2627_s0 + $0x2f8] sm:$0x3f]  ;;  %v96_v42 = vld [vmem:[%s2627_s0 + $0x270] sm:$0xff] }
  0x40   :  { %1794 = vmatprep.subr.bf16.mxu1 %v1793_v5  ;;  %v108_v5 = vld [vmem:[%s2627_s0 + $0x2d0] sm:$0x3f]  ;;  %v1818_v10 = vpack.c.bf16 %v106_v1, %v90_v0  ;;  %v1857_v41 = vpack.c.bf16 %v113_v35, %v97_v34 }
  0x41   :  { %1617 = vmatmul.mubr.msk.f32.vlgmr.msra.gmra.mrb[0].mxu0 %vm832_vm6, %v2389_v11 }
  0x42   :  { %1620 = vmatmul.mubr.msk.f32.vlgmr.msra.gmra.mrb[0].mxu1 %vm832_vm6, %v2389_v11  ;;  %1782 = vmatpush1.bf16.msra.mxu0 %v1781_v12  ;;  %v1832_v12 = vpack.c.bf16 %v108_v5, %v92_v2 }
  0x43   :  { %1796 = vmatpush1.bf16.msra.mxu1 %v1795_v13  ;;  %1784 = vmatprep.subr.bf16.mxu0 %v1783_v14  ;;  %v1835_v13 = vpack.c.bf16 %v47_v7, %v31_v6  ;;  %v30_v14 = vld [vmem:[%s2627_s0 + $0x60] sm:$0xff] }
  0x44   :  { %1798 = vmatprep.subr.bf16.mxu1 %v1797_v18  ;;  %1091 = vmatprep.mubr.f32.mxu0 %v1882_v3  ;;  %v48_v18 = vld [vmem:[%s2627_s0 + $0xf0] sm:$0xff]  ;;  %v1837_v23 = vpack.c.bf16 %v46_v15, %v30_v14 }
  0x45   :  { %1162 = vmatprep.mubr.f32.mxu1 %v1882_v3 }
  0x46   :  { %1786 = vmatpush1.bf16.msra.mxu0 %v1785_v24  ;;  %v1851_v24 = vpack.c.bf16 %v48_v18, %v32_v16 }
  0x47   :  { %1800 = vmatpush1.bf16.msra.mxu1 %v1799_v25  ;;  %1789 = vmatprep.subr.msk.bf16.mxu0 %vm2326_vm5, %v1787_v26  ;;  %v1839_v25 = vpack.c.bf16 %v79_v20, %v63_v19  ;;  %v62_v26 = vld [vmem:[%s2627_s0 + $0x160] sm:$0xff] }
  0x48   :  { %1803 = vmatprep.subr.msk.bf16.mxu1 %vm2326_vm5, %v1801_v31  ;;  %v80_v31 = vld [vmem:[%s2627_s0 + $0x1f0] sm:$0xff]  ;;  %v1841_v36 = vpack.c.bf16 %v78_v27, %v62_v26 }
  0x4a   :  { %1792 = vmatpush1.bf16.msk.msra.mxu0 %vm2326_vm5, %v1790_v37  ;;  %v1855_v37 = vpack.c.bf16 %v80_v31, %v64_v29 }
  0x4b   :  { %1806 = vmatpush1.bf16.msk.msra.mxu1 %vm2326_vm5, %v1804_v38  ;;  %1808 = vmatprep.subr.bf16.mxu0 %v1807_v39  ;;  %v1843_v38 = vpack.c.bf16 %v111_v33, %v95_v32  ;;  %v94_v39 = vld [vmem:[%s2627_s0 + $0x260] sm:$0xff] }
  0x4c   :  { %1822 = vmatprep.subr.bf16.mxu1 %v1821_v43  ;;  %v112_v43 = vld [vmem:[%s2627_s0 + $0x2f0] sm:$0x3f]  ;;  %v1846_v44 = vpack.c.bf16 %v110_v40, %v94_v39 }
  0x4d   :  { %1623 = vmatmul.mubr.msk.f32.vlgmr.msra.gmra.mrb[2].mxu0 %vm832_vm6, %v2389_v11  ;;  %v1860_v28 = vpack.c.bf16 %v112_v43, %v96_v42 }
  0x4e   :  { %1626 = vmatmul.mubr.msk.f32.vlgmr.msra.gmra.mrb[2].mxu1 %vm832_vm6, %v2389_v11  ;;  %1810 = vmatpush1.bf16.msra.mxu0 %v1809_v48  ;;  %v1493_v48 = vshrl.u32 %v1492_v46, 7 }
  0x4f   :  { %1824 = vmatpush1.bf16.msra.mxu1 %v1823_v49  ;;  %1812 = vmatprep.subr.bf16.mxu0 %v1811_v52 }
  0x50   :  { %1826 = vmatprep.subr.bf16.mxu1 %v1825_v50  ;;  %1233 = vmatprep.mubr.f32.mxu0 %v1882_v3 }
  0x51   :  { %1304 = vmatprep.mubr.f32.mxu1 %v1882_v3 }
  0x52   :  { %1814 = vmatpush1.bf16.msra.mxu0 %v1813_v61 }
  0x53   :  { %1828 = vmatpush1.bf16.msra.mxu1 %v1827_v62  ;;  %1817 = vmatprep.subr.msk.bf16.mxu0 %vm2326_vm5, %v1815_v63 }
  0x54   :  { %1831 = vmatprep.subr.msk.bf16.mxu1 %vm2326_vm5, %v1829_v4 }
  0x56   :  { %1820 = vmatpush1.bf16.msk.msra.mxu0 %vm2326_vm5, %v1818_v10 }
  0x57   :  { %1834 = vmatpush1.bf16.msk.msra.mxu1 %vm2326_vm5, %v1832_v12  ;;  %1836 = vmatprep.subr.bf16.mxu0 %v1835_v13 }
  0x58   :  { %1850 = vmatprep.subr.bf16.mxu1 %v1849_v17 }
  0x59   :  { %1629 = vmatmul.mubr.msk.f32.vlgmr.msra.gmra.mrb[4].mxu0 %vm832_vm6, %v2389_v11 }
  0x5a   :  { %1632 = vmatmul.mubr.msk.f32.vlgmr.msra.gmra.mrb[4].mxu1 %vm832_vm6, %v2389_v11  ;;  %1838 = vmatpush1.bf16.msra.mxu0 %v1837_v23 }
  0x5b   :  { %1852 = vmatpush1.bf16.msra.mxu1 %v1851_v24  ;;  %1840 = vmatprep.subr.bf16.mxu0 %v1839_v25 }
  0x5c   :  { %1854 = vmatprep.subr.bf16.mxu1 %v1853_v30  ;;  %1375 = vmatprep.mubr.f32.mxu0 %v1882_v3 }
  0x5d   :  { %1446 = vmatprep.mubr.f32.mxu1 %v1882_v3  ;;  %v1884_v3 = vmov 1966171168  }
  0x5e   :  { %1842 = vmatpush1.bf16.msra.mxu0 %v1841_v36  ;;  %v1490_v45 = vunpack.c.l.s4 %v1884_v3 }
  0x5f   :  { %1856 = vmatpush1.bf16.msra.mxu1 %v1855_v37  ;;  %1845 = vmatprep.subr.msk.bf16.mxu0 %vm2326_vm5, %v1843_v38 }
  0x60   :  { %1859 = vmatprep.subr.msk.bf16.mxu1 %vm2326_vm5, %v1857_v41  ;;  %v1491_v47 = vunpack.c.0.s8 %v1490_v45 }
  0x62   :  { %1848 = vmatpush1.bf16.msk.msra.mxu0 %vm2326_vm5, %v1846_v44  ;;  %v1494_v56 = vsub.s32 %v1491_v47, %v1493_v48 }
  0x63   :  { %1862 = vmatpush1.bf16.msk.msra.mxu1 %vm2326_vm5, %v1860_v28 }
  0x65   :  { %1635 = vmatmul.mubr.msk.f32.vlgmr.msra.gmra.mrb[6].mxu0 %vm832_vm6, %v2389_v11 }
  0x66   :  { %1638 = vmatmul.mubr.msk.f32.vlgmr.msra.gmra.mrb[6].mxu1 %vm832_vm6, %v2389_v11 }
 0x114   :  { %v951_v49 = vpop.f32.mrb[0].mxu0 }
 0x115   :  { %v1453_v52 = vmax.f32 %v951_v49, 0.0  ;;  %v1022_v53 = vpop.f32.mrb[0].mxu1  ;;  %v953_v54 = vpop.f32.mrb[1].mxu0 }
 0x116   :  { %v1455_v55 = vmax.f32 %v1022_v53, 0.0  ;;  %v1454_v50 = vmax.f32 %v953_v54, 0.0  ;;  %v1024_v51 = vpop.f32.mrb[1].mxu1 }
 0x117   :  { %v1456_v57 = vmax.f32 %v1024_v51, 0.0 }
 0x118   :  { %v1485_v58 = vcombine.low %v1453_v52, %v1454_v50 }
 0x119   :  { %v1486_v59 = vcombine.low %v1455_v55, %v1456_v57 }
 0x11a   :  { %v1495_v60 = vrot.slane %v1485_v58, %v1494_v56 }
 0x11b   :  { %v1502_v61 = vrot.slane %v1486_v59, %v1494_v56 }
 0x11d   :  { %v1517_v62 = vcombine.low %v1495_v60, %v1502_v61 }
 0x11f   :  { %v1525_v13 = vrot.slane %v1517_v62, %v1494_v56 }
 0x120   :  { %v1093_v11 = vpop.f32.mrb[2].mxu0 }
 0x121   :  { %v1457_v63 = vmax.f32 %v1093_v11, 0.0  ;;  %v1164_v0 = vpop.f32.mrb[2].mxu1  ;;  %v1095_v1 = vpop.f32.mrb[3].mxu0 }
 0x122   :  { %v1459_v2 = vmax.f32 %v1164_v0, 0.0  ;;  %v1458_v4 = vmax.f32 %v1095_v1, 0.0  ;;  %v1166_v5 = vpop.f32.mrb[3].mxu1 }
 0x123   :  { %v1460_v6 = vmax.f32 %v1166_v5, 0.0 }
 0x124   :  { %v1487_v7 = vcombine.low %v1457_v63, %v1458_v4 }
 0x125   :  { %v1488_v8 = vcombine.low %v1459_v2, %v1460_v6 }
 0x126   :  { %v1509_v9 = vrot.slane %v1487_v7, %v1494_v56 }
 0x127   :  { %v1516_v10 = vrot.slane %v1488_v8, %v1494_v56 }
 0x129   :  { %v1518_v12 = vcombine.low %v1509_v9, %v1516_v10 }
 0x12b   :  { %v1532_v14 = vrot.slane %v1518_v12, %v1494_v56 }
 0x12c   :  { %v1235_v15 = vpop.f32.mrb[4].mxu0 }
 0x12d   :  { %v1533_v16 = vcombine.low %v1525_v13, %v1532_v14  ;;  %v1461_v17 = vmax.f32 %v1235_v15, 0.0  ;;  %v1306_v18 = vpop.f32.mrb[4].mxu1  ;;  %v1237_v19 = vpop.f32.mrb[5].mxu0 }
 0x12e   :  { %v1463_v20 = vmax.f32 %v1306_v18, 0.0  ;;  %v1462_v21 = vmax.f32 %v1237_v19, 0.0  ;;  %v1308_v22 = vpop.f32.mrb[5].mxu1 }
 0x12f   :  { %1585 = vst [vmem:[%s2629_s4] sm:$0xff] %v1533_v16  ;;  %v1464_v23 = vmax.f32 %v1308_v22, 0.0 }
 0x130   :  { %v1534_v24 = vcombine.low %v1461_v17, %v1462_v21 }
 0x131   :  { %v1535_v25 = vcombine.low %v1463_v20, %v1464_v23 }
 0x132   :  { %v1544_v26 = vrot.slane %v1534_v24, %v1494_v56 }
 0x133   :  { %v1551_v27 = vrot.slane %v1535_v25, %v1494_v56 }
 0x135   :  { %v1566_v29 = vcombine.low %v1544_v26, %v1551_v27 }
 0x137   :  { %v1574_v43 = vrot.slane %v1566_v29, %v1494_v56 }
 0x138   :  { %v1377_v30 = vpop.f32.mrb[6].mxu0 }
 0x139   :  { %v1465_v31 = vmax.f32 %v1377_v30, 0.0  ;;  %v1448_v32 = vpop.f32.mrb[6].mxu1  ;;  %v1379_v33 = vpop.f32.mrb[7].mxu0 }
 0x13a   :  { %v1467_v34 = vmax.f32 %v1448_v32, 0.0  ;;  %v1466_v35 = vmax.f32 %v1379_v33, 0.0  ;;  %v1450_v36 = vpop.f32.mrb[7].mxu1 }
 0x13b   :  { %v1468_v37 = vmax.f32 %v1450_v36, 0.0 }
 0x13c   :  { %v1536_v38 = vcombine.low %v1465_v31, %v1466_v35 }
 0x13d   :  { %v1537_v39 = vcombine.low %v1467_v34, %v1468_v37 }
 0x13e   :  { %v1558_v40 = vrot.slane %v1536_v38, %v1494_v56 }
 0x13f   :  { %v1565_v41 = vrot.slane %v1537_v39, %v1494_v56 }
 0x141   :  { %v1567_v42 = vcombine.low %v1558_v40, %v1565_v41 }
 0x143   :  { %v1581_v44 = vrot.slane %v1567_v42, %v1494_v56 }
 0x145   :  { %v1582_v28 = vcombine.low %v1574_v43, %v1581_v44 }
 0x147   :  { %1586 = vst [vmem:[%s2629_s4 + $0x8] sm:$0xff] %v1582_v28 }

</bundles_post_ra>
